<compile_context>
chip_gen: v5e
topology: v5e:2x2
jax: 0.10.0
libtpu: 0.0.40
codegen_flags: <defaults>
</compile_context>

<pallas_src>
import numpy as np
import jax
import jax.numpy as jnp
from jax.experimental import pallas as pl
from jax.experimental.pallas import tpu as pltpu

# ----------------------------- model config ---------------------------------
B = 2                        # batch
C, H, W = 3, 16, 16          # image (NCHW)
PS = 8                       # patch size
GH, GW = H // PS, W // PS
NPATCH = GH * GW             # 4 patches
PD = C * PS * PS             # 192 flattened patch dim
D = 32                       # encoder width  (decoder width equals D here)
NH, HD = 4, 32 // 4          # heads / head dim
MLP_D = 4 * D
N_ENC = 2                    # encoder transformer blocks
N_DEC = 1                    # decoder transformer blocks
N_BLOCKS = N_ENC + N_DEC     # all blocks share shapes (dec width == enc width)
MASK_RATIO = 0.5
LKEEP = int(NPATCH * (1.0 - MASK_RATIO))   # 2 visible patches / example
LN_EPS = 1e-6

T_E = B * (1 + LKEEP)        # fused encoder token count  (6)
T_D = B * (1 + NPATCH)       # fused decoder token count  (10)

assert D == NH * HD

global_last_result = (None, None)

# ------------------- packed slab layouts (row offsets) -----------------------
# per-mask descriptor slab (48, 32): every component starts at row 8k, col 0
MS_ENC, MS_DEC, MS_DMASK, MS_LOSS = 0, 8, 24, 40
MASK_ROWS = 48
# static constant slab (56, 32)
CS_HMASK, CS_EBIAS, CS_DBIAS, CS_LATSEL, CS_TOKG = 0, 8, 16, 32, 40
CONST_ROWS = 56


# ------------------------- static host constants -----------------------------
def _host_gather_maps():
    e_enc = np.zeros((T_E, B * LKEEP), np.float32)
    e_dec = np.zeros((T_D, B * NPATCH), np.float32)
    cls_pass = np.zeros((T_D, T_E), np.float32)
    cls_ind = np.zeros((T_E, 1), np.float32)
    for b in range(B):
        cls_ind[b * (1 + LKEEP), 0] = 1.0
        cls_pass[b * (1 + NPATCH), b * (1 + LKEEP)] = 1.0
        for j in range(LKEEP):
            e_enc[b * (1 + LKEEP) + 1 + j, b * LKEEP + j] = 1.0
        for p in range(NPATCH):
            e_dec[b * (1 + NPATCH) + 1 + p, b * NPATCH + p] = 1.0
    return e_enc, e_dec, cls_pass, cls_ind


HOST_E_ENC_NP, HOST_E_DEC_NP, HOST_CLS_PASS_NP, HOST_CLS_IND_NP = _host_gather_maps()
HOST_E_ENC = jnp.asarray(HOST_E_ENC_NP)
HOST_E_DEC = jnp.asarray(HOST_E_DEC_NP)
HOST_CLS_PASS = jnp.asarray(HOST_CLS_PASS_NP)


def _block_bias(t, per):
    grp = np.arange(t) // per
    return np.where(grp[:, None] == grp[None, :], 0.0, -1e9).astype(np.float32)


def _build_const32():
    """One (56, 32) f32 slab holding every static constant the kernel needs."""
    c = np.zeros((CONST_ROWS, D), np.float32)
    for h in range(NH):                                   # head lane masks
        c[CS_HMASK + h, h * HD:(h + 1) * HD] = 1.0
    c[CS_EBIAS:CS_EBIAS + T_E, :T_E] = _block_bias(T_E, 1 + LKEEP)
    c[CS_DBIAS:CS_DBIAS + T_D, :T_D] = _block_bias(T_D, 1 + NPATCH)
    for b in range(B):                                    # cls-row selector
        c[CS_LATSEL + b, b * (1 + LKEEP)] = 1.0
    c[CS_TOKG:CS_TOKG + T_D, :B * NPATCH] = HOST_E_DEC_NP  # patch -> dec-token
    return jnp.asarray(c)


CONST32 = _build_const32()


# -------------------------- packed parameter layout ---------------------------
def _build_vec32_layout():
    off, o = {}, 0

    def add(name, n):
        nonlocal o
        off[name] = (o, n)
        o += n

    add("pe_bias_pos", B * NPATCH)      # b_pe + pos[1:], tiled over batch
    add("cls_add", T_E)                 # one-hot cls rows * (cls + pos[0])
    for l in range(N_BLOCKS):
        for nm in ("ln1_w", "ln1_b", "bq", "bk", "bv", "bo",
                   "ln2_w", "ln2_b", "b2"):
            add(f"{nm}{l}", 1)
    add("e_nrm_w", 1); add("e_nrm_b", 1)
    add("b_de", 1); add("mask_tok", 1)
    add("dpos_tiled", B * (1 + NPATCH))
    add("d_nrm_w", 1); add("d_nrm_b", 1)
    return off, o


VEC32_OFF, VEC32_ROWS = _build_vec32_layout()


def pack_params(p):
    """Pack the ~40 small parameter tensors into 7 slabs (weights in bf16)."""
    wd = jnp.bfloat16
    mats = []
    for l in range(N_ENC):
        wqkv = p["e_wqkv"][l]
        mats += [wqkv[:, :D], wqkv[:, D:2 * D], wqkv[:, 2 * D:], p["e_wo"][l]]
    for l in range(N_DEC):
        wqkv = p["d_wqkv"][l]
        mats += [wqkv[:, :D], wqkv[:, D:2 * D], wqkv[:, 2 * D:], p["d_wo"][l]]
    mats.append(p["w_de"])
    mat32 = jnp.stack(mats).astype(wd)                             # (13, 32, 32)
    w1s = jnp.concatenate([p["e_w1"], p["d_w1"]], 0).astype(wd)    # (3, 32, 128)
    w2s = jnp.concatenate([p["e_w2"], p["d_w2"]], 0).astype(wd)    # (3, 128, 32)
    vec128 = jnp.concatenate([p["e_b1"], p["d_b1"]], 0)            # (3, 1, 128) f32
    w_pe = p["w_pe"].astype(wd)                                    # (192, 32)
    wdp = jnp.concatenate([p["w_dp"], p["b_dp"]], 0).astype(wd)    # (33, 192)

    cls_add = jnp.asarray(HOST_CLS_IND_NP) * (p["cls"] + p["pos"][0:1])  # (T_E, D)
    rows = [jnp.tile(p["b_pe"] + p["pos"][1:], (B, 1)),            # (B*N, 32)
            cls_add]                                               # (T_E, 32)
    for l in range(N_ENC):
        bqkv = p["e_bqkv"][l]
        rows += [p["e_ln1_w"][l], p["e_ln1_b"][l],
                 bqkv[:, :D], bqkv[:, D:2 * D], bqkv[:, 2 * D:],
                 p["e_bo"][l], p["e_ln2_w"][l], p["e_ln2_b"][l], p["e_b2"][l]]
    for l in range(N_DEC):
        bqkv = p["d_bqkv"][l]
        rows += [p["d_ln1_w"][l], p["d_ln1_b"][l],
                 bqkv[:, :D], bqkv[:, D:2 * D], bqkv[:, 2 * D:],
                 p["d_bo"][l], p["d_ln2_w"][l], p["d_ln2_b"][l], p["d_b2"][l]]
    rows += [p["e_nrm_w"], p["e_nrm_b"], p["b_de"], p["mask_tok"],
             jnp.tile(p["dpos"], (B, 1)), p["d_nrm_w"], p["d_nrm_b"]]
    vec32 = jnp.concatenate(rows, 0)                               # (57, 32) f32
    assert vec32.shape == (VEC32_ROWS, D)
    return dict(mat32=mat32, w1s=w1s, w2s=w2s, vec128=vec128,
                vec32=vec32, w_pe=w_pe, wdp=wdp)


# --------------------------- shared fused MAE math ---------------------------
def _mae_fused_math(patches, mslab, consts, mat32, w1s, w2s, vec128, vec32,
                    w_pe, wdp):
    """MAE forward for the whole fused batch (one mask set).

    patches : (B*N, PD)    mslab : (MASK_ROWS, D)    consts : (CONST_ROWS, D)
    returns decoder tokens (T_D, PD), latent CLS rows (B, D), loss num (B, 1).
    """
    f32 = jnp.float32

    # -- unpack per-mask descriptors (static slices of the loaded slab) --
    enc_map = mslab[MS_ENC:MS_ENC + T_E, :B * NPATCH]           # (T_E, B*N)
    dec_map = mslab[MS_DEC:MS_DEC + T_D, :T_E]                  # (T_D, T_E)
    dmask = mslab[MS_DMASK:MS_DMASK + T_D, :1]                  # (T_D, 1)
    loss_map = mslab[MS_LOSS:MS_LOSS + B, :T_D]                 # (B, T_D)
    # -- static constants --
    hmask = consts[CS_HMASK:CS_HMASK + NH, :]                   # (NH, D)
    enc_bias = consts[CS_EBIAS:CS_EBIAS + T_E, :T_E]            # (T_E, T_E)
    dec_bias = consts[CS_DBIAS:CS_DBIAS + T_D, :T_D]            # (T_D, T_D)
    lat_sel = consts[CS_LATSEL:CS_LATSEL + B, :T_E]             # (B, T_E)
    tok_g = consts[CS_TOKG:CS_TOKG + T_D, :B * NPATCH]          # (T_D, B*N)

    def mm(a, w):                         # bf16 MXU matmul, f32 accumulation
        return jnp.dot(a.astype(jnp.bfloat16), w.astype(jnp.bfloat16),
                       preferred_element_type=f32)

    def v32(name):
        o, n = VEC32_OFF[name]
        return vec32[o:o + n, :]

    def ln(x, wname, bname):
        mu = jnp.mean(x, axis=-1, keepdims=True)
        var = jnp.mean((x - mu) ** 2, axis=-1, keepdims=True)
        return (x - mu) * jax.lax.rsqrt(var + LN_EPS) * v32(wname) + v32(bname)

    def attn(x, l, bias):
        wq, wk, wv, wo = (mat32[4 * l + i] for i in range(4))
        q = mm(x, wq) + v32(f"bq{l}")
        k = mm(x, wk) + v32(f"bk{l}")
        v = mm(x, wv) + v32(f"bv{l}")
        scale = 1.0 / float(HD) ** 0.5
        ctx = jnp.zeros_like(q)
        for h in range(NH):               # heads via disjoint lane masks
            hm = hmask[h:h + 1, :]                                    # (1, D)
            s = jnp.einsum("td,sd->ts", q * hm, k,
                           preferred_element_type=f32) * scale + bias
            p = jax.nn.softmax(s, axis=-1)
            ctx = ctx + jnp.dot(p, v, preferred_element_type=f32) * hm
        return mm(ctx, wo) + v32(f"bo{l}")

    def mlp(x, l):
        h = mm(x, w1s[l]) + vec128[l]
        # TODO(synk): PyTorch nn.GELU defaults to exact erf; tanh approx used here.
        h = jax.nn.gelu(h, approximate=True)
        return mm(h, w2s[l]) + v32(f"b2{l}")

    # ---- encoder (batch folded on the token axis) ----
    x_all = mm(patches, w_pe) + v32("pe_bias_pos")                    # (B*N, D)
    x = jnp.dot(enc_map, x_all, preferred_element_type=f32) + v32("cls_add")
    for l in range(N_ENC):
        x = x + attn(ln(x, f"ln1_w{l}", f"ln1_b{l}"), l, enc_bias)
        x = x + mlp(ln(x, f"ln2_w{l}", f"ln2_b{l}"), l)
    latent = ln(x, "e_nrm_w", "e_nrm_b")                              # (T_E, D)
    lat_cls = jnp.dot(lat_sel, latent, preferred_element_type=f32)    # (B, D)

    # ---- decoder ----
    y = mm(latent, mat32[4 * N_BLOCKS]) + v32("b_de")                 # (T_E, D)
    z = jnp.dot(dec_map, y, preferred_element_type=f32)
    z = z + dmask * v32("mask_tok") + v32("dpos_tiled")               # (T_D, D)
    for j in range(N_DEC):
        l = N_ENC + j
        z = z + attn(ln(z, f"ln1_w{l}", f"ln1_b{l}"), l, dec_bias)
        z = z + mlp(ln(z, f"ln2_w{l}", f"ln2_b{l}"), l)
    z = ln(z, "d_nrm_w", "d_nrm_b")
    pred_tok = mm(z, wdp[:D]) + wdp[D:D + 1].astype(f32)              # (T_D, PD)

    # ---- masked-MSE numerator per example (token space; CLS rows masked) ----
    patches_tok = jnp.dot(tok_g, patches, preferred_element_type=f32)  # (T_D, PD)
    per_tok = jnp.mean((pred_tok - patches_tok) ** 2, axis=-1, keepdims=True)
    lnum = jnp.dot(loss_map, per_tok, preferred_element_type=f32)      # (B, 1)
    return pred_tok, lat_cls, lnum


# ------------------------------ Pallas kernel --------------------------------
def _mae_kernel(patches_ref, mslab_ref, const_ref, mat32_ref, w1s_ref, w2s_ref,
                vec128_ref, vec32_ref, wpe_ref, wdp_ref,
                pred_ref, lat_ref, lnum_ref):
    pred, lat, lnum = _mae_fused_math(
        patches_ref[...], mslab_ref[0], const_ref[...], mat32_ref[...],
        w1s_ref[...], w2s_ref[...], vec128_ref[...], vec32_ref[...],
        wpe_ref[...], wdp_ref[...])
    # TODO(synk): the second mask set's pred is also written (discarded by the
    # wrapper); skipping it would need a separate out layout for step 0 only.
    pred_ref[0] = pred.astype(pred_ref.dtype)
    lat_ref[0] = lat.astype(lat_ref.dtype)
    lnum_ref[0] = lnum.astype(lnum_ref.dtype)


def _specs(n_masks):
    shared2 = lambda m: (0, 0)
    shared3 = lambda m: (0, 0, 0)
    per_mask = lambda m: (m, 0, 0)
    in_specs = [
        pl.BlockSpec((B * NPATCH, PD), shared2),           # patches (shared)
        pl.BlockSpec((1, MASK_ROWS, D), per_mask),         # per-mask descriptor slab
        pl.BlockSpec((CONST_ROWS, D), shared2),            # static constant slab
        pl.BlockSpec((4 * N_BLOCKS + 1, D, D), shared3),   # mat32 slab
        pl.BlockSpec((N_BLOCKS, D, MLP_D), shared3),       # w1 slab
        pl.BlockSpec((N_BLOCKS, MLP_D, D), shared3),       # w2 slab
        pl.BlockSpec((N_BLOCKS, 1, MLP_D), shared3),       # mlp bias slab
        pl.BlockSpec((VEC32_ROWS, D), shared2),            # vec32 slab
        pl.BlockSpec((PD, D), shared2),                    # w_pe
        pl.BlockSpec((D + 1, PD), shared2),                # w_dp | b_dp
    ]
    out_specs = [
        pl.BlockSpec((1, T_D, PD), per_mask),
        pl.BlockSpec((1, B, D), per_mask),
        pl.BlockSpec((1, B, 1), per_mask),
    ]
    out_shape = [
        jax.ShapeDtypeStruct((n_masks, T_D, PD), jnp.float32),
        jax.ShapeDtypeStruct((n_masks, B, D), jnp.float32),
        jax.ShapeDtypeStruct((n_masks, B, 1), jnp.float32),
    ]
    return in_specs, out_specs, out_shape


def mae_apply_pallas(packed, patches_flat, mslabs):
    n_masks = mslabs.shape[0]
    in_specs, out_specs, out_shape = _specs(n_masks)
    return pl.pallas_call(
        _mae_kernel,
        out_shape=out_shape,
        grid_spec=pltpu.PrefetchScalarGridSpec(
            num_scalar_prefetch=0,
            grid=(n_masks,),
            in_specs=in_specs,
            out_specs=out_specs,
        ),
        compiler_params=pltpu.CompilerParams(
            dimension_semantics=("parallel",)),   # 2 TCs on v7x take one mask each
    )(patches_flat, mslabs, CONST32,
      packed["mat32"], packed["w1s"], packed["w2s"], packed["vec128"],
      packed["vec32"], packed["w_pe"], packed["wdp"])


def mae_apply_ref(packed, patches_flat, mslabs):
    """Pure-JAX reference sharing the same math (validation only)."""
    preds, lats, lnums = [], [], []
    for m in range(mslabs.shape[0]):
        p, l, n = _mae_fused_math(
            patches_flat, mslabs[m], CONST32,
            packed["mat32"], packed["w1s"], packed["w2s"], packed["vec128"],
            packed["vec32"], packed["w_pe"], packed["wdp"])
        preds.append(p); lats.append(l); lnums.append(n)
    return jnp.stack(preds), jnp.stack(lats), jnp.stack(lnums)


# ------------------------------- host glue -----------------------------------
def patchify(imgs):
    b = imgs.shape[0]
    x = imgs.reshape(b, C, GH, PS, GW, PS)
    x = jnp.einsum("nchpwq->nhwpqc", x)
    return x.reshape(b, NPATCH, PS * PS * C)


def _block_diag(x):
    """(B, r, c) -> (B*r, B*c) block-diagonal."""
    bsz, r, c = x.shape
    eye = jnp.eye(bsz, dtype=x.dtype)
    return (x[:, :, None, :] * eye[:, None, :, None]).reshape(bsz * r, bsz * c)


def make_mask_slab(key):
    """One random mask set for the batch, packed into a (MASK_ROWS, D) slab."""
    noise = jax.random.uniform(key, (B, NPATCH))
    ids_shuffle = jnp.argsort(noise, axis=1)
    ids_restore = jnp.argsort(ids_shuffle, axis=1)
    ids_keep = ids_shuffle[:, :LKEEP]
    mask = jnp.ones((B, NPATCH), jnp.float32).at[:, :LKEEP].set(0.0)
    mask = jnp.take_along_axis(mask, ids_restore, axis=1)             # 0 keep, 1 drop
    sel = jax.nn.one_hot(ids_keep, NPATCH, dtype=jnp.float32)         # (B,L,N)
    restore = jax.nn.one_hot(ids_restore, NPATCH, dtype=jnp.float32)  # (B,N,N)

    enc_map = HOST_E_ENC @ _block_diag(sel)                           # (T_E, B*N)
    dec_map = (HOST_E_DEC @ _block_diag(restore[:, :, :LKEEP])
               @ HOST_E_ENC.T + HOST_CLS_PASS)                        # (T_D, T_E)
    dec_mask = HOST_E_DEC @ mask.reshape(B * NPATCH, 1)               # (T_D, 1)
    loss_tok = _block_diag(mask[:, None, :]) @ HOST_E_DEC.T           # (B, T_D)

    slab = jnp.zeros((MASK_ROWS, D), jnp.float32)
    slab = slab.at[MS_ENC:MS_ENC + T_E, :B * NPATCH].set(enc_map)
    slab = slab.at[MS_DEC:MS_DEC + T_D, :T_E].set(dec_map)
    slab = slab.at[MS_DMASK:MS_DMASK + T_D, :1].set(dec_mask)
    slab = slab.at[MS_LOSS:MS_LOSS + B, :T_D].set(loss_tok)
    return slab


def init_params(key):
    def nrm(k, shape, scale=0.02):
        return scale * jax.random.normal(k, shape, jnp.float32)
    ks = iter(jax.random.split(key, 32))
    f32 = jnp.float32
    p = {}
    p["w_pe"] = nrm(next(ks), (PD, D)); p["b_pe"] = jnp.zeros((1, D), f32)
    p["cls"] = nrm(next(ks), (1, D)); p["pos"] = nrm(next(ks), (1 + NPATCH, D))
    p["e_ln1_w"] = jnp.ones((N_ENC, 1, D), f32); p["e_ln1_b"] = jnp.zeros((N_ENC, 1, D), f32)
    p["e_wqkv"] = nrm(next(ks), (N_ENC, D, 3 * D)); p["e_bqkv"] = jnp.zeros((N_ENC, 1, 3 * D), f32)
    p["e_wo"] = nrm(next(ks), (N_ENC, D, D)); p["e_bo"] = jnp.zeros((N_ENC, 1, D), f32)
    p["e_ln2_w"] = jnp.ones((N_ENC, 1, D), f32); p["e_ln2_b"] = jnp.zeros((N_ENC, 1, D), f32)
    p["e_w1"] = nrm(next(ks), (N_ENC, D, MLP_D)); p["e_b1"] = jnp.zeros((N_ENC, 1, MLP_D), f32)
    p["e_w2"] = nrm(next(ks), (N_ENC, MLP_D, D)); p["e_b2"] = jnp.zeros((N_ENC, 1, D), f32)
    p["e_nrm_w"] = jnp.ones((1, D), f32); p["e_nrm_b"] = jnp.zeros((1, D), f32)
    p["w_de"] = nrm(next(ks), (D, D)); p["b_de"] = jnp.zeros((1, D), f32)
    p["mask_tok"] = nrm(next(ks), (1, D)); p["dpos"] = nrm(next(ks), (1 + NPATCH, D))
    p["d_ln1_w"] = jnp.ones((N_DEC, 1, D), f32); p["d_ln1_b"] = jnp.zeros((N_DEC, 1, D), f32)
    p["d_wqkv"] = nrm(next(ks), (N_DEC, D, 3 * D)); p["d_bqkv"] = jnp.zeros((N_DEC, 1, 3 * D), f32)
    p["d_wo"] = nrm(next(ks), (N_DEC, D, D)); p["d_bo"] = jnp.zeros((N_DEC, 1, D), f32)
    p["d_ln2_w"] = jnp.ones((N_DEC, 1, D), f32); p["d_ln2_b"] = jnp.zeros((N_DEC, 1, D), f32)
    p["d_w1"] = nrm(next(ks), (N_DEC, D, MLP_D)); p["d_b1"] = jnp.zeros((N_DEC, 1, MLP_D), f32)
    p["d_w2"] = nrm(next(ks), (N_DEC, MLP_D, D)); p["d_b2"] = jnp.zeros((N_DEC, 1, D), f32)
    p["d_nrm_w"] = jnp.ones((1, D), f32); p["d_nrm_b"] = jnp.zeros((1, D), f32)
    p["w_dp"] = nrm(next(ks), (D, PD)); p["b_dp"] = jnp.zeros((1, PD), f32)
    return p


class MaeTrainModel:
    """JAX/Pallas equivalent of the PyTorch MaeTrainModel forward."""

    def __init__(self, params, train_images, valid_images, use_contrast_loss=True):
        self.params = params
        self.packed = pack_params(params)          # repack if params change
        self.train_images = train_images           # dataset.batch_get_train_device
        self.valid_images = valid_images           # dataset.batch_get_valid_device
        self.use_contrast_loss = use_contrast_loss

    def forward(self, device, ids, mask_key, is_train=True, use_pallas=True):
        images = (self.train_images if is_train else self.valid_images)[ids]
        patches = patchify(images)                                   # (B, N, PD)
        patches_flat = patches.reshape(B * NPATCH, PD)

        n_masks = 2 if self.use_contrast_loss else 1
        keys = jax.random.split(mask_key, 2)
        mslabs = jnp.stack([make_mask_slab(keys[i]) for i in range(n_masks)])

        apply_fn = mae_apply_pallas if use_pallas else mae_apply_ref
        pred_tok, lat_cls, lnum = apply_fn(self.packed, patches_flat, mslabs)

        mask_sum = jnp.sum(mslabs[:, MS_LOSS:MS_LOSS + B, :], axis=(1, 2))
        rec_loss = jnp.sum(lnum[:, :, 0], axis=1) / mask_sum          # (n_masks,)
        pred1 = pred_tok[0].reshape(B, 1 + NPATCH, PD)[:, 1:, :]      # drop CLS rows
        latent1 = lat_cls[0]
        if self.use_contrast_loss:
            latent2 = lat_cls[1]
            loss = (rec_loss[0] + rec_loss[1]) / 2
        else:
            latent2 = None
            loss = rec_loss[0]
        if device == 0:
            global global_last_result
            # TODO(synk): .detach() has no JAX equivalent (no implicit autograd tape).
            global_last_result = (images[0], pred1[0])
        return loss, latent1, latent2

    __call__ = forward


# --------------------------------- main --------------------------------------
if __name__ == "__main__":
    key = jax.random.PRNGKey(0)
    kd, kp, km = jax.random.split(key, 3)

    num_train = 8
    train_images = jax.random.normal(kd, (num_train, C, H, W), jnp.float32)
    params = init_params(kp)

    model = MaeTrainModel(params, train_images, train_images, use_contrast_loss=True)
    ids = jnp.array([1, 5], dtype=jnp.int32)

    loss, latent1, latent2 = model(0, ids, km, is_train=True)
    jax.block_until_ready((loss, latent1, latent2))

    # validate against a pure-JAX reference with identical masks / params
    loss_r, lat1_r, lat2_r = model.forward(0, ids, km, is_train=True, use_pallas=False)
    jax.block_until_ready((loss_r, lat1_r, lat2_r))

    assert np.isfinite(np.asarray(loss)).all()
    assert np.allclose(np.asarray(loss), np.asarray(loss_r), rtol=2e-2, atol=2e-2)
    assert np.allclose(np.asarray(latent1), np.asarray(lat1_r), rtol=2e-2, atol=2e-2)
    assert np.allclose(np.asarray(latent2), np.asarray(lat2_r), rtol=2e-2, atol=2e-2)
    assert latent1.shape == (B, D) and latent2.shape == (B, D)

    print("KERNEL_OK")
</pallas_src>

<mosaic_0001>
module attributes {stable_mosaic.version = 11 : i64} {
  func.func @_mae_kernel(%arg0: i32, %arg1: memref<8x192xf32, #tpu.memory_space<vmem>>, %arg2: memref<1x48x32xf32, #tpu.memory_space<vmem>>, %arg3: memref<56x32xf32, #tpu.memory_space<vmem>>, %arg4: memref<13x32x32xbf16, #tpu.memory_space<vmem>>, %arg5: memref<3x32x128xbf16, #tpu.memory_space<vmem>>, %arg6: memref<3x128x32xbf16, #tpu.memory_space<vmem>>, %arg7: memref<3x1x128xf32, #tpu.memory_space<vmem>>, %arg8: memref<57x32xf32, #tpu.memory_space<vmem>>, %arg9: memref<192x32xbf16, #tpu.memory_space<vmem>>, %arg10: memref<33x192xbf16, #tpu.memory_space<vmem>>, %arg11: memref<1x10x192xf32, #tpu.memory_space<vmem>>, %arg12: memref<1x2x32xf32, #tpu.memory_space<vmem>>, %arg13: memref<1x2x1xf32, #tpu.memory_space<vmem>>) attributes {dimension_semantics = [#tpu.dimension_semantics<parallel>], iteration_bounds = array<i64: 2>, scalar_prefetch = 0 : i64, scratch_operands = 0 : i64, tpu.core_type = #tpu.core_type<tc>, window_params = [{pipeline_mode = #tpu.pipeline_mode<synchronous>, transform_indices = @transform_0, window_bounds = array<i64: 8, 192>}, {transform_indices = @transform_1, window_bounds = array<i64: 1, 48, 32>}, {pipeline_mode = #tpu.pipeline_mode<synchronous>, transform_indices = @transform_2, window_bounds = array<i64: 56, 32>}, {pipeline_mode = #tpu.pipeline_mode<synchronous>, transform_indices = @transform_3, window_bounds = array<i64: 13, 32, 32>}, {pipeline_mode = #tpu.pipeline_mode<synchronous>, transform_indices = @transform_4, window_bounds = array<i64: 3, 32, 128>}, {pipeline_mode = #tpu.pipeline_mode<synchronous>, transform_indices = @transform_5, window_bounds = array<i64: 3, 128, 32>}, {pipeline_mode = #tpu.pipeline_mode<synchronous>, transform_indices = @transform_6, window_bounds = array<i64: 3, 1, 128>}, {pipeline_mode = #tpu.pipeline_mode<synchronous>, transform_indices = @transform_7, window_bounds = array<i64: 57, 32>}, {pipeline_mode = #tpu.pipeline_mode<synchronous>, transform_indices = @transform_8, window_bounds = array<i64: 192, 32>}, {pipeline_mode = #tpu.pipeline_mode<synchronous>, transform_indices = @transform_9, window_bounds = array<i64: 33, 192>}, {transform_indices = @transform_10, window_bounds = array<i64: 1, 10, 192>}, {transform_indices = @transform_11, window_bounds = array<i64: 1, 2, 32>}, {transform_indices = @transform_12, window_bounds = array<i64: 1, 2, 1>}]} {
    %c0 = arith.constant 0 : index
    %c0_0 = arith.constant 0 : index
    %0 = vector.load %arg1[%c0, %c0_0] : memref<8x192xf32, #tpu.memory_space<vmem>>, vector<8x192xf32>
    %c0_1 = arith.constant 0 : index
    %c0_2 = arith.constant 0 : index
    %c0_3 = arith.constant 0 : index
    %1 = vector.load %arg2[%c0_1, %c0_2, %c0_3] : memref<1x48x32xf32, #tpu.memory_space<vmem>>, vector<1x48x32xf32>
    %2 = vector.shape_cast %1 : vector<1x48x32xf32> to vector<48x32xf32>
    %c0_4 = arith.constant 0 : index
    %c0_5 = arith.constant 0 : index
    %3 = vector.load %arg3[%c0_4, %c0_5] : memref<56x32xf32, #tpu.memory_space<vmem>>, vector<56x32xf32>
    %c0_6 = arith.constant 0 : index
    %c0_7 = arith.constant 0 : index
    %c0_8 = arith.constant 0 : index
    %4 = vector.load %arg4[%c0_6, %c0_7, %c0_8] : memref<13x32x32xbf16, #tpu.memory_space<vmem>>, vector<13x32x32xbf16>
    %c0_9 = arith.constant 0 : index
    %c0_10 = arith.constant 0 : index
    %c0_11 = arith.constant 0 : index
    %5 = vector.load %arg5[%c0_9, %c0_10, %c0_11] : memref<3x32x128xbf16, #tpu.memory_space<vmem>>, vector<3x32x128xbf16>
    %c0_12 = arith.constant 0 : index
    %c0_13 = arith.constant 0 : index
    %c0_14 = arith.constant 0 : index
    %6 = vector.load %arg6[%c0_12, %c0_13, %c0_14] : memref<3x128x32xbf16, #tpu.memory_space<vmem>>, vector<3x128x32xbf16>
    %c0_15 = arith.constant 0 : index
    %c0_16 = arith.constant 0 : index
    %c0_17 = arith.constant 0 : index
    %7 = vector.load %arg7[%c0_15, %c0_16, %c0_17] : memref<3x1x128xf32, #tpu.memory_space<vmem>>, vector<3x1x128xf32>
    %c0_18 = arith.constant 0 : index
    %c0_19 = arith.constant 0 : index
    %8 = vector.load %arg8[%c0_18, %c0_19] : memref<57x32xf32, #tpu.memory_space<vmem>>, vector<57x32xf32>
    %c0_20 = arith.constant 0 : index
    %c0_21 = arith.constant 0 : index
    %9 = vector.load %arg9[%c0_20, %c0_21] : memref<192x32xbf16, #tpu.memory_space<vmem>>, vector<192x32xbf16>
    %c0_22 = arith.constant 0 : index
    %c0_23 = arith.constant 0 : index
    %10 = vector.load %arg10[%c0_22, %c0_23] : memref<33x192xbf16, #tpu.memory_space<vmem>>, vector<33x192xbf16>
    %11 = vector.extract_strided_slice %2 {offsets = [0, 0], sizes = [6, 8], strides = [1, 1]} : vector<48x32xf32> to vector<6x8xf32>
    %12 = vector.extract_strided_slice %2 {offsets = [8, 0], sizes = [10, 6], strides = [1, 1]} : vector<48x32xf32> to vector<10x6xf32>
    %13 = vector.extract_strided_slice %2 {offsets = [24, 0], sizes = [10, 1], strides = [1, 1]} : vector<48x32xf32> to vector<10x1xf32>
    %14 = vector.extract_strided_slice %2 {offsets = [40, 0], sizes = [2, 10], strides = [1, 1]} : vector<48x32xf32> to vector<2x10xf32>
    %15 = vector.extract_strided_slice %3 {offsets = [0, 0], sizes = [4, 32], strides = [1, 1]} : vector<56x32xf32> to vector<4x32xf32>
    %16 = vector.extract_strided_slice %3 {offsets = [8, 0], sizes = [6, 6], strides = [1, 1]} : vector<56x32xf32> to vector<6x6xf32>
    %17 = vector.extract_strided_slice %3 {offsets = [16, 0], sizes = [10, 10], strides = [1, 1]} : vector<56x32xf32> to vector<10x10xf32>
    %18 = vector.extract_strided_slice %3 {offsets = [32, 0], sizes = [2, 6], strides = [1, 1]} : vector<56x32xf32> to vector<2x6xf32>
    %19 = vector.extract_strided_slice %3 {offsets = [40, 0], sizes = [10, 8], strides = [1, 1]} : vector<56x32xf32> to vector<10x8xf32>
    %20 = arith.truncf %0 : vector<8x192xf32> to vector<8x192xbf16>
    %cst = arith.constant dense<0.000000e+00> : vector<8x32xf32>
    %21 = tpu.matmul %20, %9, %cst {dimension_numbers = #tpu.dot_dimension_numbers<[1], [0], [0], [1], [0, 0, 1, 1], [], []>} : vector<8x192xbf16>, vector<192x32xbf16>, vector<8x32xf32> -> vector<8x32xf32>
    %22 = vector.extract_strided_slice %8 {offsets = [0, 0], sizes = [8, 32], strides = [1, 1]} : vector<57x32xf32> to vector<8x32xf32>
    %23 = arith.addf %21, %22 : vector<8x32xf32>
    %cst_24 = arith.constant dense<0.000000e+00> : vector<6x32xf32>
    %24 = tpu.matmul %11, %23, %cst_24 {dimension_numbers = #tpu.dot_dimension_numbers<[1], [0], [0], [1], [0, 0, 1, 1], [], []>} : vector<6x8xf32>, vector<8x32xf32>, vector<6x32xf32> -> vector<6x32xf32>
    %25 = vector.extract_strided_slice %8 {offsets = [8, 0], sizes = [6, 32], strides = [1, 1]} : vector<57x32xf32> to vector<6x32xf32>
    %26 = arith.addf %24, %25 : vector<6x32xf32>
    %cst_25 = arith.constant dense<0.000000e+00> : vector<6xf32>
    %27 = vector.multi_reduction <add>, %26, %cst_25 [1] : vector<6x32xf32> to vector<6xf32>
    %28 = vector.shape_cast %27 : vector<6xf32> to vector<6x1xf32>
    %cst_26 = arith.constant 3.200000e+01 : f32
    %29 = vector.broadcast %cst_26 : f32 to vector<6x1xf32>
    %30 = arith.divf %28, %29 : vector<6x1xf32>
    %31 = vector.broadcast %30 : vector<6x1xf32> to vector<6x32xf32>
    %32 = arith.subf %26, %31 : vector<6x32xf32>
    %33 = arith.mulf %32, %32 : vector<6x32xf32>
    %cst_27 = arith.constant dense<0.000000e+00> : vector<6xf32>
    %34 = vector.multi_reduction <add>, %33, %cst_27 [1] : vector<6x32xf32> to vector<6xf32>
    %35 = vector.shape_cast %34 : vector<6xf32> to vector<6x1xf32>
    %cst_28 = arith.constant 3.200000e+01 : f32
    %36 = vector.broadcast %cst_28 : f32 to vector<6x1xf32>
    %37 = arith.divf %35, %36 : vector<6x1xf32>
    %38 = vector.broadcast %30 : vector<6x1xf32> to vector<6x32xf32>
    %39 = arith.subf %26, %38 : vector<6x32xf32>
    %cst_29 = arith.constant 9.99999997E-7 : f32
    %40 = vector.broadcast %cst_29 : f32 to vector<6x1xf32>
    %41 = arith.addf %37, %40 : vector<6x1xf32>
    %42 = math.rsqrt %41 : vector<6x1xf32>
    %43 = vector.broadcast %42 : vector<6x1xf32> to vector<6x32xf32>
    %44 = arith.mulf %39, %43 : vector<6x32xf32>
    %45 = vector.extract_strided_slice %8 {offsets = [14, 0], sizes = [1, 32], strides = [1, 1]} : vector<57x32xf32> to vector<1x32xf32>
    %46 = vector.broadcast %45 : vector<1x32xf32> to vector<6x32xf32>
    %47 = arith.mulf %44, %46 : vector<6x32xf32>
    %48 = vector.extract_strided_slice %8 {offsets = [15, 0], sizes = [1, 32], strides = [1, 1]} : vector<57x32xf32> to vector<1x32xf32>
    %49 = vector.broadcast %48 : vector<1x32xf32> to vector<6x32xf32>
    %50 = arith.addf %47, %49 : vector<6x32xf32>
    %51 = vector.extract_strided_slice %4 {offsets = [0, 0, 0], sizes = [1, 32, 32], strides = [1, 1, 1]} : vector<13x32x32xbf16> to vector<1x32x32xbf16>
    %52 = vector.shape_cast %51 : vector<1x32x32xbf16> to vector<32x32xbf16>
    %53 = vector.extract_strided_slice %4 {offsets = [1, 0, 0], sizes = [1, 32, 32], strides = [1, 1, 1]} : vector<13x32x32xbf16> to vector<1x32x32xbf16>
    %54 = vector.shape_cast %53 : vector<1x32x32xbf16> to vector<32x32xbf16>
    %55 = vector.extract_strided_slice %4 {offsets = [2, 0, 0], sizes = [1, 32, 32], strides = [1, 1, 1]} : vector<13x32x32xbf16> to vector<1x32x32xbf16>
    %56 = vector.shape_cast %55 : vector<1x32x32xbf16> to vector<32x32xbf16>
    %57 = vector.extract_strided_slice %4 {offsets = [3, 0, 0], sizes = [1, 32, 32], strides = [1, 1, 1]} : vector<13x32x32xbf16> to vector<1x32x32xbf16>
    %58 = vector.shape_cast %57 : vector<1x32x32xbf16> to vector<32x32xbf16>
    %59 = arith.truncf %50 : vector<6x32xf32> to vector<6x32xbf16>
    %cst_30 = arith.constant dense<0.000000e+00> : vector<6x32xf32>
    %60 = tpu.matmul %59, %52, %cst_30 {dimension_numbers = #tpu.dot_dimension_numbers<[1], [0], [0], [1], [0, 0, 1, 1], [], []>} : vector<6x32xbf16>, vector<32x32xbf16>, vector<6x32xf32> -> vector<6x32xf32>
    %61 = vector.extract_strided_slice %8 {offsets = [16, 0], sizes = [1, 32], strides = [1, 1]} : vector<57x32xf32> to vector<1x32xf32>
    %62 = vector.broadcast %61 : vector<1x32xf32> to vector<6x32xf32>
    %63 = arith.addf %60, %62 : vector<6x32xf32>
    %64 = arith.truncf %50 : vector<6x32xf32> to vector<6x32xbf16>
    %cst_31 = arith.constant dense<0.000000e+00> : vector<6x32xf32>
    %65 = tpu.matmul %64, %54, %cst_31 {dimension_numbers = #tpu.dot_dimension_numbers<[1], [0], [0], [1], [0, 0, 1, 1], [], []>} : vector<6x32xbf16>, vector<32x32xbf16>, vector<6x32xf32> -> vector<6x32xf32>
    %66 = vector.extract_strided_slice %8 {offsets = [17, 0], sizes = [1, 32], strides = [1, 1]} : vector<57x32xf32> to vector<1x32xf32>
    %67 = vector.broadcast %66 : vector<1x32xf32> to vector<6x32xf32>
    %68 = arith.addf %65, %67 : vector<6x32xf32>
    %69 = arith.truncf %50 : vector<6x32xf32> to vector<6x32xbf16>
    %cst_32 = arith.constant dense<0.000000e+00> : vector<6x32xf32>
    %70 = tpu.matmul %69, %56, %cst_32 {dimension_numbers = #tpu.dot_dimension_numbers<[1], [0], [0], [1], [0, 0, 1, 1], [], []>} : vector<6x32xbf16>, vector<32x32xbf16>, vector<6x32xf32> -> vector<6x32xf32>
    %71 = vector.extract_strided_slice %8 {offsets = [18, 0], sizes = [1, 32], strides = [1, 1]} : vector<57x32xf32> to vector<1x32xf32>
    %72 = vector.broadcast %71 : vector<1x32xf32> to vector<6x32xf32>
    %73 = arith.addf %70, %72 : vector<6x32xf32>
    %cst_33 = arith.constant 0.000000e+00 : f32
    %74 = vector.broadcast %cst_33 : f32 to vector<6x32xf32>
    %75 = vector.extract_strided_slice %15 {offsets = [0, 0], sizes = [1, 32], strides = [1, 1]} : vector<4x32xf32> to vector<1x32xf32>
    %76 = vector.broadcast %75 : vector<1x32xf32> to vector<6x32xf32>
    %77 = arith.mulf %63, %76 : vector<6x32xf32>
    "tpu.trace_start"() <{level = 10 : i32, message = "td,sd->ts"}> : () -> ()
    %cst_34 = arith.constant dense<0.000000e+00> : vector<6x6xf32>
    %78 = tpu.matmul %77, %68, %cst_34 {dimension_numbers = #tpu.dot_dimension_numbers<[1], [1], [0], [0], [0, 0, 1, 0], [], []>} : vector<6x32xf32>, vector<6x32xf32>, vector<6x6xf32> -> vector<6x6xf32>
    "tpu.trace_stop"() : () -> ()
    %cst_35 = arith.constant 0.353553385 : f32
    %79 = vector.broadcast %cst_35 : f32 to vector<6x6xf32>
    %80 = arith.mulf %78, %79 : vector<6x6xf32>
    %81 = arith.addf %80, %16 : vector<6x6xf32>
    %cst_36 = arith.constant dense<0xFF800000> : vector<6xf32>
    %82 = vector.multi_reduction <maximumf>, %81, %cst_36 [1] : vector<6x6xf32> to vector<6xf32>
    %cst_37 = arith.constant 0xFF800000 : f32
    %83 = vector.broadcast %cst_37 : f32 to vector<6xf32>
    %84 = arith.maximumf %83, %82 : vector<6xf32>
    %85 = vector.shape_cast %84 : vector<6xf32> to vector<6x1xf32>
    %86 = vector.broadcast %85 : vector<6x1xf32> to vector<6x6xf32>
    %87 = arith.subf %81, %86 : vector<6x6xf32>
    %88 = math.exp %87 : vector<6x6xf32>
    %cst_38 = arith.constant dense<0.000000e+00> : vector<6xf32>
    %89 = vector.multi_reduction <add>, %88, %cst_38 [1] : vector<6x6xf32> to vector<6xf32>
    %90 = vector.shape_cast %89 : vector<6xf32> to vector<6x1xf32>
    %91 = vector.broadcast %90 : vector<6x1xf32> to vector<6x6xf32>
    %92 = arith.divf %88, %91 : vector<6x6xf32>
    %cst_39 = arith.constant dense<0.000000e+00> : vector<6x32xf32>
    %93 = tpu.matmul %92, %73, %cst_39 {dimension_numbers = #tpu.dot_dimension_numbers<[1], [0], [0], [1], [0, 0, 1, 1], [], []>} : vector<6x6xf32>, vector<6x32xf32>, vector<6x32xf32> -> vector<6x32xf32>
    %94 = vector.broadcast %75 : vector<1x32xf32> to vector<6x32xf32>
    %95 = arith.mulf %93, %94 : vector<6x32xf32>
    %96 = arith.addf %74, %95 : vector<6x32xf32>
    %97 = vector.extract_strided_slice %15 {offsets = [1, 0], sizes = [1, 32], strides = [1, 1]} : vector<4x32xf32> to vector<1x32xf32>
    %98 = vector.broadcast %97 : vector<1x32xf32> to vector<6x32xf32>
    %99 = arith.mulf %63, %98 : vector<6x32xf32>
    "tpu.trace_start"() <{level = 10 : i32, message = "td,sd->ts"}> : () -> ()
    %cst_40 = arith.constant dense<0.000000e+00> : vector<6x6xf32>
    %100 = tpu.matmul %99, %68, %cst_40 {dimension_numbers = #tpu.dot_dimension_numbers<[1], [1], [0], [0], [0, 0, 1, 0], [], []>} : vector<6x32xf32>, vector<6x32xf32>, vector<6x6xf32> -> vector<6x6xf32>
    "tpu.trace_stop"() : () -> ()
    %cst_41 = arith.constant 0.353553385 : f32
    %101 = vector.broadcast %cst_41 : f32 to vector<6x6xf32>
    %102 = arith.mulf %100, %101 : vector<6x6xf32>
    %103 = arith.addf %102, %16 : vector<6x6xf32>
    %cst_42 = arith.constant dense<0xFF800000> : vector<6xf32>
    %104 = vector.multi_reduction <maximumf>, %103, %cst_42 [1] : vector<6x6xf32> to vector<6xf32>
    %cst_43 = arith.constant 0xFF800000 : f32
    %105 = vector.broadcast %cst_43 : f32 to vector<6xf32>
    %106 = arith.maximumf %105, %104 : vector<6xf32>
    %107 = vector.shape_cast %106 : vector<6xf32> to vector<6x1xf32>
    %108 = vector.broadcast %107 : vector<6x1xf32> to vector<6x6xf32>
    %109 = arith.subf %103, %108 : vector<6x6xf32>
    %110 = math.exp %109 : vector<6x6xf32>
    %cst_44 = arith.constant dense<0.000000e+00> : vector<6xf32>
    %111 = vector.multi_reduction <add>, %110, %cst_44 [1] : vector<6x6xf32> to vector<6xf32>
    %112 = vector.shape_cast %111 : vector<6xf32> to vector<6x1xf32>
    %113 = vector.broadcast %112 : vector<6x1xf32> to vector<6x6xf32>
    %114 = arith.divf %110, %113 : vector<6x6xf32>
    %cst_45 = arith.constant dense<0.000000e+00> : vector<6x32xf32>
    %115 = tpu.matmul %114, %73, %cst_45 {dimension_numbers = #tpu.dot_dimension_numbers<[1], [0], [0], [1], [0, 0, 1, 1], [], []>} : vector<6x6xf32>, vector<6x32xf32>, vector<6x32xf32> -> vector<6x32xf32>
    %116 = vector.broadcast %97 : vector<1x32xf32> to vector<6x32xf32>
    %117 = arith.mulf %115, %116 : vector<6x32xf32>
    %118 = arith.addf %96, %117 : vector<6x32xf32>
    %119 = vector.extract_strided_slice %15 {offsets = [2, 0], sizes = [1, 32], strides = [1, 1]} : vector<4x32xf32> to vector<1x32xf32>
    %120 = vector.broadcast %119 : vector<1x32xf32> to vector<6x32xf32>
    %121 = arith.mulf %63, %120 : vector<6x32xf32>
    "tpu.trace_start"() <{level = 10 : i32, message = "td,sd->ts"}> : () -> ()
    %cst_46 = arith.constant dense<0.000000e+00> : vector<6x6xf32>
    %122 = tpu.matmul %121, %68, %cst_46 {dimension_numbers = #tpu.dot_dimension_numbers<[1], [1], [0], [0], [0, 0, 1, 0], [], []>} : vector<6x32xf32>, vector<6x32xf32>, vector<6x6xf32> -> vector<6x6xf32>
    "tpu.trace_stop"() : () -> ()
    %cst_47 = arith.constant 0.353553385 : f32
    %123 = vector.broadcast %cst_47 : f32 to vector<6x6xf32>
    %124 = arith.mulf %122, %123 : vector<6x6xf32>
    %125 = arith.addf %124, %16 : vector<6x6xf32>
    %cst_48 = arith.constant dense<0xFF800000> : vector<6xf32>
    %126 = vector.multi_reduction <maximumf>, %125, %cst_48 [1] : vector<6x6xf32> to vector<6xf32>
    %cst_49 = arith.constant 0xFF800000 : f32
    %127 = vector.broadcast %cst_49 : f32 to vector<6xf32>
    %128 = arith.maximumf %127, %126 : vector<6xf32>
    %129 = vector.shape_cast %128 : vector<6xf32> to vector<6x1xf32>
    %130 = vector.broadcast %129 : vector<6x1xf32> to vector<6x6xf32>
    %131 = arith.subf %125, %130 : vector<6x6xf32>
    %132 = math.exp %131 : vector<6x6xf32>
    %cst_50 = arith.constant dense<0.000000e+00> : vector<6xf32>
    %133 = vector.multi_reduction <add>, %132, %cst_50 [1] : vector<6x6xf32> to vector<6xf32>
    %134 = vector.shape_cast %133 : vector<6xf32> to vector<6x1xf32>
    %135 = vector.broadcast %134 : vector<6x1xf32> to vector<6x6xf32>
    %136 = arith.divf %132, %135 : vector<6x6xf32>
    %cst_51 = arith.constant dense<0.000000e+00> : vector<6x32xf32>
    %137 = tpu.matmul %136, %73, %cst_51 {dimension_numbers = #tpu.dot_dimension_numbers<[1], [0], [0], [1], [0, 0, 1, 1], [], []>} : vector<6x6xf32>, vector<6x32xf32>, vector<6x32xf32> -> vector<6x32xf32>
    %138 = vector.broadcast %119 : vector<1x32xf32> to vector<6x32xf32>
    %139 = arith.mulf %137, %138 : vector<6x32xf32>
    %140 = arith.addf %118, %139 : vector<6x32xf32>
    %141 = vector.extract_strided_slice %15 {offsets = [3, 0], sizes = [1, 32], strides = [1, 1]} : vector<4x32xf32> to vector<1x32xf32>
    %142 = vector.broadcast %141 : vector<1x32xf32> to vector<6x32xf32>
    %143 = arith.mulf %63, %142 : vector<6x32xf32>
    "tpu.trace_start"() <{level = 10 : i32, message = "td,sd->ts"}> : () -> ()
    %cst_52 = arith.constant dense<0.000000e+00> : vector<6x6xf32>
    %144 = tpu.matmul %143, %68, %cst_52 {dimension_numbers = #tpu.dot_dimension_numbers<[1], [1], [0], [0], [0, 0, 1, 0], [], []>} : vector<6x32xf32>, vector<6x32xf32>, vector<6x6xf32> -> vector<6x6xf32>
    "tpu.trace_stop"() : () -> ()
    %cst_53 = arith.constant 0.353553385 : f32
    %145 = vector.broadcast %cst_53 : f32 to vector<6x6xf32>
    %146 = arith.mulf %144, %145 : vector<6x6xf32>
    %147 = arith.addf %146, %16 : vector<6x6xf32>
    %cst_54 = arith.constant dense<0xFF800000> : vector<6xf32>
    %148 = vector.multi_reduction <maximumf>, %147, %cst_54 [1] : vector<6x6xf32> to vector<6xf32>
    %cst_55 = arith.constant 0xFF800000 : f32
    %149 = vector.broadcast %cst_55 : f32 to vector<6xf32>
    %150 = arith.maximumf %149, %148 : vector<6xf32>
    %151 = vector.shape_cast %150 : vector<6xf32> to vector<6x1xf32>
    %152 = vector.broadcast %151 : vector<6x1xf32> to vector<6x6xf32>
    %153 = arith.subf %147, %152 : vector<6x6xf32>
    %154 = math.exp %153 : vector<6x6xf32>
    %cst_56 = arith.constant dense<0.000000e+00> : vector<6xf32>
    %155 = vector.multi_reduction <add>, %154, %cst_56 [1] : vector<6x6xf32> to vector<6xf32>
    %156 = vector.shape_cast %155 : vector<6xf32> to vector<6x1xf32>
    %157 = vector.broadcast %156 : vector<6x1xf32> to vector<6x6xf32>
    %158 = arith.divf %154, %157 : vector<6x6xf32>
    %cst_57 = arith.constant dense<0.000000e+00> : vector<6x32xf32>
    %159 = tpu.matmul %158, %73, %cst_57 {dimension_numbers = #tpu.dot_dimension_numbers<[1], [0], [0], [1], [0, 0, 1, 1], [], []>} : vector<6x6xf32>, vector<6x32xf32>, vector<6x32xf32> -> vector<6x32xf32>
    %160 = vector.broadcast %141 : vector<1x32xf32> to vector<6x32xf32>
    %161 = arith.mulf %159, %160 : vector<6x32xf32>
    %162 = arith.addf %140, %161 : vector<6x32xf32>
    %163 = arith.truncf %162 : vector<6x32xf32> to vector<6x32xbf16>
    %cst_58 = arith.constant dense<0.000000e+00> : vector<6x32xf32>
    %164 = tpu.matmul %163, %58, %cst_58 {dimension_numbers = #tpu.dot_dimension_numbers<[1], [0], [0], [1], [0, 0, 1, 1], [], []>} : vector<6x32xbf16>, vector<32x32xbf16>, vector<6x32xf32> -> vector<6x32xf32>
    %165 = vector.extract_strided_slice %8 {offsets = [19, 0], sizes = [1, 32], strides = [1, 1]} : vector<57x32xf32> to vector<1x32xf32>
    %166 = vector.broadcast %165 : vector<1x32xf32> to vector<6x32xf32>
    %167 = arith.addf %164, %166 : vector<6x32xf32>
    %168 = arith.addf %26, %167 : vector<6x32xf32>
    %cst_59 = arith.constant dense<0.000000e+00> : vector<6xf32>
    %169 = vector.multi_reduction <add>, %168, %cst_59 [1] : vector<6x32xf32> to vector<6xf32>
    %170 = vector.shape_cast %169 : vector<6xf32> to vector<6x1xf32>
    %cst_60 = arith.constant 3.200000e+01 : f32
    %171 = vector.broadcast %cst_60 : f32 to vector<6x1xf32>
    %172 = arith.divf %170, %171 : vector<6x1xf32>
    %173 = vector.broadcast %172 : vector<6x1xf32> to vector<6x32xf32>
    %174 = arith.subf %168, %173 : vector<6x32xf32>
    %175 = arith.mulf %174, %174 : vector<6x32xf32>
    %cst_61 = arith.constant dense<0.000000e+00> : vector<6xf32>
    %176 = vector.multi_reduction <add>, %175, %cst_61 [1] : vector<6x32xf32> to vector<6xf32>
    %177 = vector.shape_cast %176 : vector<6xf32> to vector<6x1xf32>
    %cst_62 = arith.constant 3.200000e+01 : f32
    %178 = vector.broadcast %cst_62 : f32 to vector<6x1xf32>
    %179 = arith.divf %177, %178 : vector<6x1xf32>
    %180 = vector.broadcast %172 : vector<6x1xf32> to vector<6x32xf32>
    %181 = arith.subf %168, %180 : vector<6x32xf32>
    %cst_63 = arith.constant 9.99999997E-7 : f32
    %182 = vector.broadcast %cst_63 : f32 to vector<6x1xf32>
    %183 = arith.addf %179, %182 : vector<6x1xf32>
    %184 = math.rsqrt %183 : vector<6x1xf32>
    %185 = vector.broadcast %184 : vector<6x1xf32> to vector<6x32xf32>
    %186 = arith.mulf %181, %185 : vector<6x32xf32>
    %187 = vector.extract_strided_slice %8 {offsets = [20, 0], sizes = [1, 32], strides = [1, 1]} : vector<57x32xf32> to vector<1x32xf32>
    %188 = vector.broadcast %187 : vector<1x32xf32> to vector<6x32xf32>
    %189 = arith.mulf %186, %188 : vector<6x32xf32>
    %190 = vector.extract_strided_slice %8 {offsets = [21, 0], sizes = [1, 32], strides = [1, 1]} : vector<57x32xf32> to vector<1x32xf32>
    %191 = vector.broadcast %190 : vector<1x32xf32> to vector<6x32xf32>
    %192 = arith.addf %189, %191 : vector<6x32xf32>
    %193 = vector.extract_strided_slice %5 {offsets = [0, 0, 0], sizes = [1, 32, 128], strides = [1, 1, 1]} : vector<3x32x128xbf16> to vector<1x32x128xbf16>
    %194 = vector.shape_cast %193 : vector<1x32x128xbf16> to vector<32x128xbf16>
    %195 = arith.truncf %192 : vector<6x32xf32> to vector<6x32xbf16>
    %cst_64 = arith.constant dense<0.000000e+00> : vector<6x128xf32>
    %196 = tpu.matmul %195, %194, %cst_64 {dimension_numbers = #tpu.dot_dimension_numbers<[1], [0], [0], [1], [0, 0, 1, 1], [], []>} : vector<6x32xbf16>, vector<32x128xbf16>, vector<6x128xf32> -> vector<6x128xf32>
    %197 = vector.extract_strided_slice %7 {offsets = [0, 0, 0], sizes = [1, 1, 128], strides = [1, 1, 1]} : vector<3x1x128xf32> to vector<1x1x128xf32>
    %198 = vector.shape_cast %197 : vector<1x1x128xf32> to vector<1x128xf32>
    %199 = vector.broadcast %198 : vector<1x128xf32> to vector<6x128xf32>
    %200 = arith.addf %196, %199 : vector<6x128xf32>
    %201 = arith.mulf %200, %200 : vector<6x128xf32>
    %202 = arith.mulf %200, %201 : vector<6x128xf32>
    %cst_65 = arith.constant 4.471500e-02 : f32
    %203 = vector.broadcast %cst_65 : f32 to vector<6x128xf32>
    %204 = arith.mulf %203, %202 : vector<6x128xf32>
    %205 = arith.addf %200, %204 : vector<6x128xf32>
    %cst_66 = arith.constant 0.797884583 : f32
    %206 = vector.broadcast %cst_66 : f32 to vector<6x128xf32>
    %207 = arith.mulf %206, %205 : vector<6x128xf32>
    %208 = math.tanh %207 : vector<6x128xf32>
    %cst_67 = arith.constant 1.000000e+00 : f32
    %209 = vector.broadcast %cst_67 : f32 to vector<6x128xf32>
    %210 = arith.addf %209, %208 : vector<6x128xf32>
    %cst_68 = arith.constant 5.000000e-01 : f32
    %211 = vector.broadcast %cst_68 : f32 to vector<6x128xf32>
    %212 = arith.mulf %211, %210 : vector<6x128xf32>
    %213 = arith.mulf %200, %212 : vector<6x128xf32>
    %214 = vector.extract_strided_slice %6 {offsets = [0, 0, 0], sizes = [1, 128, 32], strides = [1, 1, 1]} : vector<3x128x32xbf16> to vector<1x128x32xbf16>
    %215 = vector.shape_cast %214 : vector<1x128x32xbf16> to vector<128x32xbf16>
    %216 = arith.truncf %213 : vector<6x128xf32> to vector<6x128xbf16>
    %cst_69 = arith.constant dense<0.000000e+00> : vector<6x32xf32>
    %217 = tpu.matmul %216, %215, %cst_69 {dimension_numbers = #tpu.dot_dimension_numbers<[1], [0], [0], [1], [0, 0, 1, 1], [], []>} : vector<6x128xbf16>, vector<128x32xbf16>, vector<6x32xf32> -> vector<6x32xf32>
    %218 = vector.extract_strided_slice %8 {offsets = [22, 0], sizes = [1, 32], strides = [1, 1]} : vector<57x32xf32> to vector<1x32xf32>
    %219 = vector.broadcast %218 : vector<1x32xf32> to vector<6x32xf32>
    %220 = arith.addf %217, %219 : vector<6x32xf32>
    %221 = arith.addf %168, %220 : vector<6x32xf32>
    %cst_70 = arith.constant dense<0.000000e+00> : vector<6xf32>
    %222 = vector.multi_reduction <add>, %221, %cst_70 [1] : vector<6x32xf32> to vector<6xf32>
    %223 = vector.shape_cast %222 : vector<6xf32> to vector<6x1xf32>
    %cst_71 = arith.constant 3.200000e+01 : f32
    %224 = vector.broadcast %cst_71 : f32 to vector<6x1xf32>
    %225 = arith.divf %223, %224 : vector<6x1xf32>
    %226 = vector.broadcast %225 : vector<6x1xf32> to vector<6x32xf32>
    %227 = arith.subf %221, %226 : vector<6x32xf32>
    %228 = arith.mulf %227, %227 : vector<6x32xf32>
    %cst_72 = arith.constant dense<0.000000e+00> : vector<6xf32>
    %229 = vector.multi_reduction <add>, %228, %cst_72 [1] : vector<6x32xf32> to vector<6xf32>
    %230 = vector.shape_cast %229 : vector<6xf32> to vector<6x1xf32>
    %cst_73 = arith.constant 3.200000e+01 : f32
    %231 = vector.broadcast %cst_73 : f32 to vector<6x1xf32>
    %232 = arith.divf %230, %231 : vector<6x1xf32>
    %233 = vector.broadcast %225 : vector<6x1xf32> to vector<6x32xf32>
    %234 = arith.subf %221, %233 : vector<6x32xf32>
    %cst_74 = arith.constant 9.99999997E-7 : f32
    %235 = vector.broadcast %cst_74 : f32 to vector<6x1xf32>
    %236 = arith.addf %232, %235 : vector<6x1xf32>
    %237 = math.rsqrt %236 : vector<6x1xf32>
    %238 = vector.broadcast %237 : vector<6x1xf32> to vector<6x32xf32>
    %239 = arith.mulf %234, %238 : vector<6x32xf32>
    %240 = vector.extract_strided_slice %8 {offsets = [23, 0], sizes = [1, 32], strides = [1, 1]} : vector<57x32xf32> to vector<1x32xf32>
    %241 = vector.broadcast %240 : vector<1x32xf32> to vector<6x32xf32>
    %242 = arith.mulf %239, %241 : vector<6x32xf32>
    %243 = vector.extract_strided_slice %8 {offsets = [24, 0], sizes = [1, 32], strides = [1, 1]} : vector<57x32xf32> to vector<1x32xf32>
    %244 = vector.broadcast %243 : vector<1x32xf32> to vector<6x32xf32>
    %245 = arith.addf %242, %244 : vector<6x32xf32>
    %246 = vector.extract_strided_slice %4 {offsets = [4, 0, 0], sizes = [1, 32, 32], strides = [1, 1, 1]} : vector<13x32x32xbf16> to vector<1x32x32xbf16>
    %247 = vector.shape_cast %246 : vector<1x32x32xbf16> to vector<32x32xbf16>
    %248 = vector.extract_strided_slice %4 {offsets = [5, 0, 0], sizes = [1, 32, 32], strides = [1, 1, 1]} : vector<13x32x32xbf16> to vector<1x32x32xbf16>
    %249 = vector.shape_cast %248 : vector<1x32x32xbf16> to vector<32x32xbf16>
    %250 = vector.extract_strided_slice %4 {offsets = [6, 0, 0], sizes = [1, 32, 32], strides = [1, 1, 1]} : vector<13x32x32xbf16> to vector<1x32x32xbf16>
    %251 = vector.shape_cast %250 : vector<1x32x32xbf16> to vector<32x32xbf16>
    %252 = vector.extract_strided_slice %4 {offsets = [7, 0, 0], sizes = [1, 32, 32], strides = [1, 1, 1]} : vector<13x32x32xbf16> to vector<1x32x32xbf16>
    %253 = vector.shape_cast %252 : vector<1x32x32xbf16> to vector<32x32xbf16>
    %254 = arith.truncf %245 : vector<6x32xf32> to vector<6x32xbf16>
    %cst_75 = arith.constant dense<0.000000e+00> : vector<6x32xf32>
    %255 = tpu.matmul %254, %247, %cst_75 {dimension_numbers = #tpu.dot_dimension_numbers<[1], [0], [0], [1], [0, 0, 1, 1], [], []>} : vector<6x32xbf16>, vector<32x32xbf16>, vector<6x32xf32> -> vector<6x32xf32>
    %256 = vector.extract_strided_slice %8 {offsets = [25, 0], sizes = [1, 32], strides = [1, 1]} : vector<57x32xf32> to vector<1x32xf32>
    %257 = vector.broadcast %256 : vector<1x32xf32> to vector<6x32xf32>
    %258 = arith.addf %255, %257 : vector<6x32xf32>
    %259 = arith.truncf %245 : vector<6x32xf32> to vector<6x32xbf16>
    %cst_76 = arith.constant dense<0.000000e+00> : vector<6x32xf32>
    %260 = tpu.matmul %259, %249, %cst_76 {dimension_numbers = #tpu.dot_dimension_numbers<[1], [0], [0], [1], [0, 0, 1, 1], [], []>} : vector<6x32xbf16>, vector<32x32xbf16>, vector<6x32xf32> -> vector<6x32xf32>
    %261 = vector.extract_strided_slice %8 {offsets = [26, 0], sizes = [1, 32], strides = [1, 1]} : vector<57x32xf32> to vector<1x32xf32>
    %262 = vector.broadcast %261 : vector<1x32xf32> to vector<6x32xf32>
    %263 = arith.addf %260, %262 : vector<6x32xf32>
    %264 = arith.truncf %245 : vector<6x32xf32> to vector<6x32xbf16>
    %cst_77 = arith.constant dense<0.000000e+00> : vector<6x32xf32>
    %265 = tpu.matmul %264, %251, %cst_77 {dimension_numbers = #tpu.dot_dimension_numbers<[1], [0], [0], [1], [0, 0, 1, 1], [], []>} : vector<6x32xbf16>, vector<32x32xbf16>, vector<6x32xf32> -> vector<6x32xf32>
    %266 = vector.extract_strided_slice %8 {offsets = [27, 0], sizes = [1, 32], strides = [1, 1]} : vector<57x32xf32> to vector<1x32xf32>
    %267 = vector.broadcast %266 : vector<1x32xf32> to vector<6x32xf32>
    %268 = arith.addf %265, %267 : vector<6x32xf32>
    %cst_78 = arith.constant 0.000000e+00 : f32
    %269 = vector.broadcast %cst_78 : f32 to vector<6x32xf32>
    %270 = vector.extract_strided_slice %15 {offsets = [0, 0], sizes = [1, 32], strides = [1, 1]} : vector<4x32xf32> to vector<1x32xf32>
    %271 = vector.broadcast %270 : vector<1x32xf32> to vector<6x32xf32>
    %272 = arith.mulf %258, %271 : vector<6x32xf32>
    "tpu.trace_start"() <{level = 10 : i32, message = "td,sd->ts"}> : () -> ()
    %cst_79 = arith.constant dense<0.000000e+00> : vector<6x6xf32>
    %273 = tpu.matmul %272, %263, %cst_79 {dimension_numbers = #tpu.dot_dimension_numbers<[1], [1], [0], [0], [0, 0, 1, 0], [], []>} : vector<6x32xf32>, vector<6x32xf32>, vector<6x6xf32> -> vector<6x6xf32>
    "tpu.trace_stop"() : () -> ()
    %cst_80 = arith.constant 0.353553385 : f32
    %274 = vector.broadcast %cst_80 : f32 to vector<6x6xf32>
    %275 = arith.mulf %273, %274 : vector<6x6xf32>
    %276 = arith.addf %275, %16 : vector<6x6xf32>
    %cst_81 = arith.constant dense<0xFF800000> : vector<6xf32>
    %277 = vector.multi_reduction <maximumf>, %276, %cst_81 [1] : vector<6x6xf32> to vector<6xf32>
    %cst_82 = arith.constant 0xFF800000 : f32
    %278 = vector.broadcast %cst_82 : f32 to vector<6xf32>
    %279 = arith.maximumf %278, %277 : vector<6xf32>
    %280 = vector.shape_cast %279 : vector<6xf32> to vector<6x1xf32>
    %281 = vector.broadcast %280 : vector<6x1xf32> to vector<6x6xf32>
    %282 = arith.subf %276, %281 : vector<6x6xf32>
    %283 = math.exp %282 : vector<6x6xf32>
    %cst_83 = arith.constant dense<0.000000e+00> : vector<6xf32>
    %284 = vector.multi_reduction <add>, %283, %cst_83 [1] : vector<6x6xf32> to vector<6xf32>
    %285 = vector.shape_cast %284 : vector<6xf32> to vector<6x1xf32>
    %286 = vector.broadcast %285 : vector<6x1xf32> to vector<6x6xf32>
    %287 = arith.divf %283, %286 : vector<6x6xf32>
    %cst_84 = arith.constant dense<0.000000e+00> : vector<6x32xf32>
    %288 = tpu.matmul %287, %268, %cst_84 {dimension_numbers = #tpu.dot_dimension_numbers<[1], [0], [0], [1], [0, 0, 1, 1], [], []>} : vector<6x6xf32>, vector<6x32xf32>, vector<6x32xf32> -> vector<6x32xf32>
    %289 = vector.broadcast %270 : vector<1x32xf32> to vector<6x32xf32>
    %290 = arith.mulf %288, %289 : vector<6x32xf32>
    %291 = arith.addf %269, %290 : vector<6x32xf32>
    %292 = vector.extract_strided_slice %15 {offsets = [1, 0], sizes = [1, 32], strides = [1, 1]} : vector<4x32xf32> to vector<1x32xf32>
    %293 = vector.broadcast %292 : vector<1x32xf32> to vector<6x32xf32>
    %294 = arith.mulf %258, %293 : vector<6x32xf32>
    "tpu.trace_start"() <{level = 10 : i32, message = "td,sd->ts"}> : () -> ()
    %cst_85 = arith.constant dense<0.000000e+00> : vector<6x6xf32>
    %295 = tpu.matmul %294, %263, %cst_85 {dimension_numbers = #tpu.dot_dimension_numbers<[1], [1], [0], [0], [0, 0, 1, 0], [], []>} : vector<6x32xf32>, vector<6x32xf32>, vector<6x6xf32> -> vector<6x6xf32>
    "tpu.trace_stop"() : () -> ()
    %cst_86 = arith.constant 0.353553385 : f32
    %296 = vector.broadcast %cst_86 : f32 to vector<6x6xf32>
    %297 = arith.mulf %295, %296 : vector<6x6xf32>
    %298 = arith.addf %297, %16 : vector<6x6xf32>
    %cst_87 = arith.constant dense<0xFF800000> : vector<6xf32>
    %299 = vector.multi_reduction <maximumf>, %298, %cst_87 [1] : vector<6x6xf32> to vector<6xf32>
    %cst_88 = arith.constant 0xFF800000 : f32
    %300 = vector.broadcast %cst_88 : f32 to vector<6xf32>
    %301 = arith.maximumf %300, %299 : vector<6xf32>
    %302 = vector.shape_cast %301 : vector<6xf32> to vector<6x1xf32>
    %303 = vector.broadcast %302 : vector<6x1xf32> to vector<6x6xf32>
    %304 = arith.subf %298, %303 : vector<6x6xf32>
    %305 = math.exp %304 : vector<6x6xf32>
    %cst_89 = arith.constant dense<0.000000e+00> : vector<6xf32>
    %306 = vector.multi_reduction <add>, %305, %cst_89 [1] : vector<6x6xf32> to vector<6xf32>
    %307 = vector.shape_cast %306 : vector<6xf32> to vector<6x1xf32>
    %308 = vector.broadcast %307 : vector<6x1xf32> to vector<6x6xf32>
    %309 = arith.divf %305, %308 : vector<6x6xf32>
    %cst_90 = arith.constant dense<0.000000e+00> : vector<6x32xf32>
    %310 = tpu.matmul %309, %268, %cst_90 {dimension_numbers = #tpu.dot_dimension_numbers<[1], [0], [0], [1], [0, 0, 1, 1], [], []>} : vector<6x6xf32>, vector<6x32xf32>, vector<6x32xf32> -> vector<6x32xf32>
    %311 = vector.broadcast %292 : vector<1x32xf32> to vector<6x32xf32>
    %312 = arith.mulf %310, %311 : vector<6x32xf32>
    %313 = arith.addf %291, %312 : vector<6x32xf32>
    %314 = vector.extract_strided_slice %15 {offsets = [2, 0], sizes = [1, 32], strides = [1, 1]} : vector<4x32xf32> to vector<1x32xf32>
    %315 = vector.broadcast %314 : vector<1x32xf32> to vector<6x32xf32>
    %316 = arith.mulf %258, %315 : vector<6x32xf32>
    "tpu.trace_start"() <{level = 10 : i32, message = "td,sd->ts"}> : () -> ()
    %cst_91 = arith.constant dense<0.000000e+00> : vector<6x6xf32>
    %317 = tpu.matmul %316, %263, %cst_91 {dimension_numbers = #tpu.dot_dimension_numbers<[1], [1], [0], [0], [0, 0, 1, 0], [], []>} : vector<6x32xf32>, vector<6x32xf32>, vector<6x6xf32> -> vector<6x6xf32>
    "tpu.trace_stop"() : () -> ()
    %cst_92 = arith.constant 0.353553385 : f32
    %318 = vector.broadcast %cst_92 : f32 to vector<6x6xf32>
    %319 = arith.mulf %317, %318 : vector<6x6xf32>
    %320 = arith.addf %319, %16 : vector<6x6xf32>
    %cst_93 = arith.constant dense<0xFF800000> : vector<6xf32>
    %321 = vector.multi_reduction <maximumf>, %320, %cst_93 [1] : vector<6x6xf32> to vector<6xf32>
    %cst_94 = arith.constant 0xFF800000 : f32
    %322 = vector.broadcast %cst_94 : f32 to vector<6xf32>
    %323 = arith.maximumf %322, %321 : vector<6xf32>
    %324 = vector.shape_cast %323 : vector<6xf32> to vector<6x1xf32>
    %325 = vector.broadcast %324 : vector<6x1xf32> to vector<6x6xf32>
    %326 = arith.subf %320, %325 : vector<6x6xf32>
    %327 = math.exp %326 : vector<6x6xf32>
    %cst_95 = arith.constant dense<0.000000e+00> : vector<6xf32>
    %328 = vector.multi_reduction <add>, %327, %cst_95 [1] : vector<6x6xf32> to vector<6xf32>
    %329 = vector.shape_cast %328 : vector<6xf32> to vector<6x1xf32>
    %330 = vector.broadcast %329 : vector<6x1xf32> to vector<6x6xf32>
    %331 = arith.divf %327, %330 : vector<6x6xf32>
    %cst_96 = arith.constant dense<0.000000e+00> : vector<6x32xf32>
    %332 = tpu.matmul %331, %268, %cst_96 {dimension_numbers = #tpu.dot_dimension_numbers<[1], [0], [0], [1], [0, 0, 1, 1], [], []>} : vector<6x6xf32>, vector<6x32xf32>, vector<6x32xf32> -> vector<6x32xf32>
    %333 = vector.broadcast %314 : vector<1x32xf32> to vector<6x32xf32>
    %334 = arith.mulf %332, %333 : vector<6x32xf32>
    %335 = arith.addf %313, %334 : vector<6x32xf32>
    %336 = vector.extract_strided_slice %15 {offsets = [3, 0], sizes = [1, 32], strides = [1, 1]} : vector<4x32xf32> to vector<1x32xf32>
    %337 = vector.broadcast %336 : vector<1x32xf32> to vector<6x32xf32>
    %338 = arith.mulf %258, %337 : vector<6x32xf32>
    "tpu.trace_start"() <{level = 10 : i32, message = "td,sd->ts"}> : () -> ()
    %cst_97 = arith.constant dense<0.000000e+00> : vector<6x6xf32>
    %339 = tpu.matmul %338, %263, %cst_97 {dimension_numbers = #tpu.dot_dimension_numbers<[1], [1], [0], [0], [0, 0, 1, 0], [], []>} : vector<6x32xf32>, vector<6x32xf32>, vector<6x6xf32> -> vector<6x6xf32>
    "tpu.trace_stop"() : () -> ()
    %cst_98 = arith.constant 0.353553385 : f32
    %340 = vector.broadcast %cst_98 : f32 to vector<6x6xf32>
    %341 = arith.mulf %339, %340 : vector<6x6xf32>
    %342 = arith.addf %341, %16 : vector<6x6xf32>
    %cst_99 = arith.constant dense<0xFF800000> : vector<6xf32>
    %343 = vector.multi_reduction <maximumf>, %342, %cst_99 [1] : vector<6x6xf32> to vector<6xf32>
    %cst_100 = arith.constant 0xFF800000 : f32
    %344 = vector.broadcast %cst_100 : f32 to vector<6xf32>
    %345 = arith.maximumf %344, %343 : vector<6xf32>
    %346 = vector.shape_cast %345 : vector<6xf32> to vector<6x1xf32>
    %347 = vector.broadcast %346 : vector<6x1xf32> to vector<6x6xf32>
    %348 = arith.subf %342, %347 : vector<6x6xf32>
    %349 = math.exp %348 : vector<6x6xf32>
    %cst_101 = arith.constant dense<0.000000e+00> : vector<6xf32>
    %350 = vector.multi_reduction <add>, %349, %cst_101 [1] : vector<6x6xf32> to vector<6xf32>
    %351 = vector.shape_cast %350 : vector<6xf32> to vector<6x1xf32>
    %352 = vector.broadcast %351 : vector<6x1xf32> to vector<6x6xf32>
    %353 = arith.divf %349, %352 : vector<6x6xf32>
    %cst_102 = arith.constant dense<0.000000e+00> : vector<6x32xf32>
    %354 = tpu.matmul %353, %268, %cst_102 {dimension_numbers = #tpu.dot_dimension_numbers<[1], [0], [0], [1], [0, 0, 1, 1], [], []>} : vector<6x6xf32>, vector<6x32xf32>, vector<6x32xf32> -> vector<6x32xf32>
    %355 = vector.broadcast %336 : vector<1x32xf32> to vector<6x32xf32>
    %356 = arith.mulf %354, %355 : vector<6x32xf32>
    %357 = arith.addf %335, %356 : vector<6x32xf32>
    %358 = arith.truncf %357 : vector<6x32xf32> to vector<6x32xbf16>
    %cst_103 = arith.constant dense<0.000000e+00> : vector<6x32xf32>
    %359 = tpu.matmul %358, %253, %cst_103 {dimension_numbers = #tpu.dot_dimension_numbers<[1], [0], [0], [1], [0, 0, 1, 1], [], []>} : vector<6x32xbf16>, vector<32x32xbf16>, vector<6x32xf32> -> vector<6x32xf32>
    %360 = vector.extract_strided_slice %8 {offsets = [28, 0], sizes = [1, 32], strides = [1, 1]} : vector<57x32xf32> to vector<1x32xf32>
    %361 = vector.broadcast %360 : vector<1x32xf32> to vector<6x32xf32>
    %362 = arith.addf %359, %361 : vector<6x32xf32>
    %363 = arith.addf %221, %362 : vector<6x32xf32>
    %cst_104 = arith.constant dense<0.000000e+00> : vector<6xf32>
    %364 = vector.multi_reduction <add>, %363, %cst_104 [1] : vector<6x32xf32> to vector<6xf32>
    %365 = vector.shape_cast %364 : vector<6xf32> to vector<6x1xf32>
    %cst_105 = arith.constant 3.200000e+01 : f32
    %366 = vector.broadcast %cst_105 : f32 to vector<6x1xf32>
    %367 = arith.divf %365, %366 : vector<6x1xf32>
    %368 = vector.broadcast %367 : vector<6x1xf32> to vector<6x32xf32>
    %369 = arith.subf %363, %368 : vector<6x32xf32>
    %370 = arith.mulf %369, %369 : vector<6x32xf32>
    %cst_106 = arith.constant dense<0.000000e+00> : vector<6xf32>
    %371 = vector.multi_reduction <add>, %370, %cst_106 [1] : vector<6x32xf32> to vector<6xf32>
    %372 = vector.shape_cast %371 : vector<6xf32> to vector<6x1xf32>
    %cst_107 = arith.constant 3.200000e+01 : f32
    %373 = vector.broadcast %cst_107 : f32 to vector<6x1xf32>
    %374 = arith.divf %372, %373 : vector<6x1xf32>
    %375 = vector.broadcast %367 : vector<6x1xf32> to vector<6x32xf32>
    %376 = arith.subf %363, %375 : vector<6x32xf32>
    %cst_108 = arith.constant 9.99999997E-7 : f32
    %377 = vector.broadcast %cst_108 : f32 to vector<6x1xf32>
    %378 = arith.addf %374, %377 : vector<6x1xf32>
    %379 = math.rsqrt %378 : vector<6x1xf32>
    %380 = vector.broadcast %379 : vector<6x1xf32> to vector<6x32xf32>
    %381 = arith.mulf %376, %380 : vector<6x32xf32>
    %382 = vector.extract_strided_slice %8 {offsets = [29, 0], sizes = [1, 32], strides = [1, 1]} : vector<57x32xf32> to vector<1x32xf32>
    %383 = vector.broadcast %382 : vector<1x32xf32> to vector<6x32xf32>
    %384 = arith.mulf %381, %383 : vector<6x32xf32>
    %385 = vector.extract_strided_slice %8 {offsets = [30, 0], sizes = [1, 32], strides = [1, 1]} : vector<57x32xf32> to vector<1x32xf32>
    %386 = vector.broadcast %385 : vector<1x32xf32> to vector<6x32xf32>
    %387 = arith.addf %384, %386 : vector<6x32xf32>
    %388 = vector.extract_strided_slice %5 {offsets = [1, 0, 0], sizes = [1, 32, 128], strides = [1, 1, 1]} : vector<3x32x128xbf16> to vector<1x32x128xbf16>
    %389 = vector.shape_cast %388 : vector<1x32x128xbf16> to vector<32x128xbf16>
    %390 = arith.truncf %387 : vector<6x32xf32> to vector<6x32xbf16>
    %cst_109 = arith.constant dense<0.000000e+00> : vector<6x128xf32>
    %391 = tpu.matmul %390, %389, %cst_109 {dimension_numbers = #tpu.dot_dimension_numbers<[1], [0], [0], [1], [0, 0, 1, 1], [], []>} : vector<6x32xbf16>, vector<32x128xbf16>, vector<6x128xf32> -> vector<6x128xf32>
    %392 = vector.extract_strided_slice %7 {offsets = [1, 0, 0], sizes = [1, 1, 128], strides = [1, 1, 1]} : vector<3x1x128xf32> to vector<1x1x128xf32>
    %393 = vector.shape_cast %392 : vector<1x1x128xf32> to vector<1x128xf32>
    %394 = vector.broadcast %393 : vector<1x128xf32> to vector<6x128xf32>
    %395 = arith.addf %391, %394 : vector<6x128xf32>
    %396 = arith.mulf %395, %395 : vector<6x128xf32>
    %397 = arith.mulf %395, %396 : vector<6x128xf32>
    %cst_110 = arith.constant 4.471500e-02 : f32
    %398 = vector.broadcast %cst_110 : f32 to vector<6x128xf32>
    %399 = arith.mulf %398, %397 : vector<6x128xf32>
    %400 = arith.addf %395, %399 : vector<6x128xf32>
    %cst_111 = arith.constant 0.797884583 : f32
    %401 = vector.broadcast %cst_111 : f32 to vector<6x128xf32>
    %402 = arith.mulf %401, %400 : vector<6x128xf32>
    %403 = math.tanh %402 : vector<6x128xf32>
    %cst_112 = arith.constant 1.000000e+00 : f32
    %404 = vector.broadcast %cst_112 : f32 to vector<6x128xf32>
    %405 = arith.addf %404, %403 : vector<6x128xf32>
    %cst_113 = arith.constant 5.000000e-01 : f32
    %406 = vector.broadcast %cst_113 : f32 to vector<6x128xf32>
    %407 = arith.mulf %406, %405 : vector<6x128xf32>
    %408 = arith.mulf %395, %407 : vector<6x128xf32>
    %409 = vector.extract_strided_slice %6 {offsets = [1, 0, 0], sizes = [1, 128, 32], strides = [1, 1, 1]} : vector<3x128x32xbf16> to vector<1x128x32xbf16>
    %410 = vector.shape_cast %409 : vector<1x128x32xbf16> to vector<128x32xbf16>
    %411 = arith.truncf %408 : vector<6x128xf32> to vector<6x128xbf16>
    %cst_114 = arith.constant dense<0.000000e+00> : vector<6x32xf32>
    %412 = tpu.matmul %411, %410, %cst_114 {dimension_numbers = #tpu.dot_dimension_numbers<[1], [0], [0], [1], [0, 0, 1, 1], [], []>} : vector<6x128xbf16>, vector<128x32xbf16>, vector<6x32xf32> -> vector<6x32xf32>
    %413 = vector.extract_strided_slice %8 {offsets = [31, 0], sizes = [1, 32], strides = [1, 1]} : vector<57x32xf32> to vector<1x32xf32>
    %414 = vector.broadcast %413 : vector<1x32xf32> to vector<6x32xf32>
    %415 = arith.addf %412, %414 : vector<6x32xf32>
    %416 = arith.addf %363, %415 : vector<6x32xf32>
    %cst_115 = arith.constant dense<0.000000e+00> : vector<6xf32>
    %417 = vector.multi_reduction <add>, %416, %cst_115 [1] : vector<6x32xf32> to vector<6xf32>
    %418 = vector.shape_cast %417 : vector<6xf32> to vector<6x1xf32>
    %cst_116 = arith.constant 3.200000e+01 : f32
    %419 = vector.broadcast %cst_116 : f32 to vector<6x1xf32>
    %420 = arith.divf %418, %419 : vector<6x1xf32>
    %421 = vector.broadcast %420 : vector<6x1xf32> to vector<6x32xf32>
    %422 = arith.subf %416, %421 : vector<6x32xf32>
    %423 = arith.mulf %422, %422 : vector<6x32xf32>
    %cst_117 = arith.constant dense<0.000000e+00> : vector<6xf32>
    %424 = vector.multi_reduction <add>, %423, %cst_117 [1] : vector<6x32xf32> to vector<6xf32>
    %425 = vector.shape_cast %424 : vector<6xf32> to vector<6x1xf32>
    %cst_118 = arith.constant 3.200000e+01 : f32
    %426 = vector.broadcast %cst_118 : f32 to vector<6x1xf32>
    %427 = arith.divf %425, %426 : vector<6x1xf32>
    %428 = vector.broadcast %420 : vector<6x1xf32> to vector<6x32xf32>
    %429 = arith.subf %416, %428 : vector<6x32xf32>
    %cst_119 = arith.constant 9.99999997E-7 : f32
    %430 = vector.broadcast %cst_119 : f32 to vector<6x1xf32>
    %431 = arith.addf %427, %430 : vector<6x1xf32>
    %432 = math.rsqrt %431 : vector<6x1xf32>
    %433 = vector.broadcast %432 : vector<6x1xf32> to vector<6x32xf32>
    %434 = arith.mulf %429, %433 : vector<6x32xf32>
    %435 = vector.extract_strided_slice %8 {offsets = [41, 0], sizes = [1, 32], strides = [1, 1]} : vector<57x32xf32> to vector<1x32xf32>
    %436 = vector.broadcast %435 : vector<1x32xf32> to vector<6x32xf32>
    %437 = arith.mulf %434, %436 : vector<6x32xf32>
    %438 = vector.extract_strided_slice %8 {offsets = [42, 0], sizes = [1, 32], strides = [1, 1]} : vector<57x32xf32> to vector<1x32xf32>
    %439 = vector.broadcast %438 : vector<1x32xf32> to vector<6x32xf32>
    %440 = arith.addf %437, %439 : vector<6x32xf32>
    %cst_120 = arith.constant dense<0.000000e+00> : vector<2x32xf32>
    %441 = tpu.matmul %18, %440, %cst_120 {dimension_numbers = #tpu.dot_dimension_numbers<[1], [0], [0], [1], [0, 0, 1, 1], [], []>} : vector<2x6xf32>, vector<6x32xf32>, vector<2x32xf32> -> vector<2x32xf32>
    %442 = vector.extract_strided_slice %4 {offsets = [12, 0, 0], sizes = [1, 32, 32], strides = [1, 1, 1]} : vector<13x32x32xbf16> to vector<1x32x32xbf16>
    %443 = vector.shape_cast %442 : vector<1x32x32xbf16> to vector<32x32xbf16>
    %444 = arith.truncf %440 : vector<6x32xf32> to vector<6x32xbf16>
    %cst_121 = arith.constant dense<0.000000e+00> : vector<6x32xf32>
    %445 = tpu.matmul %444, %443, %cst_121 {dimension_numbers = #tpu.dot_dimension_numbers<[1], [0], [0], [1], [0, 0, 1, 1], [], []>} : vector<6x32xbf16>, vector<32x32xbf16>, vector<6x32xf32> -> vector<6x32xf32>
    %446 = vector.extract_strided_slice %8 {offsets = [43, 0], sizes = [1, 32], strides = [1, 1]} : vector<57x32xf32> to vector<1x32xf32>
    %447 = vector.broadcast %446 : vector<1x32xf32> to vector<6x32xf32>
    %448 = arith.addf %445, %447 : vector<6x32xf32>
    %cst_122 = arith.constant dense<0.000000e+00> : vector<10x32xf32>
    %449 = tpu.matmul %12, %448, %cst_122 {dimension_numbers = #tpu.dot_dimension_numbers<[1], [0], [0], [1], [0, 0, 1, 1], [], []>} : vector<10x6xf32>, vector<6x32xf32>, vector<10x32xf32> -> vector<10x32xf32>
    %450 = vector.extract_strided_slice %8 {offsets = [44, 0], sizes = [1, 32], strides = [1, 1]} : vector<57x32xf32> to vector<1x32xf32>
    %451 = vector.broadcast %13 : vector<10x1xf32> to vector<10x32xf32>
    %452 = vector.broadcast %450 : vector<1x32xf32> to vector<10x32xf32>
    %453 = arith.mulf %451, %452 : vector<10x32xf32>
    %454 = arith.addf %449, %453 : vector<10x32xf32>
    %455 = vector.extract_strided_slice %8 {offsets = [45, 0], sizes = [10, 32], strides = [1, 1]} : vector<57x32xf32> to vector<10x32xf32>
    %456 = arith.addf %454, %455 : vector<10x32xf32>
    %cst_123 = arith.constant dense<0.000000e+00> : vector<10xf32>
    %457 = vector.multi_reduction <add>, %456, %cst_123 [1] : vector<10x32xf32> to vector<10xf32>
    %458 = vector.shape_cast %457 : vector<10xf32> to vector<10x1xf32>
    %cst_124 = arith.constant 3.200000e+01 : f32
    %459 = vector.broadcast %cst_124 : f32 to vector<10x1xf32>
    %460 = arith.divf %458, %459 : vector<10x1xf32>
    %461 = vector.broadcast %460 : vector<10x1xf32> to vector<10x32xf32>
    %462 = arith.subf %456, %461 : vector<10x32xf32>
    %463 = arith.mulf %462, %462 : vector<10x32xf32>
    %cst_125 = arith.constant dense<0.000000e+00> : vector<10xf32>
    %464 = vector.multi_reduction <add>, %463, %cst_125 [1] : vector<10x32xf32> to vector<10xf32>
    %465 = vector.shape_cast %464 : vector<10xf32> to vector<10x1xf32>
    %cst_126 = arith.constant 3.200000e+01 : f32
    %466 = vector.broadcast %cst_126 : f32 to vector<10x1xf32>
    %467 = arith.divf %465, %466 : vector<10x1xf32>
    %468 = vector.broadcast %460 : vector<10x1xf32> to vector<10x32xf32>
    %469 = arith.subf %456, %468 : vector<10x32xf32>
    %cst_127 = arith.constant 9.99999997E-7 : f32
    %470 = vector.broadcast %cst_127 : f32 to vector<10x1xf32>
    %471 = arith.addf %467, %470 : vector<10x1xf32>
    %472 = math.rsqrt %471 : vector<10x1xf32>
    %473 = vector.broadcast %472 : vector<10x1xf32> to vector<10x32xf32>
    %474 = arith.mulf %469, %473 : vector<10x32xf32>
    %475 = vector.extract_strided_slice %8 {offsets = [32, 0], sizes = [1, 32], strides = [1, 1]} : vector<57x32xf32> to vector<1x32xf32>
    %476 = vector.broadcast %475 : vector<1x32xf32> to vector<10x32xf32>
    %477 = arith.mulf %474, %476 : vector<10x32xf32>
    %478 = vector.extract_strided_slice %8 {offsets = [33, 0], sizes = [1, 32], strides = [1, 1]} : vector<57x32xf32> to vector<1x32xf32>
    %479 = vector.broadcast %478 : vector<1x32xf32> to vector<10x32xf32>
    %480 = arith.addf %477, %479 : vector<10x32xf32>
    %481 = vector.extract_strided_slice %4 {offsets = [8, 0, 0], sizes = [1, 32, 32], strides = [1, 1, 1]} : vector<13x32x32xbf16> to vector<1x32x32xbf16>
    %482 = vector.shape_cast %481 : vector<1x32x32xbf16> to vector<32x32xbf16>
    %483 = vector.extract_strided_slice %4 {offsets = [9, 0, 0], sizes = [1, 32, 32], strides = [1, 1, 1]} : vector<13x32x32xbf16> to vector<1x32x32xbf16>
    %484 = vector.shape_cast %483 : vector<1x32x32xbf16> to vector<32x32xbf16>
    %485 = vector.extract_strided_slice %4 {offsets = [10, 0, 0], sizes = [1, 32, 32], strides = [1, 1, 1]} : vector<13x32x32xbf16> to vector<1x32x32xbf16>
    %486 = vector.shape_cast %485 : vector<1x32x32xbf16> to vector<32x32xbf16>
    %487 = vector.extract_strided_slice %4 {offsets = [11, 0, 0], sizes = [1, 32, 32], strides = [1, 1, 1]} : vector<13x32x32xbf16> to vector<1x32x32xbf16>
    %488 = vector.shape_cast %487 : vector<1x32x32xbf16> to vector<32x32xbf16>
    %489 = arith.truncf %480 : vector<10x32xf32> to vector<10x32xbf16>
    %cst_128 = arith.constant dense<0.000000e+00> : vector<10x32xf32>
    %490 = tpu.matmul %489, %482, %cst_128 {dimension_numbers = #tpu.dot_dimension_numbers<[1], [0], [0], [1], [0, 0, 1, 1], [], []>} : vector<10x32xbf16>, vector<32x32xbf16>, vector<10x32xf32> -> vector<10x32xf32>
    %491 = vector.extract_strided_slice %8 {offsets = [34, 0], sizes = [1, 32], strides = [1, 1]} : vector<57x32xf32> to vector<1x32xf32>
    %492 = vector.broadcast %491 : vector<1x32xf32> to vector<10x32xf32>
    %493 = arith.addf %490, %492 : vector<10x32xf32>
    %494 = arith.truncf %480 : vector<10x32xf32> to vector<10x32xbf16>
    %cst_129 = arith.constant dense<0.000000e+00> : vector<10x32xf32>
    %495 = tpu.matmul %494, %484, %cst_129 {dimension_numbers = #tpu.dot_dimension_numbers<[1], [0], [0], [1], [0, 0, 1, 1], [], []>} : vector<10x32xbf16>, vector<32x32xbf16>, vector<10x32xf32> -> vector<10x32xf32>
    %496 = vector.extract_strided_slice %8 {offsets = [35, 0], sizes = [1, 32], strides = [1, 1]} : vector<57x32xf32> to vector<1x32xf32>
    %497 = vector.broadcast %496 : vector<1x32xf32> to vector<10x32xf32>
    %498 = arith.addf %495, %497 : vector<10x32xf32>
    %499 = arith.truncf %480 : vector<10x32xf32> to vector<10x32xbf16>
    %cst_130 = arith.constant dense<0.000000e+00> : vector<10x32xf32>
    %500 = tpu.matmul %499, %486, %cst_130 {dimension_numbers = #tpu.dot_dimension_numbers<[1], [0], [0], [1], [0, 0, 1, 1], [], []>} : vector<10x32xbf16>, vector<32x32xbf16>, vector<10x32xf32> -> vector<10x32xf32>
    %501 = vector.extract_strided_slice %8 {offsets = [36, 0], sizes = [1, 32], strides = [1, 1]} : vector<57x32xf32> to vector<1x32xf32>
    %502 = vector.broadcast %501 : vector<1x32xf32> to vector<10x32xf32>
    %503 = arith.addf %500, %502 : vector<10x32xf32>
    %cst_131 = arith.constant 0.000000e+00 : f32
    %504 = vector.broadcast %cst_131 : f32 to vector<10x32xf32>
    %505 = vector.extract_strided_slice %15 {offsets = [0, 0], sizes = [1, 32], strides = [1, 1]} : vector<4x32xf32> to vector<1x32xf32>
    %506 = vector.broadcast %505 : vector<1x32xf32> to vector<10x32xf32>
    %507 = arith.mulf %493, %506 : vector<10x32xf32>
    "tpu.trace_start"() <{level = 10 : i32, message = "td,sd->ts"}> : () -> ()
    %cst_132 = arith.constant dense<0.000000e+00> : vector<10x10xf32>
    %508 = tpu.matmul %507, %498, %cst_132 {dimension_numbers = #tpu.dot_dimension_numbers<[1], [1], [0], [0], [0, 0, 1, 0], [], []>} : vector<10x32xf32>, vector<10x32xf32>, vector<10x10xf32> -> vector<10x10xf32>
    "tpu.trace_stop"() : () -> ()
    %cst_133 = arith.constant 0.353553385 : f32
    %509 = vector.broadcast %cst_133 : f32 to vector<10x10xf32>
    %510 = arith.mulf %508, %509 : vector<10x10xf32>
    %511 = arith.addf %510, %17 : vector<10x10xf32>
    %cst_134 = arith.constant dense<0xFF800000> : vector<10xf32>
    %512 = vector.multi_reduction <maximumf>, %511, %cst_134 [1] : vector<10x10xf32> to vector<10xf32>
    %cst_135 = arith.constant 0xFF800000 : f32
    %513 = vector.broadcast %cst_135 : f32 to vector<10xf32>
    %514 = arith.maximumf %513, %512 : vector<10xf32>
    %515 = vector.shape_cast %514 : vector<10xf32> to vector<10x1xf32>
    %516 = vector.broadcast %515 : vector<10x1xf32> to vector<10x10xf32>
    %517 = arith.subf %511, %516 : vector<10x10xf32>
    %518 = math.exp %517 : vector<10x10xf32>
    %cst_136 = arith.constant dense<0.000000e+00> : vector<10xf32>
    %519 = vector.multi_reduction <add>, %518, %cst_136 [1] : vector<10x10xf32> to vector<10xf32>
    %520 = vector.shape_cast %519 : vector<10xf32> to vector<10x1xf32>
    %521 = vector.broadcast %520 : vector<10x1xf32> to vector<10x10xf32>
    %522 = arith.divf %518, %521 : vector<10x10xf32>
    %cst_137 = arith.constant dense<0.000000e+00> : vector<10x32xf32>
    %523 = tpu.matmul %522, %503, %cst_137 {dimension_numbers = #tpu.dot_dimension_numbers<[1], [0], [0], [1], [0, 0, 1, 1], [], []>} : vector<10x10xf32>, vector<10x32xf32>, vector<10x32xf32> -> vector<10x32xf32>
    %524 = vector.broadcast %505 : vector<1x32xf32> to vector<10x32xf32>
    %525 = arith.mulf %523, %524 : vector<10x32xf32>
    %526 = arith.addf %504, %525 : vector<10x32xf32>
    %527 = vector.extract_strided_slice %15 {offsets = [1, 0], sizes = [1, 32], strides = [1, 1]} : vector<4x32xf32> to vector<1x32xf32>
    %528 = vector.broadcast %527 : vector<1x32xf32> to vector<10x32xf32>
    %529 = arith.mulf %493, %528 : vector<10x32xf32>
    "tpu.trace_start"() <{level = 10 : i32, message = "td,sd->ts"}> : () -> ()
    %cst_138 = arith.constant dense<0.000000e+00> : vector<10x10xf32>
    %530 = tpu.matmul %529, %498, %cst_138 {dimension_numbers = #tpu.dot_dimension_numbers<[1], [1], [0], [0], [0, 0, 1, 0], [], []>} : vector<10x32xf32>, vector<10x32xf32>, vector<10x10xf32> -> vector<10x10xf32>
    "tpu.trace_stop"() : () -> ()
    %cst_139 = arith.constant 0.353553385 : f32
    %531 = vector.broadcast %cst_139 : f32 to vector<10x10xf32>
    %532 = arith.mulf %530, %531 : vector<10x10xf32>
    %533 = arith.addf %532, %17 : vector<10x10xf32>
    %cst_140 = arith.constant dense<0xFF800000> : vector<10xf32>
    %534 = vector.multi_reduction <maximumf>, %533, %cst_140 [1] : vector<10x10xf32> to vector<10xf32>
    %cst_141 = arith.constant 0xFF800000 : f32
    %535 = vector.broadcast %cst_141 : f32 to vector<10xf32>
    %536 = arith.maximumf %535, %534 : vector<10xf32>
    %537 = vector.shape_cast %536 : vector<10xf32> to vector<10x1xf32>
    %538 = vector.broadcast %537 : vector<10x1xf32> to vector<10x10xf32>
    %539 = arith.subf %533, %538 : vector<10x10xf32>
    %540 = math.exp %539 : vector<10x10xf32>
    %cst_142 = arith.constant dense<0.000000e+00> : vector<10xf32>
    %541 = vector.multi_reduction <add>, %540, %cst_142 [1] : vector<10x10xf32> to vector<10xf32>
    %542 = vector.shape_cast %541 : vector<10xf32> to vector<10x1xf32>
    %543 = vector.broadcast %542 : vector<10x1xf32> to vector<10x10xf32>
    %544 = arith.divf %540, %543 : vector<10x10xf32>
    %cst_143 = arith.constant dense<0.000000e+00> : vector<10x32xf32>
    %545 = tpu.matmul %544, %503, %cst_143 {dimension_numbers = #tpu.dot_dimension_numbers<[1], [0], [0], [1], [0, 0, 1, 1], [], []>} : vector<10x10xf32>, vector<10x32xf32>, vector<10x32xf32> -> vector<10x32xf32>
    %546 = vector.broadcast %527 : vector<1x32xf32> to vector<10x32xf32>
    %547 = arith.mulf %545, %546 : vector<10x32xf32>
    %548 = arith.addf %526, %547 : vector<10x32xf32>
    %549 = vector.extract_strided_slice %15 {offsets = [2, 0], sizes = [1, 32], strides = [1, 1]} : vector<4x32xf32> to vector<1x32xf32>
    %550 = vector.broadcast %549 : vector<1x32xf32> to vector<10x32xf32>
    %551 = arith.mulf %493, %550 : vector<10x32xf32>
    "tpu.trace_start"() <{level = 10 : i32, message = "td,sd->ts"}> : () -> ()
    %cst_144 = arith.constant dense<0.000000e+00> : vector<10x10xf32>
    %552 = tpu.matmul %551, %498, %cst_144 {dimension_numbers = #tpu.dot_dimension_numbers<[1], [1], [0], [0], [0, 0, 1, 0], [], []>} : vector<10x32xf32>, vector<10x32xf32>, vector<10x10xf32> -> vector<10x10xf32>
    "tpu.trace_stop"() : () -> ()
    %cst_145 = arith.constant 0.353553385 : f32
    %553 = vector.broadcast %cst_145 : f32 to vector<10x10xf32>
    %554 = arith.mulf %552, %553 : vector<10x10xf32>
    %555 = arith.addf %554, %17 : vector<10x10xf32>
    %cst_146 = arith.constant dense<0xFF800000> : vector<10xf32>
    %556 = vector.multi_reduction <maximumf>, %555, %cst_146 [1] : vector<10x10xf32> to vector<10xf32>
    %cst_147 = arith.constant 0xFF800000 : f32
    %557 = vector.broadcast %cst_147 : f32 to vector<10xf32>
    %558 = arith.maximumf %557, %556 : vector<10xf32>
    %559 = vector.shape_cast %558 : vector<10xf32> to vector<10x1xf32>
    %560 = vector.broadcast %559 : vector<10x1xf32> to vector<10x10xf32>
    %561 = arith.subf %555, %560 : vector<10x10xf32>
    %562 = math.exp %561 : vector<10x10xf32>
    %cst_148 = arith.constant dense<0.000000e+00> : vector<10xf32>
    %563 = vector.multi_reduction <add>, %562, %cst_148 [1] : vector<10x10xf32> to vector<10xf32>
    %564 = vector.shape_cast %563 : vector<10xf32> to vector<10x1xf32>
    %565 = vector.broadcast %564 : vector<10x1xf32> to vector<10x10xf32>
    %566 = arith.divf %562, %565 : vector<10x10xf32>
    %cst_149 = arith.constant dense<0.000000e+00> : vector<10x32xf32>
    %567 = tpu.matmul %566, %503, %cst_149 {dimension_numbers = #tpu.dot_dimension_numbers<[1], [0], [0], [1], [0, 0, 1, 1], [], []>} : vector<10x10xf32>, vector<10x32xf32>, vector<10x32xf32> -> vector<10x32xf32>
    %568 = vector.broadcast %549 : vector<1x32xf32> to vector<10x32xf32>
    %569 = arith.mulf %567, %568 : vector<10x32xf32>
    %570 = arith.addf %548, %569 : vector<10x32xf32>
    %571 = vector.extract_strided_slice %15 {offsets = [3, 0], sizes = [1, 32], strides = [1, 1]} : vector<4x32xf32> to vector<1x32xf32>
    %572 = vector.broadcast %571 : vector<1x32xf32> to vector<10x32xf32>
    %573 = arith.mulf %493, %572 : vector<10x32xf32>
    "tpu.trace_start"() <{level = 10 : i32, message = "td,sd->ts"}> : () -> ()
    %cst_150 = arith.constant dense<0.000000e+00> : vector<10x10xf32>
    %574 = tpu.matmul %573, %498, %cst_150 {dimension_numbers = #tpu.dot_dimension_numbers<[1], [1], [0], [0], [0, 0, 1, 0], [], []>} : vector<10x32xf32>, vector<10x32xf32>, vector<10x10xf32> -> vector<10x10xf32>
    "tpu.trace_stop"() : () -> ()
    %cst_151 = arith.constant 0.353553385 : f32
    %575 = vector.broadcast %cst_151 : f32 to vector<10x10xf32>
    %576 = arith.mulf %574, %575 : vector<10x10xf32>
    %577 = arith.addf %576, %17 : vector<10x10xf32>
    %cst_152 = arith.constant dense<0xFF800000> : vector<10xf32>
    %578 = vector.multi_reduction <maximumf>, %577, %cst_152 [1] : vector<10x10xf32> to vector<10xf32>
    %cst_153 = arith.constant 0xFF800000 : f32
    %579 = vector.broadcast %cst_153 : f32 to vector<10xf32>
    %580 = arith.maximumf %579, %578 : vector<10xf32>
    %581 = vector.shape_cast %580 : vector<10xf32> to vector<10x1xf32>
    %582 = vector.broadcast %581 : vector<10x1xf32> to vector<10x10xf32>
    %583 = arith.subf %577, %582 : vector<10x10xf32>
    %584 = math.exp %583 : vector<10x10xf32>
    %cst_154 = arith.constant dense<0.000000e+00> : vector<10xf32>
    %585 = vector.multi_reduction <add>, %584, %cst_154 [1] : vector<10x10xf32> to vector<10xf32>
    %586 = vector.shape_cast %585 : vector<10xf32> to vector<10x1xf32>
    %587 = vector.broadcast %586 : vector<10x1xf32> to vector<10x10xf32>
    %588 = arith.divf %584, %587 : vector<10x10xf32>
    %cst_155 = arith.constant dense<0.000000e+00> : vector<10x32xf32>
    %589 = tpu.matmul %588, %503, %cst_155 {dimension_numbers = #tpu.dot_dimension_numbers<[1], [0], [0], [1], [0, 0, 1, 1], [], []>} : vector<10x10xf32>, vector<10x32xf32>, vector<10x32xf32> -> vector<10x32xf32>
    %590 = vector.broadcast %571 : vector<1x32xf32> to vector<10x32xf32>
    %591 = arith.mulf %589, %590 : vector<10x32xf32>
    %592 = arith.addf %570, %591 : vector<10x32xf32>
    %593 = arith.truncf %592 : vector<10x32xf32> to vector<10x32xbf16>
    %cst_156 = arith.constant dense<0.000000e+00> : vector<10x32xf32>
    %594 = tpu.matmul %593, %488, %cst_156 {dimension_numbers = #tpu.dot_dimension_numbers<[1], [0], [0], [1], [0, 0, 1, 1], [], []>} : vector<10x32xbf16>, vector<32x32xbf16>, vector<10x32xf32> -> vector<10x32xf32>
    %595 = vector.extract_strided_slice %8 {offsets = [37, 0], sizes = [1, 32], strides = [1, 1]} : vector<57x32xf32> to vector<1x32xf32>
    %596 = vector.broadcast %595 : vector<1x32xf32> to vector<10x32xf32>
    %597 = arith.addf %594, %596 : vector<10x32xf32>
    %598 = arith.addf %456, %597 : vector<10x32xf32>
    %cst_157 = arith.constant dense<0.000000e+00> : vector<10xf32>
    %599 = vector.multi_reduction <add>, %598, %cst_157 [1] : vector<10x32xf32> to vector<10xf32>
    %600 = vector.shape_cast %599 : vector<10xf32> to vector<10x1xf32>
    %cst_158 = arith.constant 3.200000e+01 : f32
    %601 = vector.broadcast %cst_158 : f32 to vector<10x1xf32>
    %602 = arith.divf %600, %601 : vector<10x1xf32>
    %603 = vector.broadcast %602 : vector<10x1xf32> to vector<10x32xf32>
    %604 = arith.subf %598, %603 : vector<10x32xf32>
    %605 = arith.mulf %604, %604 : vector<10x32xf32>
    %cst_159 = arith.constant dense<0.000000e+00> : vector<10xf32>
    %606 = vector.multi_reduction <add>, %605, %cst_159 [1] : vector<10x32xf32> to vector<10xf32>
    %607 = vector.shape_cast %606 : vector<10xf32> to vector<10x1xf32>
    %cst_160 = arith.constant 3.200000e+01 : f32
    %608 = vector.broadcast %cst_160 : f32 to vector<10x1xf32>
    %609 = arith.divf %607, %608 : vector<10x1xf32>
    %610 = vector.broadcast %602 : vector<10x1xf32> to vector<10x32xf32>
    %611 = arith.subf %598, %610 : vector<10x32xf32>
    %cst_161 = arith.constant 9.99999997E-7 : f32
    %612 = vector.broadcast %cst_161 : f32 to vector<10x1xf32>
    %613 = arith.addf %609, %612 : vector<10x1xf32>
    %614 = math.rsqrt %613 : vector<10x1xf32>
    %615 = vector.broadcast %614 : vector<10x1xf32> to vector<10x32xf32>
    %616 = arith.mulf %611, %615 : vector<10x32xf32>
    %617 = vector.extract_strided_slice %8 {offsets = [38, 0], sizes = [1, 32], strides = [1, 1]} : vector<57x32xf32> to vector<1x32xf32>
    %618 = vector.broadcast %617 : vector<1x32xf32> to vector<10x32xf32>
    %619 = arith.mulf %616, %618 : vector<10x32xf32>
    %620 = vector.extract_strided_slice %8 {offsets = [39, 0], sizes = [1, 32], strides = [1, 1]} : vector<57x32xf32> to vector<1x32xf32>
    %621 = vector.broadcast %620 : vector<1x32xf32> to vector<10x32xf32>
    %622 = arith.addf %619, %621 : vector<10x32xf32>
    %623 = vector.extract_strided_slice %5 {offsets = [2, 0, 0], sizes = [1, 32, 128], strides = [1, 1, 1]} : vector<3x32x128xbf16> to vector<1x32x128xbf16>
    %624 = vector.shape_cast %623 : vector<1x32x128xbf16> to vector<32x128xbf16>
    %625 = arith.truncf %622 : vector<10x32xf32> to vector<10x32xbf16>
    %cst_162 = arith.constant dense<0.000000e+00> : vector<10x128xf32>
    %626 = tpu.matmul %625, %624, %cst_162 {dimension_numbers = #tpu.dot_dimension_numbers<[1], [0], [0], [1], [0, 0, 1, 1], [], []>} : vector<10x32xbf16>, vector<32x128xbf16>, vector<10x128xf32> -> vector<10x128xf32>
    %627 = vector.extract_strided_slice %7 {offsets = [2, 0, 0], sizes = [1, 1, 128], strides = [1, 1, 1]} : vector<3x1x128xf32> to vector<1x1x128xf32>
    %628 = vector.shape_cast %627 : vector<1x1x128xf32> to vector<1x128xf32>
    %629 = vector.broadcast %628 : vector<1x128xf32> to vector<10x128xf32>
    %630 = arith.addf %626, %629 : vector<10x128xf32>
    %631 = arith.mulf %630, %630 : vector<10x128xf32>
    %632 = arith.mulf %630, %631 : vector<10x128xf32>
    %cst_163 = arith.constant 4.471500e-02 : f32
    %633 = vector.broadcast %cst_163 : f32 to vector<10x128xf32>
    %634 = arith.mulf %633, %632 : vector<10x128xf32>
    %635 = arith.addf %630, %634 : vector<10x128xf32>
    %cst_164 = arith.constant 0.797884583 : f32
    %636 = vector.broadcast %cst_164 : f32 to vector<10x128xf32>
    %637 = arith.mulf %636, %635 : vector<10x128xf32>
    %638 = math.tanh %637 : vector<10x128xf32>
    %cst_165 = arith.constant 1.000000e+00 : f32
    %639 = vector.broadcast %cst_165 : f32 to vector<10x128xf32>
    %640 = arith.addf %639, %638 : vector<10x128xf32>
    %cst_166 = arith.constant 5.000000e-01 : f32
    %641 = vector.broadcast %cst_166 : f32 to vector<10x128xf32>
    %642 = arith.mulf %641, %640 : vector<10x128xf32>
    %643 = arith.mulf %630, %642 : vector<10x128xf32>
    %644 = vector.extract_strided_slice %6 {offsets = [2, 0, 0], sizes = [1, 128, 32], strides = [1, 1, 1]} : vector<3x128x32xbf16> to vector<1x128x32xbf16>
    %645 = vector.shape_cast %644 : vector<1x128x32xbf16> to vector<128x32xbf16>
    %646 = arith.truncf %643 : vector<10x128xf32> to vector<10x128xbf16>
    %cst_167 = arith.constant dense<0.000000e+00> : vector<10x32xf32>
    %647 = tpu.matmul %646, %645, %cst_167 {dimension_numbers = #tpu.dot_dimension_numbers<[1], [0], [0], [1], [0, 0, 1, 1], [], []>} : vector<10x128xbf16>, vector<128x32xbf16>, vector<10x32xf32> -> vector<10x32xf32>
    %648 = vector.extract_strided_slice %8 {offsets = [40, 0], sizes = [1, 32], strides = [1, 1]} : vector<57x32xf32> to vector<1x32xf32>
    %649 = vector.broadcast %648 : vector<1x32xf32> to vector<10x32xf32>
    %650 = arith.addf %647, %649 : vector<10x32xf32>
    %651 = arith.addf %598, %650 : vector<10x32xf32>
    %cst_168 = arith.constant dense<0.000000e+00> : vector<10xf32>
    %652 = vector.multi_reduction <add>, %651, %cst_168 [1] : vector<10x32xf32> to vector<10xf32>
    %653 = vector.shape_cast %652 : vector<10xf32> to vector<10x1xf32>
    %cst_169 = arith.constant 3.200000e+01 : f32
    %654 = vector.broadcast %cst_169 : f32 to vector<10x1xf32>
    %655 = arith.divf %653, %654 : vector<10x1xf32>
    %656 = vector.broadcast %655 : vector<10x1xf32> to vector<10x32xf32>
    %657 = arith.subf %651, %656 : vector<10x32xf32>
    %658 = arith.mulf %657, %657 : vector<10x32xf32>
    %cst_170 = arith.constant dense<0.000000e+00> : vector<10xf32>
    %659 = vector.multi_reduction <add>, %658, %cst_170 [1] : vector<10x32xf32> to vector<10xf32>
    %660 = vector.shape_cast %659 : vector<10xf32> to vector<10x1xf32>
    %cst_171 = arith.constant 3.200000e+01 : f32
    %661 = vector.broadcast %cst_171 : f32 to vector<10x1xf32>
    %662 = arith.divf %660, %661 : vector<10x1xf32>
    %663 = vector.broadcast %655 : vector<10x1xf32> to vector<10x32xf32>
    %664 = arith.subf %651, %663 : vector<10x32xf32>
    %cst_172 = arith.constant 9.99999997E-7 : f32
    %665 = vector.broadcast %cst_172 : f32 to vector<10x1xf32>
    %666 = arith.addf %662, %665 : vector<10x1xf32>
    %667 = math.rsqrt %666 : vector<10x1xf32>
    %668 = vector.broadcast %667 : vector<10x1xf32> to vector<10x32xf32>
    %669 = arith.mulf %664, %668 : vector<10x32xf32>
    %670 = vector.extract_strided_slice %8 {offsets = [55, 0], sizes = [1, 32], strides = [1, 1]} : vector<57x32xf32> to vector<1x32xf32>
    %671 = vector.broadcast %670 : vector<1x32xf32> to vector<10x32xf32>
    %672 = arith.mulf %669, %671 : vector<10x32xf32>
    %673 = vector.extract_strided_slice %8 {offsets = [56, 0], sizes = [1, 32], strides = [1, 1]} : vector<57x32xf32> to vector<1x32xf32>
    %674 = vector.broadcast %673 : vector<1x32xf32> to vector<10x32xf32>
    %675 = arith.addf %672, %674 : vector<10x32xf32>
    %676 = vector.extract_strided_slice %10 {offsets = [0, 0], sizes = [32, 192], strides = [1, 1]} : vector<33x192xbf16> to vector<32x192xbf16>
    %677 = arith.truncf %675 : vector<10x32xf32> to vector<10x32xbf16>
    %cst_173 = arith.constant dense<0.000000e+00> : vector<10x192xf32>
    %678 = tpu.matmul %677, %676, %cst_173 {dimension_numbers = #tpu.dot_dimension_numbers<[1], [0], [0], [1], [0, 0, 1, 1], [], []>} : vector<10x32xbf16>, vector<32x192xbf16>, vector<10x192xf32> -> vector<10x192xf32>
    %679 = vector.extract_strided_slice %10 {offsets = [32, 0], sizes = [1, 192], strides = [1, 1]} : vector<33x192xbf16> to vector<1x192xbf16>
    %680 = arith.extf %679 : vector<1x192xbf16> to vector<1x192xf32>
    %681 = vector.broadcast %680 : vector<1x192xf32> to vector<10x192xf32>
    %682 = arith.addf %678, %681 : vector<10x192xf32>
    %cst_174 = arith.constant dense<0.000000e+00> : vector<10x192xf32>
    %683 = tpu.matmul %19, %0, %cst_174 {dimension_numbers = #tpu.dot_dimension_numbers<[1], [0], [0], [1], [0, 0, 1, 1], [], []>} : vector<10x8xf32>, vector<8x192xf32>, vector<10x192xf32> -> vector<10x192xf32>
    %684 = arith.subf %682, %683 : vector<10x192xf32>
    %685 = arith.mulf %684, %684 : vector<10x192xf32>
    %cst_175 = arith.constant dense<0.000000e+00> : vector<10xf32>
    %686 = vector.multi_reduction <add>, %685, %cst_175 [1] : vector<10x192xf32> to vector<10xf32>
    %687 = vector.shape_cast %686 : vector<10xf32> to vector<10x1xf32>
    %cst_176 = arith.constant 1.920000e+02 : f32
    %688 = vector.broadcast %cst_176 : f32 to vector<10x1xf32>
    %689 = arith.divf %687, %688 : vector<10x1xf32>
    %cst_177 = arith.constant dense<0.000000e+00> : vector<2x1xf32>
    %690 = tpu.matmul %14, %689, %cst_177 {dimension_numbers = #tpu.dot_dimension_numbers<[1], [0], [0], [1], [0, 0, 1, 1], [], []>} : vector<2x10xf32>, vector<10x1xf32>, vector<2x1xf32> -> vector<2x1xf32>
    %c0_178 = arith.constant 0 : index
    %c0_179 = arith.constant 0 : index
    %c0_180 = arith.constant 0 : index
    %691 = vector.load %arg11[%c0_178, %c0_179, %c0_180] : memref<1x10x192xf32, #tpu.memory_space<vmem>>, vector<1x10x192xf32>
    %692 = vector.shape_cast %691 : vector<1x10x192xf32> to vector<10x192xf32>
    %693 = vector.shape_cast %682 : vector<10x192xf32> to vector<1x10x192xf32>
    tpu.vector_store %arg11[%c0_178, %c0_179, %c0_180], %693 {strides = array<i32>} : memref<1x10x192xf32, #tpu.memory_space<vmem>>, vector<1x10x192xf32>,
    %c0_181 = arith.constant 0 : index
    %c0_182 = arith.constant 0 : index
    %c0_183 = arith.constant 0 : index
    %694 = vector.load %arg12[%c0_181, %c0_182, %c0_183] : memref<1x2x32xf32, #tpu.memory_space<vmem>>, vector<1x2x32xf32>
    %695 = vector.shape_cast %694 : vector<1x2x32xf32> to vector<2x32xf32>
    %696 = vector.shape_cast %441 : vector<2x32xf32> to vector<1x2x32xf32>
    tpu.vector_store %arg12[%c0_181, %c0_182, %c0_183], %696 {strides = array<i32>} : memref<1x2x32xf32, #tpu.memory_space<vmem>>, vector<1x2x32xf32>,
    %c0_184 = arith.constant 0 : index
    %c0_185 = arith.constant 0 : index
    %c0_186 = arith.constant 0 : index
    %697 = vector.load %arg13[%c0_184, %c0_185, %c0_186] : memref<1x2x1xf32, #tpu.memory_space<vmem>>, vector<1x2x1xf32>
    %698 = vector.shape_cast %697 : vector<1x2x1xf32> to vector<2x1xf32>
    %699 = vector.shape_cast %690 : vector<2x1xf32> to vector<1x2x1xf32>
    tpu.vector_store %arg13[%c0_184, %c0_185, %c0_186], %699 {strides = array<i32>} : memref<1x2x1xf32, #tpu.memory_space<vmem>>, vector<1x2x1xf32>,
    return
  }
  func.func @transform_0(%arg0: i32) -> (i32, i32) {
    %c0_i32 = arith.constant 0 : i32
    %c0_i32_0 = arith.constant 0 : i32
    %c0_i32_1 = arith.constant 0 : i32
    return %c0_i32, %c0_i32_0 : i32, i32
  }
  func.func @transform_1(%arg0: i32) -> (i32, i32, i32) {
    %c0_i32 = arith.constant 0 : i32
    %c0_i32_0 = arith.constant 0 : i32
    %c0_i32_1 = arith.constant 0 : i32
    return %arg0, %c0_i32, %c0_i32_0 : i32, i32, i32
  }
  func.func @transform_2(%arg0: i32) -> (i32, i32) {
    %c0_i32 = arith.constant 0 : i32
    %c0_i32_0 = arith.constant 0 : i32
    %c0_i32_1 = arith.constant 0 : i32
    return %c0_i32, %c0_i32_0 : i32, i32
  }
  func.func @transform_3(%arg0: i32) -> (i32, i32, i32) {
    %c0_i32 = arith.constant 0 : i32
    %c0_i32_0 = arith.constant 0 : i32
    %c0_i32_1 = arith.constant 0 : i32
    %c0_i32_2 = arith.constant 0 : i32
    return %c0_i32, %c0_i32_0, %c0_i32_1 : i32, i32, i32
  }
  func.func @transform_4(%arg0: i32) -> (i32, i32, i32) {
    %c0_i32 = arith.constant 0 : i32
    %c0_i32_0 = arith.constant 0 : i32
    %c0_i32_1 = arith.constant 0 : i32
    %c0_i32_2 = arith.constant 0 : i32
    return %c0_i32, %c0_i32_0, %c0_i32_1 : i32, i32, i32
  }
  func.func @transform_5(%arg0: i32) -> (i32, i32, i32) {
    %c0_i32 = arith.constant 0 : i32
    %c0_i32_0 = arith.constant 0 : i32
    %c0_i32_1 = arith.constant 0 : i32
    %c0_i32_2 = arith.constant 0 : i32
    return %c0_i32, %c0_i32_0, %c0_i32_1 : i32, i32, i32
  }
  func.func @transform_6(%arg0: i32) -> (i32, i32, i32) {
    %c0_i32 = arith.constant 0 : i32
    %c0_i32_0 = arith.constant 0 : i32
    %c0_i32_1 = arith.constant 0 : i32
    %c0_i32_2 = arith.constant 0 : i32
    return %c0_i32, %c0_i32_0, %c0_i32_1 : i32, i32, i32
  }
  func.func @transform_7(%arg0: i32) -> (i32, i32) {
    %c0_i32 = arith.constant 0 : i32
    %c0_i32_0 = arith.constant 0 : i32
    %c0_i32_1 = arith.constant 0 : i32
    return %c0_i32, %c0_i32_0 : i32, i32
  }
  func.func @transform_8(%arg0: i32) -> (i32, i32) {
    %c0_i32 = arith.constant 0 : i32
    %c0_i32_0 = arith.constant 0 : i32
    %c0_i32_1 = arith.constant 0 : i32
    return %c0_i32, %c0_i32_0 : i32, i32
  }
  func.func @transform_9(%arg0: i32) -> (i32, i32) {
    %c0_i32 = arith.constant 0 : i32
    %c0_i32_0 = arith.constant 0 : i32
    %c0_i32_1 = arith.constant 0 : i32
    return %c0_i32, %c0_i32_0 : i32, i32
  }
  func.func @transform_10(%arg0: i32) -> (i32, i32, i32) {
    %c0_i32 = arith.constant 0 : i32
    %c0_i32_0 = arith.constant 0 : i32
    %c0_i32_1 = arith.constant 0 : i32
    return %arg0, %c0_i32, %c0_i32_0 : i32, i32, i32
  }
  func.func @transform_11(%arg0: i32) -> (i32, i32, i32) {
    %c0_i32 = arith.constant 0 : i32
    %c0_i32_0 = arith.constant 0 : i32
    %c0_i32_1 = arith.constant 0 : i32
    return %arg0, %c0_i32, %c0_i32_0 : i32, i32, i32
  }
  func.func @transform_12(%arg0: i32) -> (i32, i32, i32) {
    %c0_i32 = arith.constant 0 : i32
    %c0_i32_0 = arith.constant 0 : i32
    %c0_i32_1 = arith.constant 0 : i32
    return %arg0, %c0_i32, %c0_i32_0 : i32, i32, i32
  }
}

</mosaic_0001>

<bundles_post_ra>
// kernel: tpu_custom_call.1
= control target key start
LH: loop header
LB: loop body
LE: loop exit
PB: predicated region body
PF: predicated region fallthrough
CT: control target
= control target key end

     0   :  { %s4736_s0 = inlined_call_operand.vmem [shape: f32[8,192], index: 0, kind: input, shape index: {}]   ;;  %s4737_s1 = inlined_call_operand.vmem [shape: f32[2,48,32], index: 1, kind: input, shape index: {}]   ;;  %s4738_s2 = inlined_call_operand.vmem [shape: f32[56,32], index: 2, kind: input, shape index: {}]   ;;  %s4739_s3 = inlined_call_operand.vmem [shape: bf16[13,32,32], index: 3, kind: input, shape index: {}]   ;;  %s4740_s4 = inlined_call_operand.vmem [shape: bf16[3,32,128], index: 4, kind: input, shape index: {}]   ;;  %s4741_s5 = inlined_call_operand.vmem [shape: bf16[3,128,32], index: 5, kind: input, shape index: {}]   ;;  %s4742_s6 = inlined_call_operand.vmem [shape: f32[3,1,128], index: 6, kind: input, shape index: {}]   ;;  %s4743_s7 = inlined_call_operand.vmem [shape: f32[57,32], index: 7, kind: input, shape index: {}]   ;;  %s4744_s8 = inlined_call_operand.vmem [shape: bf16[192,32], index: 8, kind: input, shape index: {}]   ;;  %s4745_s9 = inlined_call_operand.vmem [shape: bf16[33,192], index: 9, kind: input, shape index: {}]   ;;  %s4746_s10 = inlined_call_operand.vmem [shape: f32[2,10,192], index: 10, kind: output, shape index: {0}]   ;;  %s4747_s11 = inlined_call_operand.hbm [shape: f32[2,2,32], index: 11, kind: output, shape index: {1}]   ;;  %s4748_s12 = inlined_call_operand.vmem [shape: f32[2,2,1], index: 12, kind: output, shape index: {2}]  }
   0x1   :  { %4751 = sst [smem:[#allocation6_spill]] %s4736_s0 }
   0x2   :  { %4752 = sst [smem:[#allocation7_spill]] %s4737_s1 }
   0x3   :  { %4753 = sst [smem:[#allocation8_spill]] %s4738_s2 }
   0x4   :  { %4754 = sst [smem:[#allocation9_spill]] %s4739_s3 }
   0x5   :  { %4755 = sst [smem:[#allocation10_spill]] %s4744_s8 }
   0x6   :  { %18 = vsyncpa [#allocation3], 0 }
   0x7   :  { %20 = vsyncpa [#allocation3 + $0x1], 0  ;;  %s3953_s21 = smov 0   ;;  %s3955_s22 = smov 0  }
   0x8   :  { %s3957_s23 = smov 0   ;;  %s3959_s24 = smov 0  }
   0x9 LB: > { %s3974_s25 = sadd.s32 4294967295, %s3883_s24   ;;  %s3205_s26 = sadd.s32 4294967294, %s3883_s24   ;;  %s3883_s24 = sphi %s3959_s24, %s4770_s24   ;;  %s3879_s23 = sphi %s3957_s23, %s4769_s23   ;;  %s3875_s22 = sphi %s3955_s22, %s4768_s22   ;;  %s3871_s21 = sphi %s3953_s21, %s4767_s21  }
   0xa   : > { %s3978_s27 = sadd.s32 1, %s3883_s24   ;;  %s274_s28 = sadd.s32 1, %s3879_s23 }
   0xb   : > { %s271_s29 = ssub.s32 %s3883_s24, %s3978_s27  ;;  %p284_p0 = scmp.ne.s32.totalorder %s3879_s23, %s3875_s22 }
   0xc   : > { %p272_p1 = scmp.eq.s32.totalorder %s271_s29, 0  ;;  %p285_p2 = scmp.eq.s32.totalorder %s3974_s25, 1 }
   0xd   : > { %p290_p3 = scmp.ne.s32.totalorder %s3875_s22, %s3871_s21  ;;  %p291_p4 = scmp.eq.s32.totalorder %s3205_s26, 1 }
   0xe   : > { %s3989_s30 = scalar_select %p272_p1, %s3879_s23, %s274_s28  }
   0xf   : > { %p3991_p5 = por %p285_p2, %p284_p0  ;;  %p3995_p6 = por %p291_p4, %p290_p3 }
  0x10   : > { %4756 = sst [smem:[#allocation5_spill]] %s3989_s30  ;;  %p3208_p7 = scmp.ge.s32.totalorder %s3883_s24, 1 }
  0x11   : > { %p370_p8 = scmp.lt.s32.totalorder %s3883_s24, 3 }
  0x13   : > { %p371_p9 = pnand %p3208_p7, %p370_p8 }
  0x14   : > { %s4759_s8 = sld [smem:[#allocation10_spill]] (!%p371_p9)  ;;  %p421_p10 = scmp.lt.s32.totalorder (!%p371_p9), %s3974_s25, 1 }
  0x15   : > { %374 = sbr.rel (%p371_p9) target bundleno = 6951 (0x1b27), region = 60  ;;  %s4760_s0 = sld [smem:[#allocation6_spill]] (!%p371_p9) }
  0x16   : > { %s4761_s1 = sld [smem:[#allocation7_spill]] (!%p371_p9)  ;;  %s3594_s16 = sshll.u32 (!%p371_p9), %s3974_s25, 1 }
  0x17   : > { %s4762_s3 = sld [smem:[#allocation9_spill]] (!%p371_p9)  ;;  %s3089_s20 = scalar_lea.hbm (!%p371_p9), %s4747_s11, %s3594_s16 }
  0x18   : > { %s4763_s2 = sld [smem:[#allocation8_spill]] (!%p371_p9) }
  0x1a   : > { %v3661_v0 = vld [vmem:[%s4759_s8 + $0x38] sm:$0xff]  ;;  %v3660_v2 = vld [vmem:[%s4759_s8 + $0x30] sm:$0xff]  ;;  %v3659_v4 = vld [vmem:[%s4759_s8 + $0x28] sm:$0xff]  ;;  %vm677_vm0 = vcmask 523264   ;;  %s4046_s30 = scalar_select %p421_p10, %s3974_s25, 1  ;;  %vm707_vm1 = vcmask 64512  }
  0x1b   : > { %v3665_v1 = vld [vmem:[%s4759_s8 + $0x58] sm:$0xff]  ;;  %681 = vmatpush.bf16.msra.mxu0 %v3661_v0  ;;  %v3664_v3 = vld [vmem:[%s4759_s8 + $0x50] sm:$0xff]  ;;  %v3663_v5 = vld [vmem:[%s4759_s8 + $0x48] sm:$0xff]  ;;  %vm731_vm2 = vcmask 259072   ;;  %v3885_v28 = vmov 32.0   ;;  %vm779_vm7 = vcmask 261120  }
  0x1c   : > { %698 = vmatpush.bf16.msra.mxu1 %v3665_v1  ;;  %v3658_v6 = vld [vmem:[%s4759_s8 + $0x20] sm:$0xff]  ;;  %v437_v8 = vld [vmem:[%s4760_s0 + $0x8] sm:$0xff]  ;;  %v3657_v9 = vld [vmem:[%s4759_s8 + $0x18] sm:$0xff]  ;;  %s3670_s29 = smul.u32 48, %s4046_s30  ;;  %3719 = vrcp.f32 %v3885_v28  ;;  %vm907_vm8 = vcmask 1045504   ;;  %vm878_vm9 = vcmask 46080  }
  0x1d   : > { %v3662_v7 = vld [vmem:[%s4759_s8 + $0x40] sm:$0xff]  ;;  %v604_v10 = vpack.c.bf16 %v437_v8, %v437_v8  ;;  %v3656_v11 = vld [vmem:[%s4759_s8 + $0x10] sm:$0xff]  ;;  %v3655_v12 = vld [vmem:[%s4759_s8 + $0x8] sm:$0xff] }
  0x1e   : > { %v3654_v13 = vld [vmem:[%s4759_s8] sm:$0xff]  ;;  %s4055_s19 = scalar_lea.vmem %s4761_s1, %s3670_s29  ;;  %v567_v24 = vld [vmem:[%s4743_s7 + $0x8] sm:$0xff]  ;;  %v3601_v41 = vld [vmem:[%s4762_s3 + $0x18] sm:$0xff]  ;;  %s4749_s1 = sand.u32 1, %s3875_s22  }
  0x1f   : > { %682 = vmatpush.bf16.msra.mxu0 %v3660_v2  ;;  %v436_v14 = vld [vmem:[%s4760_s0] sm:$0xff]  ;;  %v3599_v40 = vld [vmem:[%s4762_s3 + $0x8] sm:$0xff]  ;;  %v3600_v43 = vld [vmem:[%s4762_s3 + $0x10] sm:$0xff]  ;;  %v761_v55 = vperm.slane %v567_v24, 6  ;;  %v763_v57 = vperm.slane %v567_v24, 7  ;;  %s4385_s8 = sshll.u32 %s4749_s1, 1 }
  0x20   : > { %699 = vmatpush.bf16.msra.mxu1 %v3664_v3  ;;  %v603_v15 = vpack.c.bf16 %v436_v14, %v436_v14  ;;  %v566_v18 = vld [vmem:[%s4743_s7] sm:$0xff]  ;;  %789 = vmatpush.bf16.msra.mxu3 %v3599_v40  ;;  %v3603_v44 = vld [vmem:[%s4762_s3 + $0x28] sm:$0xff]  ;;  %v4096_v62 = vld [vmem:[%s4743_s7 + $0x10] sm:$0xff]  ;;  %s4750_s15 = scalar_lea.vmem [#allocation2], %s4385_s8  ;;  %s4764_s26 = scalar_lea.vmem [#allocation2], %s4385_s8 }
  0x21   : > { %v438_v22 = vld [vmem:[%s4055_s19] sm:$0xff]  ;;  %v766_v0 = vperm.slane %v4096_v62, 0  ;;  %v796_v1 = vperm.slane %v4096_v62, 1  ;;  %s3091_s28 = sshll.u32 %s4764_s26, 4  ;;  %s3092_s28 = int_to_ptr.vmem [resolvable:$true] %s3091_s28 }
  0x22   : > { %v3720_v29 = vpop.eup %3719  ;;  %v3598_v42 = vld [vmem:[%s4762_s3] sm:$0xff] }
  0x23   : > { %683 = vmatpush.bf16.msra.mxu0 %v3659_v4  ;;  %v736_v30 = vmul.f32 32.0, %v3720_v29  ;;  %vm740_vm3 = vweird.f32 %v3720_v29  ;;  %v3602_v47 = vld [vmem:[%s4762_s3 + $0x20] sm:$0xff] }
  0x24   : > { %700 = vmatpush.bf16.msra.mxu1 %v3663_v5  ;;  %790 = vmatpush.bf16.msra.mxu3 %v3598_v42  ;;  %v444_v63 = vld [vmem:[%s4763_s2] sm:$0xff] }
  0x25   : > { %v737_v31 = vsub.f32 1.0, %v736_v30  ;;  %v4103_v2 = vperm.slane %v444_v63, 0  ;;  %v4105_v3 = vperm.slane %v444_v63, 2 }
  0x27   : > { %684 = vmatpush.bf16.msra.mxu0 %v3658_v6  ;;  %v738_v32 = vmul.f32 %v3720_v29, %v737_v31  ;;  %v4107_v6 = vperm.slane %v444_v63, 3 }
  0x28   : > { %701 = vmatpush.bf16.msra.mxu1 %v3662_v7  ;;  %841 = vmatpush.bf16.msrb.mxu3 %v3603_v44 }
  0x29   : > { %v739_v33 = vadd.f32 %v3720_v29, %v738_v32 }
  0x2b   : > { %685 = vmatpush.bf16.msra.mxu0 %v3657_v9  ;;  %3262 = vmatmul.msk.bf16.vlgmr.msra.gmra.mxu1 %vm677_vm0, %v604_v10  ;;  %v4066_v34 = vsel %vm740_vm3, %v3720_v29, %v739_v33 }
  0x2c   : > { %842 = vmatpush.bf16.msrb.mxu3 %v3602_v47 }
  0x2f   : > { %686 = vmatpush.bf16.msra.mxu0 %v3656_v11 }
  0x33   : > { %687 = vmatpush.bf16.msra.mxu0 %v3655_v12  ;;  %v4119_v12 = vperm.slane %v444_v63, 1 }
  0x37   : > { %688 = vmatpush.bf16.msra.mxu0 %v3654_v13 }
  0x3a   : > { %689 = vmatmul.bf16.vlgmr.msra.gmra.mxu0 %v603_v15 }
  0xa8   : > { %v703_v16 = vpop.f32.mrf.mxu1 }
  0xb0   : > { %v705_v17 = vpop.f32.mrf.mxu1 }
  0xb7   : > { %v690_v19 = vpop.f32.mrf.mxu0 }
  0xb8   : > { %v691_v20 = vadd.f32 %v690_v19, %v566_v18 }
  0xba   : > { %v704_v21 = vadd.f32 %v703_v16, %v691_v20  ;;  %v822_v16 = vperm.slane %v4096_v62, 2 }
  0xbc   : > { %726 = vmatpush.msra.mxu2 %v704_v21 }
  0xbd   : > { %3263 = vmatmul.msk.f32.vlgmr.msra.gmra.mxu2 %vm707_vm1, %v438_v22 }
  0xbe   : > { %815 = vmatpush.bf16.msrb.mxu2 %v3601_v41 }
  0xbf   : > { %v692_v23 = vpop.f32.mrf.mxu0 }
  0xc2   : > { %816 = vmatpush.bf16.msrb.mxu2 %v3600_v43 }
 0x140   : > { %v728_v25 = vpop.f32.mrf.mxu2 }
 0x141   : > { %v4062_v26 = vadd.f32 %v728_v25, %v567_v24  ;;  %v4135_v25 = vld [vmem:[%s4763_s2 + $0x8] sm:$0xff] }
 0x143   : > { %v732_v27 = vsel %vm731_vm2, %v4062_v26, 0.0 }
 0x144   : > { %733 = vadd.xlane.f32.xlu0 %v732_v27 }
 0x1b7   : > { %v734_v35 = vpop.xlane.xlu0 %733 }
 0x1b8   : > { %v742_v36 = vmul.f32 %v4066_v34, %v734_v35 }
 0x1ba   : > { %v743_v37 = vsub.f32 %v4062_v26, %v742_v36 }
 0x1bc   : > { %v744_v38 = vmul.f32 %v743_v37, %v743_v37 }
 0x1be   : > { %v745_v39 = vsel %vm731_vm2, %v744_v38, 0.0 }
 0x1bf   : > { %746 = vadd.xlane.f32.xlu0 %v745_v39 }
 0x232   : > { %v747_v45 = vpop.xlane.xlu0 %746 }
 0x233   : > { %v748_v46 = vmul.f32 %v747_v45, %v4066_v34 }
 0x235   : > { %v749_v48 = vadd.f32 1e-06, %v748_v46 }
 0x237   : > { %3721 = vrsqrt.f32 %v749_v48  ;;  %vm756_vm5 = vweird.f32 %v749_v48 }
 0x23d   : > { %v3722_v49 = vpop.eup %3721 }
 0x23e   : > { %v751_v50 = vmul.f32 %v3722_v49, %v749_v48  ;;  %vm757_vm4 = vweird.f32 %v3722_v49 }
 0x23f   : > { %vm758_vm6 = vmor %vm756_vm5, %vm757_vm4  ;;  %vm903_vm4 = vcmask 48128  }
 0x240   : > { %v752_v51 = vmul.f32 %v3722_v49, %v751_v50 }
 0x242   : > { %v753_v52 = vmul.f32 0.5, %v752_v51 }
 0x244   : > { %v754_v53 = vsub.f32 1.5, %v753_v52 }
 0x246   : > { %v755_v54 = vmul.f32 %v3722_v49, %v754_v53 }
 0x248   : > { %v759_v56 = vsel %vm758_vm6, %v3722_v49, %v755_v54 }
 0x249   : > { %v760_v58 = vmul.f32 %v759_v56, %v743_v37 }
 0x24b   : > { %v762_v59 = vmul.f32 %v761_v55, %v760_v58 }
 0x24d   : > { %v764_v60 = vadd.f32 %v763_v57, %v762_v59 }
 0x24f   : > { %v765_v61 = vpack.c.bf16 %v764_v60, %v764_v60 }
 0x251   : > { %3272 = vmatmul.msk.bf16.vlgmr.msra.gmra.mxu3 %vm779_vm7, %v765_v61  ;;  %3281 = vmatmul.msk.bf16.vlgmr.msrb.gmra.mxu2 %vm779_vm7, %v765_v61 }
 0x261   : > { %3290 = vmatmul.msk.bf16.vlgmr.msrb.gmra.mxu3 %vm779_vm7, %v765_v61 }
 0x2d4   : > { %v792_v4 = vpop.f32.mrf.mxu3  ;;  %v818_v5 = vpop.f32.mrf.mxu2 }
 0x2d5   : > { %v793_v7 = vadd.f32 %v792_v4, %v766_v0  ;;  %v819_v8 = vadd.f32 %v818_v5, %v796_v1 }
 0x2d7   : > { %v849_v9 = vmul.f32 %v4103_v2, %v793_v7  ;;  %v1010_v10 = vmul.f32 %v4105_v3, %v793_v7  ;;  %3291 = vmatpush.xpose.msk.msra.mxu2 %vm779_vm7, %v819_v8  ;;  %3299 = vmatpush.xpose.msk.msra.mxu3 %vm779_vm7, %v819_v8  ;;  %v1086_v11 = vmul.f32 %v4107_v6, %v793_v7 }
 0x2d8   : > { %3303 = vmatpush.xpose.msk.msrb.mxu0 %vm779_vm7, %v819_v8  ;;  %v934_v15 = vmul.f32 %v4119_v12, %v793_v7 }
 0x2da   : > { %3292 = vmatmul.msk.f32.vlgmr.msra.gmra.mxu2 %vm779_vm7, %v849_v9  ;;  %3300 = vmatmul.msk.f32.vlgmr.msra.gmra.mxu3 %vm779_vm7, %v1010_v10 }
 0x2db   : > { %3295 = vmatpush.xpose.msk.msrb.mxu2 %vm779_vm7, %v819_v8  ;;  %3304 = vmatmul.msk.f32.vlgmr.msrb.gmra.mxu0 %vm779_vm7, %v1086_v11 }
 0x2dc   : > { %v794_v13 = vpop.f32.mrf.mxu3  ;;  %v820_v14 = vpop.f32.mrf.mxu2 }
 0x2e2   : > { %3296 = vmatmul.msk.f32.vlgmr.msrb.gmra.mxu2 %vm779_vm7, %v934_v15 }
 0x2e4   : > { %v844_v17 = vpop.f32.mrf.mxu3 }
 0x2e5   : > { %v4124_v18 = vadd.f32 %v844_v17, %v822_v16 }
 0x2e7   : > { %3293 = vmatpush.msk.msrb.mxu1 %vm907_vm8, %v4124_v18  ;;  %3301 = vmatpush.msk.msra.mxu2 %vm907_vm8, %v4124_v18 }
 0x2e9   : > { %3297 = vmatpush.msk.msra.mxu1 %vm907_vm8, %v4124_v18 }
 0x2ec   : > { %v846_v19 = vpop.f32.mrf.mxu3 }
 0x358   : > { %v1107_v24 = vpop.f32.mrf.mxu0 }
 0x359   : > { %v1110_v29 = vmul.f32 0.35355338, %v1107_v24 }
 0x35b   : > { %v1111_v35 = vadd.f32 %v1110_v29, %v4135_v25 }
 0x35d   : > { %v873_v20 = vpop.f32.mrf.mxu2  ;;  %v1031_v21 = vpop.f32.mrf.mxu3  ;;  %v1112_v37 = vsel %vm878_vm9, %v1111_v35, -inf }
 0x35e   : > { %v876_v22 = vmul.f32 0.35355338, %v873_v20  ;;  %v1034_v23 = vmul.f32 0.35355338, %v1031_v21 }
 0x360   : > { %v1035_v27 = vadd.f32 %v1034_v23, %v4135_v25  ;;  %v877_v28 = vadd.f32 %v876_v22, %v4135_v25 }
 0x362   : > { %v1036_v30 = vsel %vm878_vm9, %v1035_v27, -inf  ;;  %v879_v31 = vsel %vm878_vm9, %v877_v28, -inf }
 0x363   : > { %1037 = vmax.xlane.f32.xlu2 %v1036_v30  ;;  %880 = vmax.xlane.f32.xlu1 %v879_v31 }
 0x365   : > { %v955_v32 = vpop.f32.mrf.mxu2 }
 0x366   : > { %v958_v33 = vmul.f32 0.35355338, %v955_v32 }
 0x368   : > { %v959_v36 = vadd.f32 %v958_v33, %v4135_v25 }
 0x36a   : > { %v960_v38 = vsel %vm878_vm9, %v959_v36, -inf }
 0x36b   : > { %1113 = vmax.xlane.f32.xlu2 %v1112_v37  ;;  %961 = vmax.xlane.f32.xlu1 %v960_v38 }
 0x3d6   : > { %v1038_v39 = vpop.xlane.xlu2 %1037  ;;  %v881_v40 = vpop.xlane.xlu1 %880 }
 0x3d7   : > { %v1039_v41 = vsub.f32 %v1035_v27, %v1038_v39  ;;  %v882_v42 = vsub.f32 %v877_v28, %v881_v40 }
 0x3d9   : > { %v1040_v43 = vmul.f32 1.442695, %v1039_v41  ;;  %v883_v44 = vmul.f32 1.442695, %v882_v42 }
 0x3db   : > { %3723 = vpow2.f32 %v1040_v43 }
 0x3dc   : > { %3725 = vpow2.f32 %v883_v44 }
 0x3de   : > { %v1114_v45 = vpop.xlane.xlu2 %1113  ;;  %v962_v46 = vpop.xlane.xlu1 %961 }
 0x3df   : > { %v1115_v47 = vsub.f32 %v1111_v35, %v1114_v45  ;;  %v963_v48 = vsub.f32 %v959_v36, %v962_v46 }
 0x3e1   : > { %v3724_v49 = vpop.eup %3723  ;;  %v1116_v50 = vmul.f32 1.442695, %v1115_v47  ;;  %v964_v51 = vmul.f32 1.442695, %v963_v48 }
 0x3e2   : > { %v3726_v52 = vpop.eup %3725  ;;  %v1042_v53 = vsel %vm878_vm9, %v3724_v49, 0.0 }
 0x3e3   : > { %3727 = vpow2.f32 %v1116_v50  ;;  %1043 = vadd.xlane.f32.xlu2 %v1042_v53  ;;  %v885_v54 = vsel %vm878_vm9, %v3726_v52, 0.0 }
 0x3e4   : > { %3729 = vpow2.f32 %v964_v51  ;;  %886 = vadd.xlane.f32.xlu0 %v885_v54  ;;  %v3605_v51 = vld [vmem:[%s4762_s3 + $0x38] sm:$0xff] }
 0x3e5   : > { %1184 = vmatpush.bf16.msrb.mxu3 %v3605_v51 }
 0x3e9   : > { %v4147_v55 = vpop.eup %3727 }
 0x3ea   : > { %v4149_v56 = vpop.eup %3729  ;;  %v1118_v57 = vsel %vm878_vm9, %v4147_v55, 0.0 }
 0x3eb   : > { %v966_v58 = vsel %vm878_vm9, %v4149_v56, 0.0 }
 0x3ec   : > { %1119 = vadd.xlane.f32.xlu0 %v1118_v57  ;;  %967 = vadd.xlane.f32.xlu1 %v966_v58 }
 0x456   : > { %v1044_v59 = vpop.xlane.xlu2 %1043 }
 0x457   : > { %3731 = vrcp.f32 %v1044_v59  ;;  %v887_v60 = vpop.xlane.xlu0 %886  ;;  %v1056_v8 = vand.u32 2147483648, %v1044_v59  ;;  %v1054_v11 = vand.u32 2147483647, %v1044_v59  ;;  %vm1050_vm12 = vweird.f32 %v1044_v59 }
 0x458   : > { %3733 = vrcp.f32 %v887_v60  ;;  %v899_v13 = vand.u32 2147483648, %v887_v60  ;;  %v897_v15 = vand.u32 2147483647, %v887_v60  ;;  %vm893_vm14 = vweird.f32 %v887_v60 }
 0x459   : > { %v1057_v17 = vor.u32 1.1754944e-38, %v1056_v8  ;;  %vm1055_vm15 = vcmp.eq.f32.partialorder %v1054_v11, 8.507059e+37 }
 0x45a   : > { %v900_v22 = vor.u32 1.1754944e-38, %v899_v13  ;;  %vm898_vm5 = vcmp.eq.f32.partialorder %v897_v15, 8.507059e+37 }
 0x45d   : > { %v3732_v61 = vpop.eup %3731 }
 0x45e   : > { %v3734_v63 = vpop.eup %3733  ;;  %v1046_v0 = vmul.f32 %v3732_v61, %v1044_v59  ;;  %vm1051_vm10 = vweird.f32 %v3732_v61 }
 0x45f   : > { %v889_v1 = vmul.f32 %v3734_v63, %v887_v60  ;;  %v1120_v4 = vpop.xlane.xlu0 %1119  ;;  %v968_v5 = vpop.xlane.xlu1 %967  ;;  %vm894_vm11 = vweird.f32 %v3734_v63  ;;  %vm1052_vm13 = vmor %vm1050_vm12, %vm1051_vm10 }
 0x460   : > { %v1047_v7 = vsub.f32 1.0, %v1046_v0  ;;  %3735 = vrcp.f32 %v1120_v4  ;;  %vm895_vm3 = vmor %vm893_vm14, %vm894_vm11  ;;  %v980_v36 = vand.u32 2147483648, %v968_v5  ;;  %v978_v39 = vand.u32 2147483647, %v968_v5 }
 0x461   : > { %v890_v9 = vsub.f32 1.0, %v889_v1  ;;  %3737 = vrcp.f32 %v968_v5  ;;  %vm974_vm10 = vweird.f32 %v968_v5  ;;  %v1132_v44 = vand.u32 2147483648, %v1120_v4 }
 0x462   : > { %v1048_v10 = vmul.f32 %v3732_v61, %v1047_v7  ;;  %v981_v41 = vor.u32 1.1754944e-38, %v980_v36  ;;  %vm1126_vm14 = vweird.f32 %v1120_v4  ;;  %v1130_v46 = vand.u32 2147483647, %v1120_v4 }
 0x463   : > { %v891_v14 = vmul.f32 %v3734_v63, %v890_v9 }
 0x464   : > { %v1049_v16 = vadd.f32 %v3732_v61, %v1048_v10 }
 0x465   : > { %v892_v19 = vadd.f32 %v3734_v63, %v891_v14 }
 0x466   : > { %v3736_v20 = vpop.eup %3735  ;;  %v1053_v21 = vsel %vm1052_vm13, %v3732_v61, %v1049_v16  ;;  %vm979_vm13 = vcmp.eq.f32.partialorder %v978_v39, 8.507059e+37  ;;  %v3636_v39 = vld [vmem:[%s4741_s5 + $0x30] sm:$0xff] }
 0x467   : > { %v3738_v23 = vpop.eup %3737  ;;  %v1058_v24 = vsel %vm1055_vm15, %v1057_v17, %v1053_v21  ;;  %v1122_v27 = vmul.f32 %v3736_v20, %v1120_v4  ;;  %v896_v28 = vsel %vm895_vm3, %v3734_v63, %v892_v19  ;;  %vm1127_vm12 = vweird.f32 %v3736_v20  ;;  %v3625_v17 = vld [vmem:[%s4740_s4 + $0x8] sm:$0xff]  ;;  %v3637_v19 = vld [vmem:[%s4741_s5 + $0x38] sm:$0xff] }
 0x468   : > { %v970_v29 = vmul.f32 %v3738_v23, %v968_v5  ;;  %v901_v30 = vsel %vm898_vm5, %v900_v22, %v896_v28  ;;  %v1059_v31 = vmul.f32 %v3724_v49, %v1058_v24  ;;  %vm975_vm6 = vweird.f32 %v3738_v23  ;;  %vm1128_vm15 = vmor %vm1126_vm14, %vm1127_vm12  ;;  %1243 = vmatpush.bf16.msrb.mxu2 %v3625_v17  ;;  %1309 = vmatpush.bf16.msra.mxu0 %v3637_v19 }
 0x469   : > { %v1123_v32 = vsub.f32 1.0, %v1122_v27  ;;  %v902_v33 = vmul.f32 %v3726_v52, %v901_v30  ;;  %vm976_vm11 = vmor %vm974_vm10, %vm975_vm6  ;;  %v1133_v49 = vor.u32 1.1754944e-38, %v1132_v44  ;;  %vm1131_vm3 = vcmp.eq.f32.partialorder %v1130_v46, 8.507059e+37  ;;  %v3604_v52 = vld [vmem:[%s4762_s3 + $0x30] sm:$0xff]  ;;  %v3631_v44 = vld [vmem:[%s4741_s5 + $0x8] sm:$0xff] }
 0x46a   : > { %v971_v35 = vsub.f32 1.0, %v970_v29  ;;  %3302 = vmatmul.msk.f32.vlgmr.msra.gmra.mxu2 %vm903_vm4, %v1059_v31  ;;  %1185 = vmatpush.bf16.msrb.mxu3 %v3604_v52  ;;  %v1162_v4 = vperm.slane %v4096_v62, 3  ;;  %v1214_v31 = vperm.slane %v4096_v62, 4  ;;  %v3715_v46 = vld [vmem:[%s4742_s6] ss:$0 sm:$0xff] }
 0x46b   : > { %3294 = vmatmul.msk.f32.vlgmr.msrb.gmra.mxu1 %vm903_vm4, %v902_v33  ;;  %v1124_v37 = vmul.f32 %v3736_v20, %v1123_v32 }
 0x46c   : > { %v972_v38 = vmul.f32 %v3738_v23, %v971_v35  ;;  %3305 = vmatpush.msk.msrb.mxu1 %vm907_vm8, %v4124_v18  ;;  %v1216_v35 = vperm.slane %v4096_v62, 5  ;;  %1310 = vmatpush.bf16.msra.mxu0 %v3636_v39 }
 0x46d   : > { %v1125_v42 = vadd.f32 %v3736_v20, %v1124_v37 }
 0x46e   : > { %v973_v40 = vadd.f32 %v3738_v23, %v972_v38 }
 0x46f   : > { %v1129_v48 = vsel %vm1128_vm15, %v3736_v20, %v1125_v42  ;;  %v3633_v42 = vld [vmem:[%s4741_s5 + $0x18] sm:$0xff] }
 0x470   : > { %v977_v43 = vsel %vm976_vm11, %v3738_v23, %v973_v40  ;;  %v1134_v18 = vsel %vm1131_vm3, %v1133_v49, %v1129_v48  ;;  %v3635_v40 = vld [vmem:[%s4741_s5 + $0x28] sm:$0xff] }
 0x471   : > { %v982_v45 = vsel %vm979_vm13, %v981_v41, %v977_v43  ;;  %v1135_v50 = vmul.f32 %v4147_v55, %v1134_v18  ;;  %1311 = vmatpush.bf16.msra.mxu0 %v3635_v40  ;;  %v3634_v41 = vld [vmem:[%s4741_s5 + $0x20] sm:$0xff]  ;;  %v3632_v43 = vld [vmem:[%s4741_s5 + $0x10] sm:$0xff] }
 0x472   : > { %v983_v47 = vmul.f32 %v4149_v56, %v982_v45  ;;  %v3630_v45 = vld [vmem:[%s4741_s5] sm:$0xff] }
 0x474   : > { %3298 = vmatmul.msk.f32.vlgmr.msra.gmra.mxu1 %vm903_vm4, %v983_v47 }
 0x475   : > { %1312 = vmatpush.bf16.msra.mxu0 %v3634_v41 }
 0x479   : > { %1313 = vmatpush.bf16.msra.mxu0 %v3633_v42 }
 0x47c   : > { %3306 = vmatmul.msk.f32.vlgmr.msrb.gmra.mxu1 %vm903_vm4, %v1135_v50 }
 0x47d   : > { %1314 = vmatpush.bf16.msra.mxu0 %v3632_v43 }
 0x481   : > { %1315 = vmatpush.bf16.msra.mxu0 %v3631_v44 }
 0x485   : > { %1316 = vmatpush.bf16.msra.mxu0 %v3630_v45 }
 0x4e8   : > { %v928_v53 = vpop.f32.mrf.mxu1 }
 0x4e9   : > { %v931_v57 = vmul.f32 %v928_v53, %v4103_v2 }
 0x4ed   : > { %v1080_v58 = vpop.f32.mrf.mxu2 }
 0x4ee   : > { %v1083_v59 = vmul.f32 %v1080_v58, %v4105_v3 }
 0x4f1   : > { %v1004_v54 = vpop.f32.mrf.mxu1 }
 0x4f2   : > { %v1007_v56 = vmul.f32 %v1004_v54, %v4119_v12 }
 0x4f4   : > { %v1008_v55 = vadd.f32 %v1007_v56, %v931_v57 }
 0x4f6   : > { %v1084_v61 = vadd.f32 %v1083_v59, %v1008_v55  ;;  %v1260_v59 = vperm.slane %v4096_v62, 6 }
 0x4f9   : > { %v1156_v60 = vpop.f32.mrf.mxu1 }
 0x4fa   : > { %v1159_v63 = vmul.f32 %v1156_v60, %v4107_v6 }
 0x4fc   : > { %v1160_v0 = vadd.f32 %v1159_v63, %v1084_v61 }
 0x4fe   : > { %v1161_v1 = vpack.c.bf16 %v1160_v0, %v1160_v0 }
 0x500   : > { %3315 = vmatmul.msk.bf16.vlgmr.msrb.gmra.mxu3 %vm779_vm7, %v1161_v1 }
 0x583   : > { %v1187_v5 = vpop.f32.mrf.mxu3 }
 0x584   : > { %v1188_v7 = vadd.f32 %v1187_v5, %v1162_v4 }
 0x586   : > { %v4176_v8 = vadd.f32 %v1188_v7, %v4062_v26  ;;  %v3624_v26 = vld [vmem:[%s4740_s4] sm:$0xff] }
 0x587   : > { %1244 = vmatpush.bf16.msrb.mxu2 %v3624_v26 }
 0x588   : > { %v1192_v9 = vsel %vm731_vm2, %v4176_v8, 0.0 }
 0x589   : > { %1193 = vadd.xlane.f32.xlu1 %v1192_v9 }
 0x58b   : > { %v1189_v10 = vpop.f32.mrf.mxu3 }
 0x5fc   : > { %v1194_v11 = vpop.xlane.xlu1 %1193 }
 0x5fd   : > { %v1195_v13 = vmul.f32 %v1194_v11, %v4066_v34  ;;  %v3607_v11 = vld [vmem:[%s4762_s3 + $0x48] sm:$0xff] }
 0x5fe   : > { %1372 = vmatpush.bf16.msra.mxu1 %v3607_v11 }
 0x5ff   : > { %v1196_v14 = vsub.f32 %v4176_v8, %v1195_v13  ;;  %v3611_v13 = vld [vmem:[%s4762_s3 + $0x68] sm:$0xff] }
 0x600   : > { %1424 = vmatpush.bf16.msra.mxu2 %v3611_v13 }
 0x601   : > { %v1197_v15 = vmul.f32 %v1196_v14, %v1196_v14 }
 0x603   : > { %v1198_v16 = vsel %vm731_vm2, %v1197_v15, 0.0  ;;  %v3608_v15 = vld [vmem:[%s4762_s3 + $0x50] sm:$0xff] }
 0x604   : > { %1199 = vadd.xlane.f32.xlu2 %v1198_v16  ;;  %v3610_v16 = vld [vmem:[%s4762_s3 + $0x60] sm:$0xff] }
 0x605   : > { %1425 = vmatpush.bf16.msra.mxu2 %v3610_v16 }
 0x677   : > { %v1200_v20 = vpop.xlane.xlu2 %1199 }
 0x678   : > { %v1201_v21 = vmul.f32 %v1200_v20, %v4066_v34 }
 0x67a   : > { %v1202_v22 = vadd.f32 1e-06, %v1201_v21 }
 0x67c   : > { %3739 = vrsqrt.f32 %v1202_v22  ;;  %vm1209_vm6 = vweird.f32 %v1202_v22 }
 0x682   : > { %v3740_v23 = vpop.eup %3739 }
 0x683   : > { %v1204_v24 = vmul.f32 %v3740_v23, %v1202_v22  ;;  %vm1210_vm5 = vweird.f32 %v3740_v23 }
 0x684   : > { %vm1211_vm10 = vmor %vm1209_vm6, %vm1210_vm5 }
 0x685   : > { %v1205_v27 = vmul.f32 %v3740_v23, %v1204_v24 }
 0x687   : > { %v1206_v28 = vmul.f32 0.5, %v1205_v27 }
 0x689   : > { %v1207_v29 = vsub.f32 1.5, %v1206_v28  ;;  %v4251_v28 = vld [vmem:[%s4743_s7 + $0x18] sm:$0xff] }
 0x68a   : > { %v1379_v39 = vperm.slane %v4251_v28, 2 }
 0x68b   : > { %v1208_v30 = vmul.f32 %v3740_v23, %v1207_v29  ;;  %v1345_v29 = vperm.slane %v4096_v62, 7  ;;  %v1405_v62 = vperm.slane %v4251_v28, 3 }
 0x68d   : > { %v1212_v32 = vsel %vm1211_vm10, %v3740_v23, %v1208_v30 }
 0x68e   : > { %v1213_v33 = vmul.f32 %v1212_v32, %v1196_v14  ;;  %v3606_v14 = vld [vmem:[%s4762_s3 + $0x40] sm:$0xff]  ;;  %v1347_v32 = vperm.slane %v4251_v28, 0 }
 0x68f   : > { %1373 = vmatpush.bf16.msra.mxu1 %v3606_v14 }
 0x690   : > { %v1215_v36 = vmul.f32 %v1214_v31, %v1213_v33 }
 0x692   : > { %v1217_v37 = vadd.f32 %v1216_v35, %v1215_v36 }
 0x694   : > { %v1218_v38 = vpack.c.bf16 %v1217_v37, %v1217_v37 }
 0x696   : > { %3324 = vmatmul.msk.bf16.vlgmr.msrb.gmra.mxu2 %vm779_vm7, %v1218_v38  ;;  %v1350_v38 = vperm.slane %v4251_v28, 1 }
 0x719   : > { %v1246_v47 = vpop.f32.mrf.mxu2 }
 0x71a   : > { %v1247_v48 = vadd.f32 %v3715_v46, %v1246_v47 }
 0x71c   : > { %v1250_v49 = vmul.f32 %v1247_v48, %v1247_v48 }
 0x71e   : > { %v1251_v18 = vmul.f32 %v1250_v49, %v1247_v48 }
 0x720   : > { %v1252_v50 = vmul.f32 0.044715, %v1251_v18 }
 0x721   : > { %v1248_v51 = vpop.f32.mrf.mxu2 }
 0x722   : > { %v1253_v52 = vadd.f32 %v1252_v50, %v1247_v48 }
 0x724   : > { %v1254_v53 = vmul.f32 0.7978846, %v1253_v52 }
 0x726   : > { %3741 = vtanh.f32 %v1254_v53 }
 0x72c   : > { %v3742_v54 = vpop.eup %3741 }
 0x72d   : > { %v1256_v56 = vadd.f32 1.0, %v3742_v54 }
 0x72f   : > { %v1257_v57 = vmul.f32 0.5, %v1256_v56 }
 0x731   : > { %v1258_v58 = vmul.f32 %v1257_v57, %v1247_v48 }
 0x733   : > { %v1259_v55 = vpack.c.bf16 %v1258_v58, %v1258_v58 }
 0x735   : > { %1317 = vmatmul.bf16.vlgmr.msra.gmra.mxu0 %v1259_v55 }
 0x7b2   : > { %v1318_v60 = vpop.f32.mrf.mxu0 }
 0x7b3   : > { %v1319_v61 = vadd.f32 %v1318_v60, %v1260_v59 }
 0x7b5   : > { %v4222_v63 = vadd.f32 %v1319_v61, %v4176_v8  ;;  %v3609_v8 = vld [vmem:[%s4762_s3 + $0x58] sm:$0xff] }
 0x7b6   : > { %1398 = vmatpush.bf16.msra.mxu3 %v3609_v8 }
 0x7b7   : > { %v1323_v0 = vsel %vm731_vm2, %v4222_v63, 0.0 }
 0x7b8   : > { %1324 = vadd.xlane.f32.xlu0 %v1323_v0 }
 0x7ba   : > { %v1320_v1 = vpop.f32.mrf.mxu0  ;;  %1399 = vmatpush.bf16.msra.mxu3 %v3608_v15 }
 0x82b   : > { %v1325_v4 = vpop.xlane.xlu0 %1324 }
 0x82c   : > { %v1326_v5 = vmul.f32 %v1325_v4, %v4066_v34 }
 0x82e   : > { %v1327_v7 = vsub.f32 %v4222_v63, %v1326_v5 }
 0x830   : > { %v1328_v9 = vmul.f32 %v1327_v7, %v1327_v7 }
 0x832   : > { %v1329_v10 = vsel %vm731_vm2, %v1328_v9, 0.0 }
 0x833   : > { %1330 = vadd.xlane.f32.xlu1 %v1329_v10 }
 0x8a6   : > { %v1331_v17 = vpop.xlane.xlu1 %1330 }
 0x8a7   : > { %v1332_v26 = vmul.f32 %v1331_v17, %v4066_v34 }
 0x8a9   : > { %v1333_v19 = vadd.f32 1e-06, %v1332_v26 }
 0x8ab   : > { %3743 = vrsqrt.f32 %v1333_v19  ;;  %vm1340_vm12 = vweird.f32 %v1333_v19 }
 0x8b1   : > { %v3744_v20 = vpop.eup %3743 }
 0x8b2   : > { %v1335_v21 = vmul.f32 %v3744_v20, %v1333_v19  ;;  %vm1341_vm11 = vweird.f32 %v3744_v20 }
 0x8b3   : > { %vm1342_vm13 = vmor %vm1340_vm12, %vm1341_vm11 }
 0x8b4   : > { %v1336_v22 = vmul.f32 %v3744_v20, %v1335_v21 }
 0x8b6   : > { %v1337_v23 = vmul.f32 0.5, %v1336_v22 }
 0x8b8   : > { %v1338_v24 = vsub.f32 1.5, %v1337_v23 }
 0x8ba   : > { %v1339_v27 = vmul.f32 %v3744_v20, %v1338_v24 }
 0x8bc   : > { %v1343_v30 = vsel %vm1342_vm13, %v3744_v20, %v1339_v27 }
 0x8bd   : > { %v1344_v31 = vmul.f32 %v1343_v30, %v1327_v7 }
 0x8bf   : > { %v1346_v33 = vmul.f32 %v1345_v29, %v1344_v31 }
 0x8c1   : > { %v1348_v35 = vadd.f32 %v1347_v32, %v1346_v33 }
 0x8c3   : > { %v1349_v36 = vpack.c.bf16 %v1348_v35, %v1348_v35 }
 0x8c5   : > { %3365 = vmatmul.msk.bf16.vlgmr.msra.gmra.mxu1 %vm779_vm7, %v1349_v36  ;;  %3374 = vmatmul.msk.bf16.vlgmr.msra.gmra.mxu3 %vm779_vm7, %v1349_v36 }
 0x8c6   : > { %3383 = vmatmul.msk.bf16.vlgmr.msra.gmra.mxu2 %vm779_vm7, %v1349_v36 }
 0x942   : > { %v1375_v37 = vpop.f32.mrf.mxu1 }
 0x943   : > { %v4261_v40 = vadd.f32 %v1375_v37, %v1350_v38 }
 0x945   : > { %v1431_v46 = vmul.f32 %v4261_v40, %v4103_v2  ;;  %v1512_v47 = vmul.f32 %v4261_v40, %v4119_v12  ;;  %v1587_v37 = vmul.f32 %v4261_v40, %v4105_v3  ;;  %v1662_v38 = vmul.f32 %v4261_v40, %v4107_v6 }
 0x948   : > { %v1401_v41 = vpop.f32.mrf.mxu3 }
 0x949   : > { %v1402_v42 = vadd.f32 %v1401_v41, %v1379_v39  ;;  %v1427_v43 = vpop.f32.mrf.mxu2 }
 0x94a   : > { %v1428_v44 = vadd.f32 %v1427_v43, %v1405_v62  ;;  %v1377_v45 = vpop.f32.mrf.mxu1 }
 0x94b   : > { %3384 = vmatpush.xpose.msk.msrb.mxu1 %vm779_vm7, %v1402_v42  ;;  %3388 = vmatpush.xpose.msk.msrb.mxu3 %vm779_vm7, %v1402_v42 }
 0x94c   : > { %3390 = vmatpush.msk.msrb.mxu2 %vm907_vm8, %v1428_v44  ;;  %3398 = vmatpush.msk.msrb.mxu0 %vm907_vm8, %v1428_v44 }
 0x94e   : > { %3396 = vmatpush.xpose.msk.msra.mxu2 %vm779_vm7, %v1402_v42  ;;  %3385 = vmatmul.msk.f32.vlgmr.msrb.gmra.mxu1 %vm779_vm7, %v1431_v46 }
 0x94f   : > { %3386 = vmatpush.msk.msra.mxu1 %vm907_vm8, %v1428_v44  ;;  %3394 = vmatpush.msk.msra.mxu3 %vm907_vm8, %v1428_v44 }
 0x950   : > { %3389 = vmatmul.msk.f32.vlgmr.msrb.gmra.mxu3 %vm779_vm7, %v1512_v47  ;;  %v1403_v48 = vpop.f32.mrf.mxu3 }
 0x951   : > { %3392 = vmatpush.xpose.msk.msrb.mxu1 %vm779_vm7, %v1402_v42  ;;  %v1429_v49 = vpop.f32.mrf.mxu2 }
 0x9cb   : > { %v1455_v18 = vpop.f32.mrf.mxu1 }
 0x9cc   : > { %v1458_v50 = vmul.f32 0.35355338, %v1455_v18 }
 0x9ce   : > { %v1459_v51 = vadd.f32 %v1458_v50, %v4135_v25 }
 0x9d0   : > { %v1460_v52 = vsel %vm878_vm9, %v1459_v51, -inf }
 0x9d1   : > { %1461 = vmax.xlane.f32.xlu2 %v1460_v52 }
 0x9d3   : > { %v1533_v53 = vpop.f32.mrf.mxu3 }
 0x9d4   : > { %v1536_v54 = vmul.f32 0.35355338, %v1533_v53 }
 0x9d6   : > { %v1537_v56 = vadd.f32 %v1536_v54, %v4135_v25 }
 0x9d8   : > { %v1538_v57 = vsel %vm878_vm9, %v1537_v56, -inf }
 0x9d9   : > { %1539 = vmax.xlane.f32.xlu0 %v1538_v57 }
 0xa44   : > { %v1462_v58 = vpop.xlane.xlu2 %1461 }
 0xa45   : > { %v1463_v55 = vsub.f32 %v1459_v51, %v1462_v58 }
 0xa47   : > { %v1464_v59 = vmul.f32 1.442695, %v1463_v55 }
 0xa49   : > { %3745 = vpow2.f32 %v1464_v59 }
 0xa4c   : > { %v1540_v60 = vpop.xlane.xlu0 %1539 }
 0xa4d   : > { %v1541_v61 = vsub.f32 %v1537_v56, %v1540_v60 }
 0xa4f   : > { %v1542_v0 = vmul.f32 1.442695, %v1541_v61  ;;  %v3746_v1 = vpop.eup %3745 }
 0xa50   : > { %v1466_v4 = vsel %vm878_vm9, %v3746_v1, 0.0 }
 0xa51   : > { %3747 = vpow2.f32 %v1542_v0  ;;  %1467 = vadd.xlane.f32.xlu1 %v1466_v4 }
 0xa57   : > { %v3748_v5 = vpop.eup %3747 }
 0xa58   : > { %v1544_v7 = vsel %vm878_vm9, %v3748_v5, 0.0 }
 0xa59   : > { %1545 = vadd.xlane.f32.xlu2 %v1544_v7 }
 0xac4   : > { %v1468_v9 = vpop.xlane.xlu1 %1467 }
 0xac5   : > { %3749 = vrcp.f32 %v1468_v9  ;;  %v1480_v14 = vand.u32 2147483648, %v1468_v9  ;;  %v1478_v16 = vand.u32 2147483647, %v1468_v9  ;;  %vm1474_vm15 = vweird.f32 %v1468_v9 }
 0xac7   : > { %v1481_v19 = vor.u32 1.1754944e-38, %v1480_v14  ;;  %vm1479_vm5 = vcmp.eq.f32.partialorder %v1478_v16, 8.507059e+37 }
 0xacb   : > { %v3750_v10 = vpop.eup %3749 }
 0xacc   : > { %v1546_v11 = vpop.xlane.xlu2 %1545  ;;  %v1470_v8 = vmul.f32 %v3750_v10, %v1468_v9  ;;  %vm1475_vm14 = vweird.f32 %v3750_v10 }
 0xacd   : > { %3751 = vrcp.f32 %v1546_v11  ;;  %vm1476_vm3 = vmor %vm1474_vm15, %vm1475_vm14  ;;  %v1558_v24 = vand.u32 2147483648, %v1546_v11  ;;  %v1556_v30 = vand.u32 2147483647, %v1546_v11  ;;  %vm1552_vm10 = vweird.f32 %v1546_v11 }
 0xace   : > { %v1471_v13 = vsub.f32 1.0, %v1470_v8 }
 0xacf   : > { %v1559_v32 = vor.u32 1.1754944e-38, %v1558_v24  ;;  %vm1557_vm12 = vcmp.eq.f32.partialorder %v1556_v30, 8.507059e+37 }
 0xad0   : > { %v1472_v15 = vmul.f32 %v3750_v10, %v1471_v13 }
 0xad2   : > { %v1473_v26 = vadd.f32 %v3750_v10, %v1472_v15 }
 0xad3   : > { %v3752_v17 = vpop.eup %3751 }
 0xad4   : > { %v1548_v20 = vmul.f32 %v3752_v17, %v1546_v11  ;;  %v1477_v21 = vsel %vm1476_vm3, %v3750_v10, %v1473_v26  ;;  %vm1553_vm6 = vweird.f32 %v3752_v17 }
 0xad5   : > { %v1482_v22 = vsel %vm1479_vm5, %v1481_v19, %v1477_v21  ;;  %vm1554_vm11 = vmor %vm1552_vm10, %vm1553_vm6 }
 0xad6   : > { %v1549_v23 = vsub.f32 1.0, %v1548_v20  ;;  %v1483_v27 = vmul.f32 %v3746_v1, %v1482_v22 }
 0xad8   : > { %v1550_v29 = vmul.f32 %v3752_v17, %v1549_v23  ;;  %3387 = vmatmul.msk.f32.vlgmr.msra.gmra.mxu1 %vm903_vm4, %v1483_v27  ;;  %v3613_v27 = vld [vmem:[%s4762_s3 + $0x78] sm:$0xff] }
 0xad9   : > { %1760 = vmatpush.bf16.msra.mxu1 %v3613_v27 }
 0xada   : > { %v1551_v31 = vadd.f32 %v3752_v17, %v1550_v29  ;;  %v3612_v29 = vld [vmem:[%s4762_s3 + $0x70] sm:$0xff] }
 0xadc   : > { %v1555_v33 = vsel %vm1554_vm11, %v3752_v17, %v1551_v31 }
 0xadd   : > { %v1560_v35 = vsel %vm1557_vm12, %v1559_v32, %v1555_v33  ;;  %1761 = vmatpush.bf16.msra.mxu1 %v3612_v29 }
 0xade   : > { %v1561_v36 = vmul.f32 %v3748_v5, %v1560_v35 }
 0xae0   : > { %3391 = vmatmul.msk.f32.vlgmr.msrb.gmra.mxu2 %vm903_vm4, %v1561_v36  ;;  %3393 = vmatmul.msk.f32.vlgmr.msrb.gmra.mxu1 %vm779_vm7, %v1587_v37 }
 0xae8   : > { %3397 = vmatmul.msk.f32.vlgmr.msra.gmra.mxu2 %vm779_vm7, %v1662_v38  ;;  %v1738_v38 = vperm.slane %v4251_v28, 4 }
 0xb55   : > { %v1507_v39 = vpop.f32.mrf.mxu1 }
 0xb56   : > { %v1510_v45 = vmul.f32 %v1507_v39, %v4103_v2 }
 0xb5d   : > { %v1608_v62 = vpop.f32.mrf.mxu1 }
 0xb5e   : > { %v1611_v41 = vmul.f32 0.35355338, %v1608_v62 }
 0xb60   : > { %v1612_v42 = vadd.f32 %v1611_v41, %v4135_v25 }
 0xb62   : > { %v1613_v44 = vsel %vm878_vm9, %v1612_v42, -inf }
 0xb63   : > { %v1582_v43 = vpop.f32.mrf.mxu2  ;;  %1614 = vmax.xlane.f32.xlu0 %v1613_v44 }
 0xb64   : > { %v1585_v46 = vmul.f32 %v1582_v43, %v4119_v12 }
 0xb66   : > { %v4295_v47 = vadd.f32 %v1585_v46, %v1510_v45 }
 0xb6b   : > { %v1683_v48 = vpop.f32.mrf.mxu2 }
 0xb6c   : > { %v1686_v49 = vmul.f32 0.35355338, %v1683_v48 }
 0xb6e   : > { %v1687_v40 = vadd.f32 %v1686_v49, %v4135_v25  ;;  %v3627_v49 = vld [vmem:[%s4740_s4 + $0x18] sm:$0xff] }
 0xb6f   : > { %1819 = vmatpush.bf16.msrb.mxu3 %v3627_v49 }
 0xb70   : > { %v1688_v18 = vsel %vm878_vm9, %v1687_v40, -inf }
 0xb71   : > { %1689 = vmax.xlane.f32.xlu1 %v1688_v18 }
 0xbd6   : > { %v1615_v50 = vpop.xlane.xlu0 %1614 }
 0xbd7   : > { %v1616_v51 = vsub.f32 %v1612_v42, %v1615_v50 }
 0xbd9   : > { %v1617_v52 = vmul.f32 1.442695, %v1616_v51 }
 0xbdb   : > { %3753 = vpow2.f32 %v1617_v52 }
 0xbe1   : > { %v3754_v53 = vpop.eup %3753 }
 0xbe2   : > { %v1619_v54 = vsel %vm878_vm9, %v3754_v53, 0.0 }
 0xbe3   : > { %1620 = vadd.xlane.f32.xlu2 %v1619_v54 }
 0xbe4   : > { %v1690_v56 = vpop.xlane.xlu1 %1689 }
 0xbe5   : > { %v1691_v57 = vsub.f32 %v1687_v40, %v1690_v56  ;;  %v3645_v40 = vld [vmem:[%s4741_s5 + $0x78] sm:$0xff] }
 0xbe6   : > { %1885 = vmatpush.bf16.msrb.mxu2 %v3645_v40 }
 0xbe7   : > { %v1692_v58 = vmul.f32 1.442695, %v1691_v57 }
 0xbe9   : > { %3755 = vpow2.f32 %v1692_v58 }
 0xbef   : > { %v3756_v55 = vpop.eup %3755 }
 0xbf0   : > { %v1694_v59 = vsel %vm878_vm9, %v3756_v55, 0.0 }
 0xbf1   : > { %1695 = vadd.xlane.f32.xlu0 %v1694_v59 }
 0xc56   : > { %v1621_v25 = vpop.xlane.xlu2 %1620 }
 0xc57   : > { %3757 = vrcp.f32 %v1621_v25  ;;  %v1633_v1 = vand.u32 2147483648, %v1621_v25  ;;  %v1631_v5 = vand.u32 2147483647, %v1621_v25  ;;  %vm1627_vm14 = vweird.f32 %v1621_v25 }
 0xc59   : > { %v1634_v10 = vor.u32 1.1754944e-38, %v1633_v1  ;;  %vm1632_vm3 = vcmp.eq.f32.partialorder %v1631_v5, 8.507059e+37  ;;  %v3643_v5 = vld [vmem:[%s4741_s5 + $0x68] sm:$0xff] }
 0xc5d   : > { %v3758_v60 = vpop.eup %3757 }
 0xc5e   : > { %v1623_v61 = vmul.f32 %v3758_v60, %v1621_v25  ;;  %vm1628_vm13 = vweird.f32 %v3758_v60 }
 0xc5f   : > { %vm1629_vm15 = vmor %vm1627_vm14, %vm1628_vm13 }
 0xc60   : > { %v1624_v0 = vsub.f32 1.0, %v1623_v61 }
 0xc62   : > { %v1625_v4 = vmul.f32 %v3758_v60, %v1624_v0 }
 0xc64   : > { %v1696_v7 = vpop.xlane.xlu0 %1695  ;;  %v1626_v9 = vadd.f32 %v3758_v60, %v1625_v4  ;;  %v3644_v4 = vld [vmem:[%s4741_s5 + $0x70] sm:$0xff] }
 0xc65   : > { %3759 = vrcp.f32 %v1696_v7  ;;  %v1708_v17 = vand.u32 2147483648, %v1696_v7  ;;  %v1706_v19 = vand.u32 2147483647, %v1696_v7  ;;  %vm1702_vm5 = vweird.f32 %v1696_v7  ;;  %1886 = vmatpush.bf16.msrb.mxu2 %v3644_v4  ;;  %v439_v4 = vld [vmem:[%s4055_s19 + $0x8] sm:$0xff] }
 0xc66   : > { %v1630_v11 = vsel %vm1629_vm15, %v3758_v60, %v1626_v9  ;;  %v1792_v60 = vperm.slane %v4251_v28, 6  ;;  %v3641_v9 = vld [vmem:[%s4741_s5 + $0x58] sm:$0xff] }
 0xc67   : > { %v1635_v8 = vsel %vm1632_vm3, %v1634_v10, %v1630_v11  ;;  %v1709_v21 = vor.u32 1.1754944e-38, %v1708_v17  ;;  %vm1707_vm10 = vcmp.eq.f32.partialorder %v1706_v19, 8.507059e+37  ;;  %v3640_v10 = vld [vmem:[%s4741_s5 + $0x50] sm:$0xff]  ;;  %v3639_v11 = vld [vmem:[%s4741_s5 + $0x48] sm:$0xff]  ;;  %vm2039_vm3 = vcmask 254976  }
 0xc68   : > { %v1636_v13 = vmul.f32 %v3754_v53, %v1635_v8  ;;  %v3638_v8 = vld [vmem:[%s4741_s5 + $0x40] sm:$0xff] }
 0xc69   : > { %1887 = vmatpush.bf16.msrb.mxu2 %v3643_v5 }
 0xc6a   : > { %3395 = vmatmul.msk.f32.vlgmr.msra.gmra.mxu3 %vm903_vm4, %v1636_v13  ;;  %v3716_v13 = vld [vmem:[%s4742_s6 + $0x1] ss:$0 sm:$0xff] }
 0xc6b   : > { %v3760_v14 = vpop.eup %3759 }
 0xc6c   : > { %v1698_v15 = vmul.f32 %v3760_v14, %v1696_v7  ;;  %vm1703_vm9 = vweird.f32 %v3760_v14  ;;  %v3642_v7 = vld [vmem:[%s4741_s5 + $0x60] sm:$0xff] }
 0xc6d   : > { %vm1704_vm6 = vmor %vm1702_vm5, %vm1703_vm9  ;;  %1888 = vmatpush.bf16.msrb.mxu2 %v3642_v7  ;;  %v440_v7 = vld [vmem:[%s4055_s19 + $0x10] sm:$0xff]  ;;  %vm2028_vm9 = vcmask 1042432  }
 0xc6e   : > { %v1699_v16 = vsub.f32 1.0, %v1698_v15 }
 0xc70   : > { %v1700_v26 = vmul.f32 %v3760_v14, %v1699_v16 }
 0xc71   : > { %1889 = vmatpush.bf16.msrb.mxu2 %v3641_v9 }
 0xc72   : > { %v1701_v20 = vadd.f32 %v3760_v14, %v1700_v26 }
 0xc74   : > { %v1705_v22 = vsel %vm1704_vm6, %v3760_v14, %v1701_v20 }
 0xc75   : > { %v1710_v23 = vsel %vm1707_vm10, %v1709_v21, %v1705_v22  ;;  %1890 = vmatpush.bf16.msrb.mxu2 %v3640_v10  ;;  %v572_v10 = vld [vmem:[%s4743_s7 + $0x30] sm:$0xff] }
 0xc76   : > { %v1711_v24 = vmul.f32 %v3756_v55, %v1710_v23  ;;  %v1790_v55 = vperm.slane %v4251_v28, 5 }
 0xc78   : > { %3399 = vmatmul.msk.f32.vlgmr.msrb.gmra.mxu0 %vm903_vm4, %v1711_v24 }
 0xc79   : > { %1891 = vmatpush.bf16.msrb.mxu2 %v3639_v11 }
 0xc7d   : > { %1892 = vmatpush.bf16.msrb.mxu2 %v3638_v8 }
 0xced   : > { %v1657_v30 = vpop.f32.mrf.mxu3 }
 0xcee   : > { %v1660_v31 = vmul.f32 %v1657_v30, %v4105_v3  ;;  %v1836_v30 = vperm.slane %v4251_v28, 7 }
 0xcf0   : > { %v1661_v33 = vadd.f32 %v1660_v31, %v4295_v47 }
 0xcf5   : > { %v1732_v32 = vpop.f32.mrf.mxu0 }
 0xcf6   : > { %v1735_v35 = vmul.f32 %v1732_v32, %v4107_v6 }
 0xcf8   : > { %v1736_v36 = vadd.f32 %v1735_v35, %v1661_v33 }
 0xcfa   : > { %v1737_v37 = vpack.c.bf16 %v1736_v36, %v1736_v36 }
 0xcfc   : > { %3408 = vmatmul.msk.bf16.vlgmr.msra.gmra.mxu1 %vm779_vm7, %v1737_v37 }
 0xd79   : > { %v1763_v39 = vpop.f32.mrf.mxu1 }
 0xd7a   : > { %v1764_v62 = vadd.f32 %v1763_v39, %v1738_v38 }
 0xd7c   : > { %v4315_v41 = vadd.f32 %v1764_v62, %v4222_v63  ;;  %v3626_v63 = vld [vmem:[%s4740_s4 + $0x10] sm:$0xff] }
 0xd7d   : > { %1820 = vmatpush.bf16.msrb.mxu3 %v3626_v63 }
 0xd7e   : > { %v1768_v42 = vsel %vm731_vm2, %v4315_v41, 0.0 }
 0xd7f   : > { %1769 = vadd.xlane.f32.xlu1 %v1768_v42 }
 0xd81   : > { %v1765_v43 = vpop.f32.mrf.mxu1 }
 0xdf2   : > { %v1770_v44 = vpop.xlane.xlu1 %1769 }
 0xdf3   : > { %v1771_v45 = vmul.f32 %v1770_v44, %v4066_v34 }
 0xdf5   : > { %v1772_v46 = vsub.f32 %v4315_v41, %v1771_v45 }
 0xdf7   : > { %v1773_v47 = vmul.f32 %v1772_v46, %v1772_v46 }
 0xdf9   : > { %v1774_v48 = vsel %vm731_vm2, %v1773_v47, 0.0 }
 0xdfa   : > { %1775 = vadd.xlane.f32.xlu2 %v1774_v48  ;;  %v571_v48 = vld [vmem:[%s4743_s7 + $0x28] sm:$0xff] }
 0xdfb   : > { %v1921_v40 = vperm.slane %v571_v48, 1  ;;  %v1991_v9 = vperm.slane %v571_v48, 4  ;;  %v2029_v8 = vrot.slane %v571_v48, 5 }
 0xe6d   : > { %v1776_v18 = vpop.xlane.xlu2 %1775 }
 0xe6e   : > { %v1777_v50 = vmul.f32 %v1776_v18, %v4066_v34 }
 0xe70   : > { %v1778_v51 = vadd.f32 1e-06, %v1777_v50 }
 0xe72   : > { %3761 = vrsqrt.f32 %v1778_v51  ;;  %vm1785_vm12 = vweird.f32 %v1778_v51 }
 0xe78   : > { %v3762_v52 = vpop.eup %3761 }
 0xe79   : > { %v1780_v53 = vmul.f32 %v3762_v52, %v1778_v51  ;;  %vm1786_vm11 = vweird.f32 %v3762_v52  ;;  %v1923_v51 = vperm.slane %v571_v48, 2 }
 0xe7a   : > { %vm1787_vm13 = vmor %vm1785_vm12, %vm1786_vm11  ;;  %vm2269_vm12 = vcmask 1041408  }
 0xe7b   : > { %v1781_v54 = vmul.f32 %v3762_v52, %v1780_v53 }
 0xe7d   : > { %v1782_v56 = vmul.f32 0.5, %v1781_v54  ;;  %v448_v54 = vld [vmem:[%s4763_s2 + $0x20] sm:$0xff] }
 0xe7f   : > { %v1783_v57 = vsub.f32 1.5, %v1782_v56  ;;  %v3623_v56 = vld [vmem:[%s4762_s3 + $0xc8] sm:$0xff] }
 0xe81   : > { %v1784_v58 = vmul.f32 %v3762_v52, %v1783_v57  ;;  %v3622_v57 = vld [vmem:[%s4762_s3 + $0xc0] sm:$0xff] }
 0xe83   : > { %v1788_v59 = vsel %vm1787_vm13, %v3762_v52, %v1784_v58  ;;  %vm2213_vm13 = vcmask 80896  }
 0xe84   : > { %v1789_v25 = vmul.f32 %v1788_v59, %v1772_v46  ;;  %v441_v59 = vld [vmem:[%s4055_s19 + $0x18] sm:$0xff] }
 0xe86   : > { %v1791_v61 = vmul.f32 %v1790_v55, %v1789_v25  ;;  %v442_v55 = vld [vmem:[%s4055_s19 + $0x20] sm:$0xff]  ;;  %v3886_v25 = vmov 0  }
 0xe87   : > { %3714 = vset.pattern.permute.xlu0 %v3886_v25  ;;  %3713 = vset.pattern.permute.xlu2 %v3886_v25 }
 0xe88   : > { %v1793_v0 = vadd.f32 %v1792_v60, %v1791_v61  ;;  %1983 = vperm.xlu2 %3713, %v441_v59   ;;  %v1952_v61 = vperm.slane %v571_v48, 3 }
 0xe8a   : > { %v1794_v1 = vpack.c.bf16 %v1793_v0, %v1793_v0 }
 0xe8c   : > { %3417 = vmatmul.msk.bf16.vlgmr.msrb.gmra.mxu3 %vm779_vm7, %v1794_v1 }
 0xee2   : > { %v1984_v11 = vpop.permute.xlu2 %1983 }
 0xf0f   : > { %v1822_v14 = vpop.f32.mrf.mxu3 }
 0xf10   : > { %v1823_v15 = vadd.f32 %v3716_v13, %v1822_v14  ;;  %v2030_v13 = vrot.slane %v572_v10, 5  ;;  %v1992_v14 = vmul.f32 %v1991_v9, %v1984_v11 }
 0xf12   : > { %v1826_v16 = vmul.f32 %v1823_v15, %v1823_v15 }
 0xf14   : > { %v1827_v17 = vmul.f32 %v1826_v16, %v1823_v15  ;;  %v2031_v16 = vsel %vm2028_vm9, %v2029_v8, %v2030_v13 }
 0xf16   : > { %v1828_v26 = vmul.f32 0.044715, %v1827_v17 }
 0xf17   : > { %v1824_v19 = vpop.f32.mrf.mxu3 }
 0xf18   : > { %v1829_v20 = vadd.f32 %v1828_v26, %v1823_v15 }
 0xf1a   : > { %v1830_v21 = vmul.f32 0.7978846, %v1829_v20 }
 0xf1c   : > { %3763 = vtanh.f32 %v1830_v21 }
 0xf22   : > { %v3764_v22 = vpop.eup %3763 }
 0xf23   : > { %v1832_v23 = vadd.f32 1.0, %v3764_v22 }
 0xf25   : > { %v1833_v24 = vmul.f32 0.5, %v1832_v23 }
 0xf27   : > { %v1834_v27 = vmul.f32 %v1833_v24, %v1823_v15 }
 0xf29   : > { %v1835_v29 = vpack.c.bf16 %v1834_v27, %v1834_v27 }
 0xf2b   : > { %1893 = vmatmul.bf16.vlgmr.msrb.gmra.mxu2 %v1835_v29 }
 0xfae   : > { %v1894_v31 = vpop.f32.mrf.mxu2 }
 0xfaf   : > { %v1895_v32 = vadd.f32 %v1894_v31, %v1836_v30 }
 0xfb1   : > { %v1898_v33 = vadd.f32 %v1895_v32, %v4315_v41 }
 0xfb3   : > { %v1899_v35 = vsel %vm731_vm2, %v1898_v33, 0.0 }
 0xfb4   : > { %1900 = vadd.xlane.f32.xlu0 %v1899_v35 }
 0xfb6   : > { %v1896_v36 = vpop.f32.mrf.mxu2 }
 0xfc8   : > { %1988 = vperm.xlu0 %3714, %v442_v55  }
0x1027   : > { %v1901_v37 = vpop.xlane.xlu0 %1900 }
0x1028   : > { %v1902_v38 = vmul.f32 %v1901_v37, %v4066_v34 }
0x102a   : > { %v1903_v39 = vsub.f32 %v1898_v33, %v1902_v38 }
0x102c   : > { %v1904_v62 = vmul.f32 %v1903_v39, %v1903_v39 }
0x102e   : > { %v1905_v42 = vsel %vm731_vm2, %v1904_v62, 0.0  ;;  %v3615_v62 = vld [vmem:[%s4762_s3 + $0x88] sm:$0xff] }
0x102f   : > { %1906 = vadd.xlane.f32.xlu1 %v1905_v42  ;;  %v3617_v42 = vld [vmem:[%s4762_s3 + $0x98] sm:$0xff]  ;;  %2110 = vmatpush.bf16.msra.mxu3 %v3615_v62 }
0x103a   : > { %v1989_v26 = vpop.permute.xlu0 %1988 }
0x103b   : > { %v1993_v20 = vmul.f32 %v1991_v9, %v1989_v26 }
0x10a2   : > { %v1907_v43 = vpop.xlane.xlu1 %1906 }
0x10a3   : > { %v1908_v44 = vmul.f32 %v1907_v43, %v4066_v34  ;;  %v3619_v43 = vld [vmem:[%s4762_s3 + $0xa8] sm:$0xff] }
0x10a5   : > { %v1909_v28 = vadd.f32 1e-06, %v1908_v44 }
0x10a7   : > { %3765 = vrsqrt.f32 %v1909_v28  ;;  %vm1916_vm15 = vweird.f32 %v1909_v28 }
0x10ad   : > { %v3766_v45 = vpop.eup %3765 }
0x10ae   : > { %v1911_v46 = vmul.f32 %v3766_v45, %v1909_v28  ;;  %vm1917_vm14 = vweird.f32 %v3766_v45 }
0x10af   : > { %vm1918_vm2 = vmor %vm1916_vm15, %vm1917_vm14  ;;  %vm2217_vm14 = vcmask 74752  }
0x10b0   : > { %v1912_v41 = vmul.f32 %v3766_v45, %v1911_v46  ;;  %v3614_v46 = vld [vmem:[%s4762_s3 + $0x80] sm:$0xff] }
0x10b1   : > { %2111 = vmatpush.bf16.msra.mxu3 %v3614_v46 }
0x10b2   : > { %v1913_v47 = vmul.f32 0.5, %v1912_v41  ;;  %v3616_v41 = vld [vmem:[%s4762_s3 + $0x90] sm:$0xff] }
0x10b4   : > { %v1914_v49 = vsub.f32 1.5, %v1913_v47  ;;  %v3618_v47 = vld [vmem:[%s4762_s3 + $0xa0] sm:$0xff] }
0x10b6   : > { %v1915_v63 = vmul.f32 %v3766_v45, %v1914_v49 }
0x10b8   : > { %v1919_v18 = vsel %vm1918_vm2, %v3766_v45, %v1915_v63 }
0x10b9   : > { %v1920_v50 = vmul.f32 %v1919_v18, %v1903_v39 }
0x10bb   : > { %v1922_v52 = vmul.f32 %v1921_v40, %v1920_v50 }
0x10bd   : > { %v1924_v53 = vadd.f32 %v1923_v51, %v1922_v52 }
0x10bf   : > { %3450 = vmatpush.msk.msra.mxu0 %vm907_vm8, %v1924_v53  ;;  %v1951_v58 = vpack.c.bf16 %v1924_v53, %v1924_v53 }
0x10c0   : > { %3451 = vmatmul.msk.f32.vlgmr.msra.gmra.mxu0 %vm903_vm4, %v448_v54 }
0x10c1   : > { %1974 = vmatpush.bf16.msrb.mxu0 %v3623_v56 }
0x10c5   : > { %1975 = vmatpush.bf16.msrb.mxu0 %v3622_v57 }
0x10c8   : > { %3460 = vmatmul.msk.bf16.vlgmr.msrb.gmra.mxu0 %vm779_vm7, %v1951_v58  ;;  %v4436_v58 = vld [vmem:[%s4743_s7 + $0x20] sm:$0xff] }
0x10c9   : > { %2137 = vmatpush.bf16.msra.mxu0 %v3617_v42 }
0x10cd   : > { %2138 = vmatpush.bf16.msra.mxu0 %v3616_v41 }
0x113d   : > { %v1948_v60 = vpop.f32.mrf.mxu0 }
0x113e   : > { %3063 = vst.msk [vmem:[%s4750_s15] sm:$0x3] %vm2039_vm3, %v1948_v60  ;;  %v2081_v60 = vperm.slane %v4436_v58, 0  ;;  %s4765_s15 = sand.u32 1, %s3875_s22  }
0x113f   : > { %s3072_s1 = scalar_lea.sflag [#allocation3], %s4765_s15 }
0x1145   : > { %v1977_v0 = vpop.f32.mrf.mxu0 }
0x1146   : > { %v1978_v1 = vadd.f32 %v1977_v0, %v1952_v61 }
0x1148   : > { %3461 = vmatpush.msk.msrb.mxu1 %vm907_vm8, %v1978_v1 }
0x1149   : > { %3462 = vmatmul.msk.f32.vlgmr.msrb.gmra.mxu1 %vm903_vm4, %v439_v4  ;;  %v2084_v4 = vperm.slane %v4436_v58, 1 }
0x114a   : > { %2164 = vmatpush.bf16.msra.mxu1 %v3619_v43 }
0x114d   : > { %v1979_v5 = vpop.f32.mrf.mxu0 }
0x114e   : > { %2165 = vmatpush.bf16.msra.mxu1 %v3618_v47 }
0x1151   : > { %3463 = vmatmul.msk.f32.gmra.mxu1 %vm903_vm4, %v440_v7 }
0x11c6   : > { %v2020_v15 = vpop.f32.mrf.mxu1 }
0x11c7   : > { %v2021_v17 = vadd.f32 %v2020_v15, %v1992_v14  ;;  %v2118_v15 = vperm.slane %v4436_v58, 3 }
0x11c9   : > { %v4399_v19 = vadd.f32 %v2031_v16, %v2021_v17  ;;  %v2145_v16 = vperm.slane %v4436_v58, 4 }
0x11cb   : > { %v2036_v21 = vsel %vm779_vm7, %v4399_v19, 0.0 }
0x11cc   : > { %2037 = vadd.xlane.f32.xlu1 %v2036_v21 }
0x11ce   : > { %v2023_v22 = vpop.f32.mrf.mxu1 }
0x11cf   : > { %v2024_v23 = vadd.f32 %v2023_v22, %v1993_v20  ;;  %v2088_v20 = vperm.slane %v4436_v58, 2 }
0x11d1   : > { %v4403_v24 = vadd.f32 %v2030_v13, %v2024_v23 }
0x11d3   : > { %v2040_v27 = vsel %vm2039_vm3, %v4403_v24, 0.0 }
0x11d4   : > { %2041 = vadd.xlane.f32.xlu1 %v2040_v27 }
0x123f   : > { %v2038_v29 = vpop.xlane.xlu1 %2037 }
0x1240   : > { %v2043_v30 = vmul.f32 %v2038_v29, %v4066_v34 }
0x1242   : > { %v2045_v31 = vsub.f32 %v4399_v19, %v2043_v30 }
0x1244   : > { %v2047_v32 = vmul.f32 %v2045_v31, %v2045_v31 }
0x1246   : > { %v2049_v33 = vsel %vm779_vm7, %v2047_v32, 0.0 }
0x1247   : > { %2050 = vadd.xlane.f32.xlu1 %v2049_v33  ;;  %v2042_v35 = vpop.xlane.xlu1 %2041 }
0x1248   : > { %v2044_v36 = vmul.f32 %v2042_v35, %v4066_v34 }
0x124a   : > { %v2046_v37 = vsub.f32 %v4403_v24, %v2044_v36 }
0x124c   : > { %v2048_v38 = vmul.f32 %v2046_v37, %v2046_v37 }
0x124e   : > { %v2052_v39 = vsel %vm2039_vm3, %v2048_v38, 0.0 }
0x124f   : > { %2053 = vadd.xlane.f32.xlu2 %v2052_v39 }
0x12ba   : > { %v2051_v44 = vpop.xlane.xlu1 %2050 }
0x12bb   : > { %v2055_v28 = vmul.f32 %v2051_v44, %v4066_v34  ;;  %v446_v44 = vld [vmem:[%s4763_s2 + $0x10] sm:$0xff] }
0x12bd   : > { %v2057_v45 = vadd.f32 1e-06, %v2055_v28 }
0x12bf   : > { %3767 = vrsqrt.f32 %v2057_v45  ;;  %vm2065_vm4 = vweird.f32 %v2057_v45 }
0x12c2   : > { %v2054_v48 = vpop.xlane.xlu2 %2053 }
0x12c3   : > { %v2056_v49 = vmul.f32 %v2054_v48, %v4066_v34 }
0x12c5   : > { %v3768_v63 = vpop.eup %3767  ;;  %v2058_v40 = vadd.f32 1e-06, %v2056_v49 }
0x12c6   : > { %v2060_v18 = vmul.f32 %v3768_v63, %v2057_v45  ;;  %vm2066_vm8 = vweird.f32 %v3768_v63 }
0x12c7   : > { %3769 = vrsqrt.f32 %v2058_v40  ;;  %vm2067_vm5 = vmor %vm2065_vm4, %vm2066_vm8  ;;  %vm2075_vm10 = vweird.f32 %v2058_v40 }
0x12c8   : > { %v2061_v50 = vmul.f32 %v3768_v63, %v2060_v18  ;;  %v447_v18 = vld [vmem:[%s4763_s2 + $0x18] sm:$0xff] }
0x12ca   : > { %v2062_v51 = vmul.f32 0.5, %v2061_v50 }
0x12cc   : > { %v2063_v52 = vsub.f32 1.5, %v2062_v51 }
0x12cd   : > { %v3770_v53 = vpop.eup %3769 }
0x12ce   : > { %v2064_v54 = vmul.f32 %v3768_v63, %v2063_v52  ;;  %v2070_v56 = vmul.f32 %v3770_v53, %v2058_v40  ;;  %vm2076_vm6 = vweird.f32 %v3770_v53 }
0x12cf   : > { %vm2077_vm11 = vmor %vm2075_vm10, %vm2076_vm6 }
0x12d0   : > { %v2071_v57 = vmul.f32 %v3770_v53, %v2070_v56  ;;  %v2068_v55 = vsel %vm2067_vm5, %v3768_v63, %v2064_v54 }
0x12d1   : > { %v2079_v61 = vmul.f32 %v2068_v55, %v2045_v31 }
0x12d2   : > { %v2072_v59 = vmul.f32 0.5, %v2071_v57 }
0x12d3   : > { %v2082_v5 = vmul.f32 %v2081_v60, %v2079_v61 }
0x12d4   : > { %v2073_v25 = vsub.f32 1.5, %v2072_v59 }
0x12d5   : > { %v2085_v10 = vadd.f32 %v2084_v4, %v2082_v5 }
0x12d6   : > { %v2074_v0 = vmul.f32 %v3770_v53, %v2073_v25 }
0x12d8   : > { %v2078_v1 = vsel %vm2077_vm11, %v3770_v53, %v2074_v0 }
0x12d9   : > { %v2080_v7 = vmul.f32 %v2078_v1, %v2046_v37 }
0x12db   : > { %v2083_v9 = vmul.f32 %v2081_v60, %v2080_v7 }
0x12dd   : > { %v2086_v11 = vadd.f32 %v2084_v4, %v2083_v9 }
0x12df   : > { %v2087_v8 = vpack.c.bf16 %v2086_v11, %v2085_v10 }
0x12e1   : > { %3472 = vmatmul.msk.bf16.vlgmr.msra.gmra.mxu3 %vm779_vm7, %v2087_v8  ;;  %3481 = vmatmul.msk.bf16.vlgmr.msra.gmra.mxu0 %vm779_vm7, %v2087_v8 }
0x12e2   : > { %3490 = vmatmul.msk.bf16.vlgmr.msra.gmra.mxu1 %vm779_vm7, %v2087_v8 }
0x135e   : > { %v2140_v13 = vpop.f32.mrf.mxu0 }
0x135f   : > { %v2167_v14 = vpop.f32.mrf.mxu1  ;;  %v2141_v30 = vadd.f32 %v2140_v13, %v2118_v15 }
0x1360   : > { %v2168_v27 = vadd.f32 %v2167_v14, %v2145_v16 }
0x1364   : > { %v2113_v17 = vpop.f32.mrf.mxu3 }
0x1365   : > { %v2114_v29 = vadd.f32 %v2113_v17, %v2088_v20 }
0x1366   : > { %v2142_v26 = vpop.f32.mrf.mxu0 }
0x1367   : > { %v2169_v21 = vpop.f32.mrf.mxu1  ;;  %v2143_v22 = vadd.f32 %v2142_v26, %v2118_v15  ;;  %v2172_v31 = vmul.f32 %v2114_v29, %v4103_v2  ;;  %v2300_v32 = vmul.f32 %v2114_v29, %v4119_v12  ;;  %v2416_v38 = vmul.f32 %v2114_v29, %v4105_v3 }
0x1368   : > { %v2170_v23 = vadd.f32 %v2169_v21, %v2145_v16  ;;  %v2532_v39 = vmul.f32 %v2114_v29, %v4107_v6 }
0x1369   : > { %3491 = vmatpush.xpose.msk.msrb.mxu3 %vm779_vm7, %v2143_v22  ;;  %3498 = vmatpush.xpose.msk.msrb.mxu0 %vm779_vm7, %v2143_v22 }
0x136a   : > { %3495 = vmatpush.msk.msra.mxu2 %vm2269_vm12, %v2170_v23  ;;  %3502 = vmatpush.msk.msrb.mxu1 %vm2269_vm12, %v2170_v23 }
0x136c   : > { %2288 = vmatpush.msra.mxu2 %v2168_v27  ;;  %2404 = vmatpush.msrb.mxu1 %v2168_v27  ;;  %v2115_v33 = vpop.f32.mrf.mxu3 }
0x136d   : > { %3492 = vmatpush.xpose.msk.msrb.mxu3 %vm779_vm7, %v2141_v30  ;;  %3499 = vmatpush.xpose.msk.msrb.mxu0 %vm779_vm7, %v2141_v30  ;;  %v2116_v35 = vadd.f32 %v2115_v33, %v2088_v20 }
0x136e   : > { %3509 = vmatpush.msk.msrb.mxu2 %vm2269_vm12, %v2170_v23  ;;  %3516 = vmatpush.msk.msra.mxu1 %vm2269_vm12, %v2170_v23 }
0x136f   : > { %v2173_v36 = vmul.f32 %v2116_v35, %v4103_v2  ;;  %v2301_v37 = vmul.f32 %v2116_v35, %v4119_v12  ;;  %v2417_v62 = vmul.f32 %v2116_v35, %v4105_v3  ;;  %v2533_v42 = vmul.f32 %v2116_v35, %v4107_v6 }
0x1370   : > { %2520 = vmatpush.msrb.mxu2 %v2168_v27  ;;  %2636 = vmatpush.msra.mxu1 %v2168_v27 }
0x1371   : > { %3505 = vmatpush.xpose.msk.msra.mxu3 %vm779_vm7, %v2143_v22  ;;  %3512 = vmatpush.xpose.msk.msra.mxu0 %vm779_vm7, %v2143_v22 }
0x1372   : > { %3493 = vmatmul.msk.f32.vlgmr.msrb.gmra.mxu3 %vm779_vm7, %v2172_v31  ;;  %3500 = vmatmul.msk.f32.vlgmr.msrb.gmra.mxu0 %vm779_vm7, %v2300_v32 }
0x1375   : > { %3506 = vmatpush.xpose.msk.msra.mxu3 %vm779_vm7, %v2141_v30  ;;  %3513 = vmatpush.xpose.msk.msra.mxu0 %vm779_vm7, %v2141_v30 }
0x137a   : > { %3494 = vmatmul.msk.f32.gmra.mxu3 %vm779_vm7, %v2173_v36  ;;  %3501 = vmatmul.msk.f32.gmra.mxu0 %vm779_vm7, %v2301_v37 }
0x1382   : > { %3507 = vmatmul.msk.f32.vlgmr.msra.gmra.mxu3 %vm779_vm7, %v2416_v38  ;;  %3514 = vmatmul.msk.f32.vlgmr.msra.gmra.mxu0 %vm779_vm7, %v2532_v39 }
0x138a   : > { %3508 = vmatmul.msk.f32.gmra.mxu3 %vm779_vm7, %v2417_v62  ;;  %3515 = vmatmul.msk.f32.gmra.mxu0 %vm779_vm7, %v2533_v42 }
0x13ef   : > { %v2325_v43 = vpop.f32.mrf.mxu0 }
0x13f0   : > { %v2331_v28 = vmul.f32 0.35355338, %v2325_v43 }
0x13f2   : > { %v2333_v45 = vadd.f32 %v2331_v28, %v446_v44 }
0x13f4   : > { %v2335_v46 = vsel %vm2213_vm13, %v2333_v45, -inf }
0x13f5   : > { %v2203_v41 = vpop.f32.mrf.mxu3  ;;  %2336 = vmax.xlane.f32.xlu0 %v2335_v46 }
0x13f6   : > { %v2209_v47 = vmul.f32 0.35355338, %v2203_v41 }
0x13f7   : > { %v2328_v48 = vpop.f32.mrf.mxu0 }
0x13f8   : > { %v2211_v49 = vadd.f32 %v2209_v47, %v446_v44  ;;  %v2332_v63 = vmul.f32 0.35355338, %v2328_v48 }
0x13fa   : > { %v2214_v40 = vsel %vm2213_vm13, %v2211_v49, -inf  ;;  %v2334_v51 = vadd.f32 %v2332_v63, %v447_v18 }
0x13fb   : > { %2215 = vmax.xlane.f32.xlu1 %v2214_v40 }
0x13fc   : > { %v2338_v56 = vsel %vm2217_vm14, %v2334_v51, -inf }
0x13fd   : > { %v2206_v50 = vpop.f32.mrf.mxu3 }
0x13fe   : > { %v2210_v54 = vmul.f32 0.35355338, %v2206_v50 }
0x13ff   : > { %v2557_v52 = vpop.f32.mrf.mxu0 }
0x1400   : > { %v2563_v53 = vmul.f32 0.35355338, %v2557_v52  ;;  %v2212_v25 = vadd.f32 %v2210_v54, %v447_v18 }
0x1402   : > { %v2565_v57 = vadd.f32 %v2563_v53, %v446_v44  ;;  %v2218_v61 = vsel %vm2217_vm14, %v2212_v25, -inf }
0x1403   : > { %2339 = vmax.xlane.f32.xlu1 %v2338_v56 }
0x1404   : > { %v2567_v55 = vsel %vm2213_vm13, %v2565_v57, -inf }
0x1405   : > { %v2441_v59 = vpop.f32.mrf.mxu3  ;;  %2568 = vmax.xlane.f32.xlu2 %v2567_v55 }
0x1406   : > { %v2447_v60 = vmul.f32 0.35355338, %v2441_v59 }
0x1407   : > { %v2560_v9 = vpop.f32.mrf.mxu0 }
0x1408   : > { %v2449_v0 = vadd.f32 %v2447_v60, %v446_v44  ;;  %v2564_v10 = vmul.f32 0.35355338, %v2560_v9 }
0x140a   : > { %v2451_v5 = vsel %vm2213_vm13, %v2449_v0, -inf  ;;  %v2566_v8 = vadd.f32 %v2564_v10, %v447_v18 }
0x140b   : > { %2219 = vmax.xlane.f32.xlu1 %v2218_v61 }
0x140c   : > { %v2570_v13 = vsel %vm2217_vm14, %v2566_v8, -inf }
0x140d   : > { %v2444_v1 = vpop.f32.mrf.mxu3 }
0x140e   : > { %v2448_v4 = vmul.f32 0.35355338, %v2444_v1 }
0x1410   : > { %v2450_v7 = vadd.f32 %v2448_v4, %v447_v18 }
0x1412   : > { %v2454_v11 = vsel %vm2217_vm14, %v2450_v7, -inf }
0x1413   : > { %2452 = vmax.xlane.f32.xlu1 %v2451_v5 }
0x141b   : > { %2455 = vmax.xlane.f32.xlu1 %v2454_v11 }
0x1423   : > { %2571 = vmax.xlane.f32.xlu1 %v2570_v13 }
0x1468   : > { %v2337_v14 = vpop.xlane.xlu0 %2336 }
0x1469   : > { %v2341_v17 = vsub.f32 %v2333_v45, %v2337_v14 }
0x146b   : > { %v2343_v20 = vmul.f32 1.442695, %v2341_v17 }
0x146e   : > { %v2216_v15 = vpop.xlane.xlu1 %2215 }
0x146f   : > { %v2221_v16 = vsub.f32 %v2211_v49, %v2216_v15 }
0x1471   : > { %v2223_v26 = vmul.f32 1.442695, %v2221_v16 }
0x1473   : > { %3771 = vpow2.f32 %v2223_v26 }
0x1474   : > { %3773 = vpow2.f32 %v2343_v20 }
0x1476   : > { %v2340_v21 = vpop.xlane.xlu1 %2339 }
0x1477   : > { %v2342_v31 = vsub.f32 %v2334_v51, %v2340_v21 }
0x1478   : > { %v2569_v36 = vpop.xlane.xlu2 %2568 }
0x1479   : > { %v4488_v22 = vpop.eup %3771  ;;  %v2345_v35 = vmul.f32 1.442695, %v2342_v31  ;;  %v2573_v62 = vsub.f32 %v2565_v57, %v2569_v36 }
0x147a   : > { %v2227_v23 = vsel %vm2213_vm13, %v4488_v22, 0.0  ;;  %v4492_v29 = vpop.eup %3773 }
0x147b   : > { %2228 = vadd.xlane.f32.xlu2 %v2227_v23  ;;  %v2347_v33 = vsel %vm2213_vm13, %v4492_v29, 0.0  ;;  %v2575_v44 = vmul.f32 1.442695, %v2573_v62 }
0x147e   : > { %v2220_v27 = vpop.xlane.xlu1 %2219 }
0x147f   : > { %v2222_v30 = vsub.f32 %v2212_v25, %v2220_v27 }
0x1481   : > { %v2225_v32 = vmul.f32 1.442695, %v2222_v30 }
0x1483   : > { %3775 = vpow2.f32 %v2225_v32  ;;  %2348 = vadd.xlane.f32.xlu2 %v2347_v33 }
0x1484   : > { %3777 = vpow2.f32 %v2345_v35 }
0x1486   : > { %v2453_v37 = vpop.xlane.xlu1 %2452 }
0x1487   : > { %v2457_v38 = vsub.f32 %v2449_v0, %v2453_v37 }
0x1489   : > { %v4496_v39 = vpop.eup %3775  ;;  %v2459_v42 = vmul.f32 1.442695, %v2457_v38 }
0x148a   : > { %v2230_v43 = vsel %vm2217_vm14, %v4496_v39, 0.0  ;;  %v4500_v45 = vpop.eup %3777 }
0x148b   : > { %3779 = vpow2.f32 %v2459_v42  ;;  %2231 = vadd.xlane.f32.xlu1 %v2230_v43  ;;  %v2350_v48 = vsel %vm2217_vm14, %v4500_v45, 0.0 }
0x148c   : > { %3781 = vpow2.f32 %v2575_v44 }
0x148e   : > { %v2456_v28 = vpop.xlane.xlu1 %2455 }
0x148f   : > { %v2458_v46 = vsub.f32 %v2450_v7, %v2456_v28 }
0x1491   : > { %v4502_v41 = vpop.eup %3779  ;;  %v2461_v47 = vmul.f32 1.442695, %v2458_v46 }
0x1492   : > { %v2463_v49 = vsel %vm2213_vm13, %v4502_v41, 0.0  ;;  %v4508_v40 = vpop.eup %3781 }
0x1493   : > { %3783 = vpow2.f32 %v2461_v47  ;;  %2351 = vadd.xlane.f32.xlu1 %v2350_v48  ;;  %2464 = vadd.xlane.f32.xlu2 %v2463_v49  ;;  %v2579_v52 = vsel %vm2213_vm13, %v4508_v40, 0.0 }
0x1496   : > { %v2572_v63 = vpop.xlane.xlu1 %2571 }
0x1497   : > { %v2574_v18 = vsub.f32 %v2566_v8, %v2572_v63 }
0x1499   : > { %v4510_v50 = vpop.eup %3783  ;;  %v2577_v51 = vmul.f32 1.442695, %v2574_v18 }
0x149a   : > { %v2466_v53 = vsel %vm2217_vm14, %v4510_v50, 0.0 }
0x149b   : > { %3785 = vpow2.f32 %v2577_v51  ;;  %2580 = vadd.xlane.f32.xlu1 %v2579_v52  ;;  %2467 = vadd.xlane.f32.xlu0 %v2466_v53 }
0x14a1   : > { %v4516_v54 = vpop.eup %3785 }
0x14a2   : > { %v2582_v56 = vsel %vm2217_vm14, %v4516_v54, 0.0 }
0x14a3   : > { %2583 = vadd.xlane.f32.xlu2 %v2582_v56 }
0x14ee   : > { %v2229_v57 = vpop.xlane.xlu2 %2228 }
0x14ef   : > { %3787 = vrcp.f32 %v2229_v57  ;;  %v2244_v61 = vand.u32 2147483648, %v2229_v57  ;;  %v2242_v1 = vand.u32 2147483647, %v2229_v57  ;;  %vm2238_vm2 = vweird.f32 %v2229_v57 }
0x14f1   : > { %v2245_v7 = vor.u32 1.1754944e-38, %v2244_v61  ;;  %vm2243_vm8 = vcmp.eq.f32.partialorder %v2242_v1, 8.507059e+37 }
0x14f5   : > { %v3788_v55 = vpop.eup %3787 }
0x14f6   : > { %v2234_v59 = vmul.f32 %v3788_v55, %v2229_v57  ;;  %v2349_v25 = vpop.xlane.xlu2 %2348  ;;  %vm2239_vm15 = vweird.f32 %v3788_v55 }
0x14f7   : > { %3789 = vrcp.f32 %v2349_v25  ;;  %vm2240_vm9 = vmor %vm2238_vm2, %vm2239_vm15  ;;  %v2364_v15 = vand.u32 2147483648, %v2349_v25  ;;  %v2362_v17 = vand.u32 2147483647, %v2349_v25  ;;  %vm2358_vm5 = vweird.f32 %v2349_v25 }
0x14f8   : > { %v2235_v60 = vsub.f32 1.0, %v2234_v59 }
0x14f9   : > { %v2365_v21 = vor.u32 1.1754944e-38, %v2364_v15  ;;  %vm2363_vm10 = vcmp.eq.f32.partialorder %v2362_v17, 8.507059e+37 }
0x14fa   : > { %v2236_v0 = vmul.f32 %v3788_v55, %v2235_v60 }
0x14fc   : > { %v2237_v4 = vadd.f32 %v3788_v55, %v2236_v0 }
0x14fd   : > { %v3790_v5 = vpop.eup %3789 }
0x14fe   : > { %v2241_v9 = vsel %vm2240_vm9, %v3788_v55, %v2237_v4  ;;  %v2354_v10 = vmul.f32 %v3790_v5, %v2349_v25  ;;  %v2232_v11 = vpop.xlane.xlu1 %2231  ;;  %vm2359_vm4 = vweird.f32 %v3790_v5 }
0x14ff   : > { %v2246_v8 = vsel %vm2243_vm8, %v2245_v7, %v2241_v9  ;;  %3791 = vrcp.f32 %v2232_v11  ;;  %vm2360_vm6 = vmor %vm2358_vm5, %vm2359_vm4  ;;  %v2259_v36 = vand.u32 2147483648, %v2232_v11  ;;  %vm2253_vm14 = vweird.f32 %v2232_v11 }
0x1500   : > { %v2355_v13 = vsub.f32 1.0, %v2354_v10  ;;  %v2247_v14 = vmul.f32 %v4488_v22, %v2246_v8  ;;  %v2257_v38 = vand.u32 2147483647, %v2232_v11 }
0x1501   : > { %v2260_v47 = vor.u32 1.1754944e-38, %v2259_v36 }
0x1502   : > { %v2356_v16 = vmul.f32 %v3790_v5, %v2355_v13  ;;  %3496 = vmatmul.msk.f32.vlgmr.msra.gmra.mxu2 %vm2213_vm13, %v2247_v14  ;;  %vm2258_vm2 = vcmp.eq.f32.partialorder %v2257_v38, 8.507059e+37 }
0x1504   : > { %v2357_v26 = vadd.f32 %v3790_v5, %v2356_v16 }
0x1505   : > { %v3792_v20 = vpop.eup %3791 }
0x1506   : > { %v2361_v23 = vsel %vm2360_vm6, %v3790_v5, %v2357_v26  ;;  %v2249_v27 = vmul.f32 %v3792_v20, %v2232_v11  ;;  %v2465_v30 = vpop.xlane.xlu2 %2464  ;;  %v2352_v31 = vpop.xlane.xlu1 %2351  ;;  %vm2254_vm11 = vweird.f32 %v3792_v20 }
0x1507   : > { %v2366_v32 = vsel %vm2363_vm10, %v2365_v21, %v2361_v23  ;;  %3793 = vrcp.f32 %v2465_v30  ;;  %vm2255_vm15 = vmor %vm2253_vm14, %vm2254_vm11  ;;  %v2480_v49 = vand.u32 2147483648, %v2465_v30  ;;  %v2478_v52 = vand.u32 2147483647, %v2465_v30 }
0x1508   : > { %v2250_v33 = vsub.f32 1.0, %v2249_v27  ;;  %3795 = vrcp.f32 %v2352_v31  ;;  %v2367_v22 = vmul.f32 %v4492_v29, %v2366_v32  ;;  %v2379_v57 = vand.u32 2147483648, %v2352_v31 }
0x1509   : > { %vm2474_vm8 = vweird.f32 %v2465_v30  ;;  %v2377_v59 = vand.u32 2147483647, %v2352_v31  ;;  %v2481_v60 = vor.u32 1.1754944e-38, %v2480_v49  ;;  %vm2479_vm6 = vcmp.eq.f32.partialorder %v2478_v52, 8.507059e+37 }
0x150a   : > { %v2251_v35 = vmul.f32 %v3792_v20, %v2250_v33  ;;  %3503 = vmatmul.msk.f32.vlgmr.msrb.gmra.mxu1 %vm2213_vm13, %v2367_v22  ;;  %vm2373_vm10 = vweird.f32 %v2352_v31  ;;  %v2380_v7 = vor.u32 1.1754944e-38, %v2379_v57 }
0x150b   : > { %vm2378_vm14 = vcmp.eq.f32.partialorder %v2377_v59, 8.507059e+37 }
0x150c   : > { %v2252_v37 = vadd.f32 %v3792_v20, %v2251_v35 }
0x150d   : > { %v3794_v62 = vpop.eup %3793 }
0x150e   : > { %v3796_v42 = vpop.eup %3795  ;;  %v2470_v43 = vmul.f32 %v3794_v62, %v2465_v30  ;;  %v4524_v44 = vpop.xlane.xlu0 %2467  ;;  %v2256_v46 = vsel %vm2255_vm15, %v3792_v20, %v2252_v37  ;;  %vm2475_vm9 = vweird.f32 %v3794_v62 }
0x150f   : > { %v4526_v28 = vpop.xlane.xlu1 %2580  ;;  %v2369_v48 = vmul.f32 %v3796_v42, %v2352_v31  ;;  %3797 = vrcp.f32 %v4524_v44  ;;  %v2261_v18 = vsel %vm2258_vm2, %v2260_v47, %v2256_v46  ;;  %vm2374_vm4 = vweird.f32 %v3796_v42  ;;  %vm2476_vm5 = vmor %vm2474_vm8, %vm2475_vm9 }
0x1510   : > { %v2471_v29 = vsub.f32 1.0, %v2470_v43  ;;  %3799 = vrcp.f32 %v4526_v28  ;;  %v2262_v53 = vmul.f32 %v4496_v39, %v2261_v18  ;;  %vm2375_vm11 = vmor %vm2373_vm10, %vm2374_vm4  ;;  %v2495_v11 = vand.u32 2147483648, %v4524_v44 }
0x1511   : > { %v2370_v63 = vsub.f32 1.0, %v2369_v48  ;;  %v2596_v14 = vand.u32 2147483648, %v4526_v28  ;;  %v2493_v20 = vand.u32 2147483647, %v4524_v44  ;;  %v2594_v23 = vand.u32 2147483647, %v4526_v28 }
0x1512   : > { %v2472_v51 = vmul.f32 %v3794_v62, %v2471_v29  ;;  %3497 = vmatmul.msk.f32.gmra.mxu2 %vm2213_vm13, %v2262_v53  ;;  %vm2489_vm9 = vweird.f32 %v4524_v44  ;;  %v2496_v31 = vor.u32 1.1754944e-38, %v2495_v11  ;;  %vm2590_vm8 = vweird.f32 %v4526_v28 }
0x1513   : > { %v2371_v56 = vmul.f32 %v3796_v42, %v2370_v63  ;;  %vm2595_vm10 = vcmp.eq.f32.partialorder %v2594_v23, 8.507059e+37 }
0x1514   : > { %v2473_v55 = vadd.f32 %v3794_v62, %v2472_v51 }
0x1515   : > { %v3798_v25 = vpop.eup %3797  ;;  %v2372_v61 = vadd.f32 %v3796_v42, %v2371_v56 }
0x1516   : > { %v3800_v0 = vpop.eup %3799  ;;  %v2477_v1 = vsel %vm2476_vm5, %v3794_v62, %v2473_v55  ;;  %v2485_v4 = vmul.f32 %v3798_v25, %v4524_v44  ;;  %v2584_v5 = vpop.xlane.xlu2 %2583  ;;  %vm2490_vm15 = vweird.f32 %v3798_v25 }
0x1517   : > { %v2482_v39 = vsel %vm2479_vm6, %v2481_v60, %v2477_v1  ;;  %v2586_v9 = vmul.f32 %v3800_v0, %v4526_v28  ;;  %3801 = vrcp.f32 %v2584_v5  ;;  %v2376_v8 = vsel %vm2375_vm11, %v3796_v42, %v2372_v61  ;;  %vm2491_vm4 = vmor %vm2489_vm9, %vm2490_vm15 }
0x1518   : > { %v2486_v10 = vsub.f32 1.0, %v2485_v4  ;;  %v2381_v15 = vsel %vm2378_vm14, %v2380_v7, %v2376_v8  ;;  %v2483_v16 = vmul.f32 %v4502_v41, %v2482_v39  ;;  %vm2591_vm2 = vweird.f32 %v3800_v0 }
0x1519   : > { %v2587_v13 = vsub.f32 1.0, %v2586_v9  ;;  %v2382_v26 = vmul.f32 %v4500_v45, %v2381_v15  ;;  %vm2592_vm5 = vmor %vm2590_vm8, %vm2591_vm2  ;;  %v2597_v45 = vor.u32 1.1754944e-38, %v2596_v14  ;;  %vm2494_vm6 = vcmp.eq.f32.partialorder %v2493_v20, 8.507059e+37 }
0x151a   : > { %v2487_v17 = vmul.f32 %v3798_v25, %v2486_v10  ;;  %3510 = vmatmul.msk.f32.vlgmr.msrb.gmra.mxu2 %vm2213_vm13, %v2483_v16  ;;  %v2611_v62 = vand.u32 2147483648, %v2584_v5  ;;  %v2609_v44 = vand.u32 2147483647, %v2584_v5  ;;  %vm2605_vm14 = vweird.f32 %v2584_v5 }
0x151b   : > { %v2588_v21 = vmul.f32 %v3800_v0, %v2587_v13  ;;  %3504 = vmatmul.msk.f32.gmra.mxu1 %vm2213_vm13, %v2382_v26 }
0x151c   : > { %v2488_v27 = vadd.f32 %v3798_v25, %v2487_v17  ;;  %v2612_v46 = vor.u32 1.1754944e-38, %v2611_v62  ;;  %vm2610_vm2 = vcmp.eq.f32.partialorder %v2609_v44, 8.507059e+37 }
0x151d   : > { %v3802_v30 = vpop.eup %3801  ;;  %v2589_v41 = vadd.f32 %v3800_v0, %v2588_v21 }
0x151e   : > { %v2601_v32 = vmul.f32 %v3802_v30, %v2584_v5  ;;  %v2492_v33 = vsel %vm2491_vm4, %v3798_v25, %v2488_v27  ;;  %vm2606_vm11 = vweird.f32 %v3802_v30 }
0x151f   : > { %v2593_v22 = vsel %vm2592_vm5, %v3800_v0, %v2589_v41  ;;  %v2497_v35 = vsel %vm2494_vm6, %v2496_v31, %v2492_v33  ;;  %vm2607_vm15 = vmor %vm2605_vm14, %vm2606_vm11 }
0x1520   : > { %v2598_v36 = vsel %vm2595_vm10, %v2597_v45, %v2593_v22  ;;  %v2602_v37 = vsub.f32 1.0, %v2601_v32  ;;  %v2498_v38 = vmul.f32 %v4510_v50, %v2497_v35  ;;  %v3620_v50 = vld [vmem:[%s4762_s3 + $0xb0] sm:$0xff]  ;;  %v3629_v45 = vld [vmem:[%s4740_s4 + $0x28] sm:$0xff]  ;;  %v3628_v22 = vld [vmem:[%s4740_s4 + $0x20] sm:$0xff] }
0x1521   : > { %v2599_v42 = vmul.f32 %v4508_v40, %v2598_v36  ;;  %v3621_v40 = vld [vmem:[%s4762_s3 + $0xb8] sm:$0xff]  ;;  %2756 = vmatpush.bf16.msra.mxu2 %v3629_v45  ;;  %v3817_v35 = vld [vmem:[%s4760_s0] sm:$0xff]  ;;  %s3597_s3 = sshll.u32 %s4046_s30, 5 }
0x1522   : > { %v2603_v43 = vmul.f32 %v3802_v30, %v2602_v37  ;;  %3511 = vmatmul.msk.f32.gmra.mxu2 %vm2213_vm13, %v2498_v38  ;;  %2671 = vmatpush.bf16.msrb.mxu3 %v3621_v40  ;;  %s430_s29 = scalar_lea.vmem %s4746_s10, %s3597_s3  ;;  %s3093_s3 = sshll.u32 %s3089_s20, 4  ;;  %s3094_s3 = int_to_ptr.hbm [resolvable:$true] %s3093_s3 }
0x1523   : > { %3517 = vmatmul.msk.f32.vlgmr.msra.gmra.mxu1 %vm2213_vm13, %v2599_v42 }
0x1524   : > { %v2604_v28 = vadd.f32 %v3802_v30, %v2603_v43 }
0x1525   : > { %2757 = vmatpush.bf16.msra.mxu2 %v3628_v22 }
0x1526   : > { %v2608_v47 = vsel %vm2607_vm15, %v3802_v30, %v2604_v28  ;;  %2672 = vmatpush.bf16.msrb.mxu3 %v3620_v50 }
0x1527   : > { %v2613_v48 = vsel %vm2610_vm2, %v2612_v46, %v2608_v47 }
0x1528   : > { %v2614_v29 = vmul.f32 %v4516_v54, %v2613_v48 }
0x1529   : > { %2975 = vmatpush.msrb.mxu2 %v3817_v35 }
0x152b   : > { %3518 = vmatmul.msk.f32.gmra.mxu1 %vm2213_vm13, %v2614_v29 }
0x1585   : > { %v2290_v49 = vpop.f32.mrf.mxu2 }
0x1586   : > { %v2296_v56 = vmul.f32 %v2290_v49, %v4103_v2 }
0x1587   : > { %v2406_v63 = vpop.f32.mrf.mxu1 }
0x1588   : > { %v2412_v54 = vmul.f32 %v2406_v63, %v4119_v12  ;;  %v2725_v63 = vperm.slane %v4436_v58, 6 }
0x158a   : > { %v2414_v59 = vadd.f32 %v2412_v54, %v2296_v56 }
0x1595   : > { %v2293_v18 = vpop.f32.mrf.mxu2 }
0x1596   : > { %v2297_v25 = vmul.f32 %v2293_v18, %v4103_v2 }
0x1598   : > { %v2409_v51 = vpop.f32.mrf.mxu1 }
0x1599   : > { %v2413_v57 = vmul.f32 %v2409_v51, %v4119_v12  ;;  %v2649_v12 = vperm.slane %v4436_v58, 5 }
0x159b   : > { %v2415_v61 = vadd.f32 %v2413_v57, %v2297_v25 }
0x159d   : > { %v2522_v52 = vpop.f32.mrf.mxu2 }
0x159e   : > { %v2528_v55 = vmul.f32 %v2522_v52, %v4105_v3 }
0x15a0   : > { %v2638_v53 = vpop.f32.mrf.mxu1  ;;  %v2530_v0 = vadd.f32 %v2528_v55, %v2414_v59 }
0x15a1   : > { %v2644_v1 = vmul.f32 %v2638_v53, %v4107_v6  ;;  %v2728_v53 = vperm.slane %v4436_v58, 7  ;;  %v3651_v58 = vld [vmem:[%s4741_s5 + $0xa8] sm:$0xff] }
0x15a3   : > { %v2646_v9 = vadd.f32 %v2644_v1, %v2530_v0  ;;  %v3650_v0 = vld [vmem:[%s4741_s5 + $0xa0] sm:$0xff]  ;;  %v3649_v1 = vld [vmem:[%s4741_s5 + $0x98] sm:$0xff] }
0x15a5   : > { %v2525_v60 = vpop.f32.mrf.mxu2 }
0x15a6   : > { %v2529_v4 = vmul.f32 %v2525_v60, %v4105_v3  ;;  %v3653_v60 = vld [vmem:[%s4741_s5 + $0xb8] sm:$0xff] }
0x15a7   : > { %2832 = vmatpush.bf16.msrb.mxu0 %v3653_v60  ;;  %v3667_v60 = vld [vmem:[%s4745_s9 + $0x4] sm:$0xf0] }
0x15a8   : > { %v2641_v5 = vpop.f32.mrf.mxu1  ;;  %v2531_v39 = vadd.f32 %v2529_v4, %v2415_v61  ;;  %v3652_v61 = vld [vmem:[%s4741_s5 + $0xb0] sm:$0xff] }
0x15a9   : > { %v2645_v7 = vmul.f32 %v2641_v5, %v4107_v6  ;;  %v3648_v4 = vld [vmem:[%s4741_s5 + $0x90] sm:$0xff]  ;;  %v3717_v5 = vld [vmem:[%s4742_s6 + $0x2] ss:$0 sm:$0xff] }
0x15ab   : > { %v2647_v10 = vadd.f32 %v2645_v7, %v2531_v39  ;;  %2833 = vmatpush.bf16.msrb.mxu0 %v3652_v61  ;;  %v3647_v39 = vld [vmem:[%s4741_s5 + $0x88] sm:$0xff]  ;;  %v3666_v61 = vld [vmem:[%s4745_s9 + $0x4] sm:$0xf] }
0x15ad   : > { %v2648_v11 = vpack.c.bf16 %v2647_v10, %v2646_v9  ;;  %v3646_v9 = vld [vmem:[%s4741_s5 + $0x80] sm:$0xff] }
0x15af   : > { %3527 = vmatmul.msk.bf16.vlgmr.msrb.gmra.mxu3 %vm779_vm7, %v2648_v11  ;;  %2834 = vmatpush.bf16.msrb.mxu0 %v3651_v58  ;;  %v3573_v58 = vld [vmem:[%s4745_s9 + $0x8] sm:$0xf0] }
0x15b3   : > { %2835 = vmatpush.bf16.msrb.mxu0 %v3650_v0 }
0x15b7   : > { %2836 = vmatpush.bf16.msrb.mxu0 %v3649_v1  ;;  %v3576_v1 = vor.u32 %v3666_v61, %v3573_v58 }
0x15bb   : > { %2837 = vmatpush.bf16.msrb.mxu0 %v3648_v4 }
0x15bf   : > { %2838 = vmatpush.bf16.msrb.mxu0 %v3647_v39 }
0x15c3   : > { %2839 = vmatpush.bf16.msrb.mxu0 %v3646_v9 }
0x1632   : > { %v2674_v8 = vpop.f32.mrf.mxu3 }
0x1633   : > { %v2675_v2 = vadd.f32 %v2674_v8, %v2649_v12 }
0x1635   : > { %v4568_v13 = vadd.f32 %v2675_v2, %v4399_v19 }
0x1637   : > { %v2681_v14 = vsel %vm779_vm7, %v4568_v13, 0.0 }
0x1638   : > { %2682 = vadd.xlane.f32.xlu0 %v2681_v14 }
0x163a   : > { %v2676_v3 = vpop.f32.mrf.mxu3 }
0x163b   : > { %v2677_v15 = vadd.f32 %v2676_v3, %v2649_v12 }
0x163d   : > { %v4573_v6 = vadd.f32 %v2677_v15, %v4403_v24 }
0x163f   : > { %v2684_v16 = vsel %vm2039_vm3, %v4573_v6, 0.0 }
0x1640   : > { %2685 = vadd.xlane.f32.xlu1 %v2684_v16 }
0x16ab   : > { %v2683_v17 = vpop.xlane.xlu0 %2682 }
0x16ac   : > { %v2687_v26 = vmul.f32 %v2683_v17, %v4066_v34 }
0x16ae   : > { %v2689_v20 = vsub.f32 %v4568_v13, %v2687_v26 }
0x16b0   : > { %v2691_v19 = vmul.f32 %v2689_v20, %v2689_v20 }
0x16b2   : > { %v2693_v21 = vsel %vm779_vm7, %v2691_v19, 0.0 }
0x16b3   : > { %v2686_v23 = vpop.xlane.xlu1 %2685  ;;  %2694 = vadd.xlane.f32.xlu2 %v2693_v21 }
0x16b4   : > { %v2688_v27 = vmul.f32 %v2686_v23, %v4066_v34 }
0x16b6   : > { %v2690_v30 = vsub.f32 %v4573_v6, %v2688_v27 }
0x16b8   : > { %v2692_v24 = vmul.f32 %v2690_v30, %v2690_v30 }
0x16ba   : > { %v2696_v31 = vsel %vm2039_vm3, %v2692_v24, 0.0 }
0x16bb   : > { %2697 = vadd.xlane.f32.xlu0 %v2696_v31 }
0x1726   : > { %v2695_v41 = vpop.xlane.xlu2 %2694 }
0x1727   : > { %v2699_v32 = vmul.f32 %v2695_v41, %v4066_v34 }
0x1729   : > { %v2701_v33 = vadd.f32 1e-06, %v2699_v32 }
0x172b   : > { %3803 = vrsqrt.f32 %v2701_v33  ;;  %vm2709_vm8 = vweird.f32 %v2701_v33 }
0x172e   : > { %v2698_v36 = vpop.xlane.xlu0 %2697 }
0x172f   : > { %v2700_v37 = vmul.f32 %v2698_v36, %v4066_v34 }
0x1731   : > { %v3804_v38 = vpop.eup %3803  ;;  %v2702_v62 = vadd.f32 1e-06, %v2700_v37 }
0x1732   : > { %v2704_v42 = vmul.f32 %v3804_v38, %v2701_v33  ;;  %vm2710_vm9 = vweird.f32 %v3804_v38  ;;  %v3818_v33 = vld [vmem:[%s4743_s7 + $0x28] sm:$0xff] }
0x1733   : > { %3805 = vrsqrt.f32 %v2702_v62  ;;  %vm2711_vm4 = vmor %vm2709_vm8, %vm2710_vm9  ;;  %vm2719_vm6 = vweird.f32 %v2702_v62  ;;  %v2783_v22 = vperm.slane %v3818_v33, 0 }
0x1734   : > { %v2705_v43 = vmul.f32 %v3804_v38, %v2704_v42 }
0x1736   : > { %v2706_v44 = vmul.f32 0.5, %v2705_v43 }
0x1738   : > { %v2707_v28 = vsub.f32 1.5, %v2706_v44 }
0x1739   : > { %v3806_v46 = vpop.eup %3805 }
0x173a   : > { %v2708_v47 = vmul.f32 %v3804_v38, %v2707_v28  ;;  %v2714_v48 = vmul.f32 %v3806_v46, %v2702_v62  ;;  %vm2720_vm5 = vweird.f32 %v3806_v46 }
0x173b   : > { %vm2721_vm10 = vmor %vm2719_vm6, %vm2720_vm5 }
0x173c   : > { %v2715_v29 = vmul.f32 %v3806_v46, %v2714_v48  ;;  %v2712_v40 = vsel %vm2711_vm4, %v3804_v38, %v2708_v47 }
0x173d   : > { %v2723_v18 = vmul.f32 %v2712_v40, %v2689_v20 }
0x173e   : > { %v2716_v50 = vmul.f32 0.5, %v2715_v29 }
0x173f   : > { %v2726_v54 = vmul.f32 %v2725_v63, %v2723_v18  ;;  %v3669_v18 = vld [vmem:[%s4745_s9 + $0x14] sm:$0xf0] }
0x1740   : > { %v2717_v49 = vsub.f32 1.5, %v2716_v50 }
0x1741   : > { %v2729_v55 = vadd.f32 %v2728_v53, %v2726_v54  ;;  %v3581_v54 = vld [vmem:[%s4745_s9 + $0x18] sm:$0xf0] }
0x1742   : > { %v2718_v51 = vmul.f32 %v3806_v46, %v2717_v49 }
0x1744   : > { %v2722_v52 = vsel %vm2721_vm10, %v3806_v46, %v2718_v51  ;;  %v3668_v51 = vld [vmem:[%s4745_s9 + $0x14] sm:$0xf] }
0x1745   : > { %v2724_v56 = vmul.f32 %v2722_v52, %v2690_v30 }
0x1747   : > { %v2727_v57 = vmul.f32 %v2725_v63, %v2724_v56 }
0x1749   : > { %v2730_v59 = vadd.f32 %v2728_v53, %v2727_v57  ;;  %v3584_v57 = vor.u32 %v3668_v51, %v3581_v54 }
0x174b   : > { %v2731_v25 = vpack.c.bf16 %v2730_v59, %v2729_v55  ;;  %2946 = vmatpush.bf16.msra.mxu3 %v3584_v57  ;;  %v449_v59 = vld [vmem:[%s4763_s2 + $0x28] sm:$0xff] }
0x174d   : > { %3536 = vmatmul.msk.bf16.vlgmr.msra.gmra.mxu2 %vm779_vm7, %v2731_v25  ;;  %v3571_v25 = vld [vmem:[%s4745_s9] sm:$0xf] }
0x174e   : > { %v3572_v0 = vor.u32 %v3667_v60, %v3571_v25  ;;  %v3887_v60 = vmov 192.0  }
0x174f   : > { %2947 = vmatpush.bf16.msra.mxu3 %v3576_v1 }
0x175d   : > { %3587 = vmatmul.msk.f32.vlgmr.msrb.gmra.mxu2 %vm707_vm1, %v449_v59 }
0x17d0   : > { %v2759_v7 = vpop.f32.mrf.mxu2 }
0x17d1   : > { %v2760_v10 = vadd.f32 %v3717_v5, %v2759_v7  ;;  %v450_v7 = vld [vmem:[%s4763_s2 + $0x30] sm:$0xff]  ;;  %s3841_s2 = scalar_lea.hbm %s4747_s11, 4 }
0x17d2   : > { %3588 = vmatmul.msk.f32.gmra.mxu2 %vm707_vm1, %v450_v7 }
0x17d3   : > { %v2764_v11 = vmul.f32 %v2760_v10, %v2760_v10 }
0x17d5   : > { %v2766_v12 = vmul.f32 %v2764_v11, %v2760_v10 }
0x17d7   : > { %v2768_v8 = vmul.f32 0.044715, %v2766_v12 }
0x17d8   : > { %v2761_v2 = vpop.f32.mrf.mxu2 }
0x17d9   : > { %v2770_v14 = vadd.f32 %v2768_v8, %v2760_v10  ;;  %v2762_v3 = vadd.f32 %v3717_v5, %v2761_v2  ;;  %v3819_v5 = vld [vmem:[%s4760_s0 + $0x8] sm:$0xff] }
0x17db   : > { %v2772_v15 = vmul.f32 0.7978846, %v2770_v14  ;;  %v2765_v16 = vmul.f32 %v2762_v3, %v2762_v3 }
0x17dd   : > { %v2767_v17 = vmul.f32 %v2765_v16, %v2762_v3  ;;  %3807 = vtanh.f32 %v2772_v15 }
0x17df   : > { %v2769_v26 = vmul.f32 0.044715, %v2767_v17 }
0x17e1   : > { %v2771_v20 = vadd.f32 %v2769_v26, %v2762_v3 }
0x17e3   : > { %v2773_v19 = vmul.f32 0.7978846, %v2771_v20  ;;  %v3808_v21 = vpop.eup %3807  ;;  %v3820_v20 = vld [vmem:[%s4743_s7 + $0x30] sm:$0xff] }
0x17e4   : > { %v2776_v23 = vadd.f32 1.0, %v3808_v21 }
0x17e5   : > { %3809 = vtanh.f32 %v2773_v19  ;;  %v2892_v19 = vperm.slane %v3820_v20, 7 }
0x17e6   : > { %v2778_v30 = vmul.f32 0.5, %v2776_v23 }
0x17e8   : > { %v2780_v41 = vmul.f32 %v2778_v30, %v2760_v10  ;;  %v3718_v30 = vld [vmem:[%s4743_s7 + $0x38] ss:$0 sm:$0xff] }
0x17eb   : > { %v3810_v27 = vpop.eup %3809 }
0x17ec   : > { %v2777_v24 = vadd.f32 1.0, %v3810_v27 }
0x17ee   : > { %v2779_v31 = vmul.f32 0.5, %v2777_v24 }
0x17f0   : > { %v2781_v45 = vmul.f32 %v2779_v31, %v2762_v3 }
0x17f2   : > { %v2782_v32 = vpack.c.bf16 %v2781_v45, %v2780_v41 }
0x17f4   : > { %2840 = vmatmul.bf16.vlgmr.msrb.gmra.mxu0 %v2782_v32 }
0x1871   : > { %v2841_v35 = vpop.f32.mrf.mxu0 }
0x1872   : > { %v2842_v36 = vadd.f32 %v2841_v35, %v2783_v22 }
0x1874   : > { %v2846_v37 = vadd.f32 %v2842_v36, %v4568_v13 }
0x1876   : > { %v2848_v38 = vsel %vm779_vm7, %v2846_v37, 0.0 }
0x1877   : > { %2849 = vadd.xlane.f32.xlu1 %v2848_v38 }
0x1879   : > { %v2843_v62 = vpop.f32.mrf.mxu0 }
0x187a   : > { %v2844_v42 = vadd.f32 %v2843_v62, %v2783_v22  ;;  %v602_v22 = vld [vmem:[%s4745_s9 + $0x20] sm:$0x11] }
0x187b   : > { %v2899_v35 = vunpack.c.l.bf16 %v602_v22 }
0x187c   : > { %v2847_v43 = vadd.f32 %v2844_v42, %v4573_v6  ;;  %v3579_v6 = vld [vmem:[%s4745_s9 + $0x10] sm:$0xf] }
0x187d   : > { %v3580_v53 = vor.u32 %v3669_v18, %v3579_v6  ;;  %v2901_v36 = vperm.slane %v2899_v35, 0 }
0x187e   : > { %v2851_v44 = vsel %vm2039_vm3, %v2847_v43, 0.0 }
0x187f   : > { %2852 = vadd.xlane.f32.xlu2 %v2851_v44  ;;  %2932 = vmatpush.bf16.msrb.mxu1 %v3580_v53 }
0x1883   : > { %2933 = vmatpush.bf16.msrb.mxu1 %v3572_v0 }
0x1887   : > { %2998 = vmatpush.msra.mxu1 %v3819_v5 }
0x18ea   : > { %v2850_v28 = vpop.xlane.xlu1 %2849 }
0x18eb   : > { %v2854_v46 = vmul.f32 %v2850_v28, %v4066_v34  ;;  %v2977_v28 = vpop.f32.mrf.mxu2 }
0x18ed   : > { %v2856_v47 = vsub.f32 %v2846_v37, %v2854_v46  ;;  %v2900_v37 = vunpack.c.h.bf16 %v602_v22 }
0x18ef   : > { %v2858_v48 = vmul.f32 %v2856_v47, %v2856_v47  ;;  %v2902_v42 = vperm.slane %v2900_v37, 0 }
0x18f1   : > { %v2860_v29 = vsel %vm779_vm7, %v2858_v48, 0.0 }
0x18f2   : > { %v2853_v40 = vpop.xlane.xlu2 %2852  ;;  %2861 = vadd.xlane.f32.xlu0 %v2860_v29 }
0x18f3   : > { %v2855_v13 = vmul.f32 %v2853_v40, %v4066_v34 }
0x18f5   : > { %v2857_v50 = vsub.f32 %v2847_v43, %v2855_v13 }
0x18f7   : > { %v2859_v49 = vmul.f32 %v2857_v50, %v2857_v50 }
0x18f9   : > { %v2863_v63 = vsel %vm2039_vm3, %v2859_v49, 0.0  ;;  %v2980_v49 = vpop.f32.mrf.mxu2 }
0x18fa   : > { %2864 = vadd.xlane.f32.xlu1 %v2863_v63 }
0x1965   : > { %v2862_v52 = vpop.xlane.xlu0 %2861 }
0x1966   : > { %v2866_v56 = vmul.f32 %v2862_v52, %v4066_v34 }
0x1968   : > { %v2868_v55 = vadd.f32 1e-06, %v2866_v56 }
0x196a   : > { %3811 = vrsqrt.f32 %v2868_v55  ;;  %vm2876_vm11 = vweird.f32 %v2868_v55 }
0x196d   : > { %v2865_v4 = vpop.xlane.xlu1 %2864 }
0x196e   : > { %v2867_v39 = vmul.f32 %v2865_v4, %v4066_v34 }
0x1970   : > { %v3812_v9 = vpop.eup %3811  ;;  %v2869_v10 = vadd.f32 1e-06, %v2867_v39 }
0x1971   : > { %v2871_v11 = vmul.f32 %v3812_v9, %v2868_v55  ;;  %vm2877_vm3 = vweird.f32 %v3812_v9 }
0x1972   : > { %3813 = vrsqrt.f32 %v2869_v10  ;;  %vm2878_vm14 = vmor %vm2876_vm11, %vm2877_vm3  ;;  %vm2886_vm2 = vweird.f32 %v2869_v10 }
0x1973   : > { %v2872_v12 = vmul.f32 %v3812_v9, %v2871_v11  ;;  %3815 = vrcp.f32 %v3887_v60  ;;  %v443_v11 = vld [vmem:[%s4055_s19 + $0x28] sm:$0xff] }
0x1975   : > { %v2873_v8 = vmul.f32 0.5, %v2872_v12 }
0x1977   : > { %v2874_v2 = vsub.f32 1.5, %v2873_v8 }
0x1978   : > { %v3814_v14 = vpop.eup %3813 }
0x1979   : > { %v2875_v3 = vmul.f32 %v3812_v9, %v2874_v2  ;;  %v2881_v15 = vmul.f32 %v3814_v14, %v2869_v10  ;;  %vm2887_vm15 = vweird.f32 %v3814_v14  ;;  %v3816_v61 = vpop.eup %3815 }
0x197a   : > { %vm2888_vm9 = vmor %vm2886_vm2, %vm2887_vm15  ;;  %v3025_v58 = vmul.f32 192.0, %v3816_v61 }
0x197b   : > { %v2882_v16 = vmul.f32 %v3814_v14, %v2881_v15  ;;  %v2879_v34 = vsel %vm2878_vm14, %v3812_v9, %v2875_v3 }
0x197c   : > { %v2890_v21 = vmul.f32 %v2879_v34, %v2856_v47  ;;  %v3026_v0 = vsub.f32 1.0, %v3025_v58 }
0x197d   : > { %v2883_v17 = vmul.f32 0.5, %v2882_v16 }
0x197e   : > { %v2893_v24 = vmul.f32 %v2892_v19, %v2890_v21  ;;  %v3027_v1 = vmul.f32 %v3816_v61, %v3026_v0 }
0x197f   : > { %v2884_v26 = vsub.f32 1.5, %v2883_v17 }
0x1980   : > { %v2896_v45 = vadd.f32 %v3718_v30, %v2893_v24  ;;  %v3028_v4 = vadd.f32 %v3816_v61, %v3027_v1 }
0x1981   : > { %v2885_v23 = vmul.f32 %v3814_v14, %v2884_v26 }
0x1983   : > { %v2889_v27 = vsel %vm2888_vm9, %v3814_v14, %v2885_v23 }
0x1984   : > { %v2891_v31 = vmul.f32 %v2889_v27, %v2857_v50 }
0x1986   : > { %v2894_v41 = vmul.f32 %v2892_v19, %v2891_v31 }
0x1988   : > { %v2897_v32 = vadd.f32 %v3718_v30, %v2894_v41 }
0x198a   : > { %v2898_v33 = vpack.c.bf16 %v2897_v32, %v2896_v45 }
0x198c   : > { %3585 = vmatmul.msk.bf16.vlgmr.msrb.gmra.mxu1 %vm779_vm7, %v2898_v33  ;;  %3586 = vmatmul.msk.bf16.vlgmr.msra.gmra.mxu3 %vm779_vm7, %v2898_v33 }
0x199c   : > { %3589 = vmatmul.msk.f32.vlgmr.msra.gmra.mxu1 %vm707_vm1, %v449_v59 }
0x19a4   : > { %3590 = vmatmul.msk.f32.gmra.mxu1 %vm707_vm1, %v450_v7  ;;  %vm3019_vm1 = vcmask 517120  }
0x1a09   : > { %v2935_v38 = vpop.f32.mrf.mxu1 }
0x1a0a   : > { %v2936_v62 = vadd.f32 %v2935_v38, %v2901_v36 }
0x1a0c   : > { %3059 = vst [vmem:[%s430_s29] sm:$0xff] %v2936_v62  ;;  %v3006_v40 = vsub.f32 %v2936_v62, %v2977_v28 }
0x1a0e   : > { %v3010_v6 = vmul.f32 %v3006_v40, %v3006_v40 }
0x1a0f   : > { %v2949_v43 = vpop.f32.mrf.mxu3 }
0x1a10   : > { %v2950_v44 = vadd.f32 %v2949_v43, %v2902_v42 }
0x1a11   : > { %v2937_v46 = vpop.f32.mrf.mxu1 }
0x1a12   : > { %3060 = vst.msk [vmem:[%s430_s29 + $0x8] sm:$0xff] %vm677_vm0, %v2950_v44  ;;  %v2938_v47 = vadd.f32 %v2937_v46, %v2901_v36 }
0x1a14   : > { %3061 = vst [vmem:[%s430_s29 + $0x10] sm:$0x3] %v2938_v47  ;;  %v3008_v18 = vsub.f32 %v2938_v47, %v2980_v49 }
0x1a16   : > { %v3012_v54 = vmul.f32 %v3008_v18, %v3008_v18 }
0x1a17   : > { %v2951_v48 = vpop.f32.mrf.mxu3 }
0x1a18   : > { %v2952_v29 = vadd.f32 %v2951_v48, %v2902_v42  ;;  %v3018_v55 = vsel %vm2269_vm12, %v3012_v54, 0.0 }
0x1a19   : > { %v3000_v13 = vpop.f32.mrf.mxu1 }
0x1a1a   : > { %v3007_v50 = vsub.f32 %v2950_v44, %v3000_v13  ;;  %3062 = vst.msk [vmem:[%s430_s29 + $0x18] sm:$0x3] %vm3019_vm1, %v2952_v29  ;;  %s3835_s29 = sshra.s32 %s3094_s3, 4  ;;  %s3836_s29 = int_to_ptr.hbm [resolvable:$true] %s3835_s29 }
0x1a1b   : > { %s3837_s0 = scalar_lea.hbm %s3836_s29, 2  ;;  %p3842_p0 = scmp.lt.s32.totalorder %s3836_s29, %s4747_s11 }
0x1a1c   : > { %v3011_v63 = vmul.f32 %v3007_v50, %v3007_v50  ;;  %p3838_p11 = scmp.ne.s32.totalorder %s3836_s29, %s3837_s0  ;;  %p3843_p1 = scmp.lt.s32.totalorder %s3841_s2, %s3837_s0 }
0x1a1e   : > { %v3014_v51 = vsel %vm677_vm0, %v3011_v63, 0.0  ;;  %vm3029_vm0 = vweird.f32 %v3816_v61  ;;  %p3839_p12 = pnand %p3838_p11, %p3991_p5  ;;  %p3844_p2 = por %p3843_p1, %p3842_p0 }
0x1a1f   : > { %v3015_v52 = vadd.f32 %v3014_v51, %v3010_v6  ;;  %v3030_v5 = vsel %vm3029_vm0, %v3816_v61, %v3028_v4 }
0x1a20   : > { %p3840_p13 = pneg %p3839_p12 }
0x1a21   : > { %v3003_v53 = vpop.f32.mrf.mxu1  ;;  %3016 = vadd.xlane.f32.xlu0 %v3015_v52 }
0x1a22   : > { %v3009_v56 = vsub.f32 %v2952_v29, %v3003_v53  ;;  %p3845_p3 = pnand %p3844_p2, %p3840_p13 }
0x1a24   : > { %v3013_v57 = vmul.f32 %v3009_v56, %v3009_v56 }
0x1a26   : > { %v3020_v59 = vsel %vm3019_vm1, %v3013_v57, 0.0 }
0x1a27   : > { %v3021_v25 = vadd.f32 %v3020_v59, %v3018_v55 }
0x1a29   : > { %3022 = vadd.xlane.f32.xlu2 %v3021_v25 }
0x1a94   : > { %v3017_v39 = vpop.xlane.xlu0 %3016 }
0x1a95   : > { %v3031_v10 = vmul.f32 %v3030_v5, %v3017_v39 }
0x1a9c   : > { %v3023_v7 = vpop.xlane.xlu2 %3022 }
0x1a9d   : > { %v3032_v9 = vmul.f32 %v3030_v5, %v3023_v7 }
0x1a9f   : > { %3591 = vmatpush.msk.msrb.mxu3 %vm2269_vm12, %v3032_v9 }
0x1aa1   : > { %3054 = vmatpush.msrb.mxu3 %v3031_v10 }
0x1aa2   : > { %3592 = vmatmul.msk.f32.vlgmr.msrb.gmra.mxu3 %vm2213_vm13, %v443_v11 }
0x1aa3   : > { %3848 = shalt.err (!%p3845_p3)
}
0x1aa4   : > { %3671 = dma.vmem_to_hbm [thread:$0]  (%p3991_p5), %s3092_s28, 32, %s3094_s3, %s3072_s1   ;;  %vm3064_vm7 = vcmask 1024  }
0x1aa5   : > { %s3213_s8 = sshll.u32 %s4046_s30, 1 }
0x1aa6   : > { %s434_s26 = scalar_lea.vmem %s4748_s12, %s3213_s8 }
0x1b25   : > { %v3056_v12 = vpop.f32.mrf.mxu3 }
0x1b26   : > { %3065 = vst.msk [vmem:[%s434_s26] sm:$0x3] %vm3064_vm7, %v3056_v12 }
0x1b27 PF: > { %p3677_p4 = scmp.ge.s32.totalorder %s3883_s24, 2  ;;  %s3116_s0 = sand.u32 1, %s3871_s21  }
0x1b28   : > { %s3117_s2 = scalar_lea.sflag [#allocation3], %s3116_s0 }
0x1b29   : > { %p3674_p7 = pnand %p3677_p4, %p3995_p6 }
0x1b2b   : > { %p3675_p8 = pneg %p3674_p7 }
0x1b2d   : > { %3866 = dma.done.wait (%p3675_p8), %s3117_s2, 32  }
0x1b2e   : > { %3868 = vsyncadd (%p3675_p8), %s3117_s2, 4294967264  ;;  %s4766_s13 = sld [smem:[#allocation5_spill]]  ;;  %p23_p5 = scmp.ge.s32.totalorder %s3978_s27, 4  }
0x1b2f   : > { %s4767_s21 = smov %s3875_s22  ;;  %s4768_s22 = smov %s3879_s23 }
0x1b30   : > { %s4770_s24 = smov %s3978_s27  ;;  %25 = sbr.rel (!%p23_p5) target bundleno = 9 (0x9), region = 119 }
0x1b34   : > { %s4769_s23 = smov %s4766_s13 }
0x1b35   :  { %3130 = vsyncpa [#allocation3], 1 }
0x1b36   :  { %3132 = vsyncpa [#allocation3 + $0x1], 1 }

</bundles_post_ra>
